<compile_context>
chip_gen: v7x
topology: tpu7x:2x2x1
jax: 0.10.0
libtpu: 0.0.40
codegen_flags: <defaults>
</compile_context>

<pallas_src>
import math

import numpy as np
import jax
import jax.numpy as jnp
from jax import lax
from jax.experimental import pallas as pl
from jax.experimental.pallas import tpu as pltpu

MASK_SIZE = 16          # spec default -> conv1 out 14 -> pool 7 -> conv2 out 3 -> pool 1
IN_OBS = 8192           # fc_observation input features
D_OUT = 512
FLAT_INPUT = 16         # 16 * conv2_output^2 = 16 * 1 * 1
TK = 2048               # fc_observation K tile -> grid of 4 steps, 2 MiB bf16 per block


# ------------------------- static pooling-aware im2col index ----------------------------

def _build_pool_im2col_index_padded():
    """idx[8*d + pr, 9*pc + 3*kh + kw] = flat index of z[2*pr+dr+kh, 2*pc+dc+kw], with
    d = 2*dr + dc the position inside the 2x2 maxpool window (after the 3x3 conv1).
    Rows 8*d + 7 are sublane padding and point at the zero sentinel (index 256)."""
    idx = np.full((32, 63), MASK_SIZE * MASK_SIZE, np.int32)
    for d in range(4):
        dr, dc = d // 2, d % 2
        for pr in range(7):
            for pc in range(7):
                for kh in range(3):
                    for kw in range(3):
                        r = 2 * pr + dr + kh
                        c = 2 * pc + dc + kw
                        idx[8 * d + pr, 9 * pc + 3 * kh + kw] = r * MASK_SIZE + c
    return idx


_X1_IDX = _build_pool_im2col_index_padded()


# ----------------------------------- fused kernel ----------------------------------------

def _fused_forward_kernel(x_ref, x1_ref,
                          wobs_ref, bobs_ref,
                          w1bd_ref, b1_ref,
                          w2b_ref, b2_ref,
                          wmx_ref, wmz_ref, bm_ref,
                          o_ref, acc_ref, zfeat_ref):
    k = pl.program_id(0)

    # ---- first K step: zero the accumulator and run the tiny conv branch so it overlaps
    #      with the w_obs weight DMA of the remaining K tiles ----
    @pl.when(k == 0)
    def _():
        acc_ref[...] = jnp.zeros_like(acc_ref)

        # conv1 (1->8, 3x3) + ReLU + 2x2/2 maxpool: one (32,63)@(63,56) matmul.
        # x1 rows are the 4 pool offsets on 8-aligned sublane groups (row 8d+7 = zero pad);
        # w1bd is block-diagonal, output col = 8*pc + ci.
        c1 = jnp.dot(x1_ref[...], w1bd_ref[...],
                     preferred_element_type=jnp.float32)            # (32, 56)
        c1m = jnp.maximum(jnp.maximum(c1[0:8], c1[8:16]),
                          jnp.maximum(c1[16:24], c1[24:32]))         # (8, 56), row 7 = pad
        pooled1 = jnp.maximum(c1m + b1_ref[...], 0.0)                # rows 0..6 valid

        # conv2 (8->16, 5x5) + ReLU + 2x2/2 maxpool: 5 banded matmuls (3,56)@(56,48).
        # w2b[kh][8*pc + ci, 16*c2 + oc] = w2[oc, ci, kh, pc - c2] (zero outside band).
        acc2 = jnp.dot(pooled1[0:3, :], w2b_ref[0],
                       preferred_element_type=jnp.float32)           # (3, 48)
        for kh in range(1, 5):
            acc2 = acc2 + jnp.dot(pooled1[kh:kh + 3, :], w2b_ref[kh],
                                  preferred_element_type=jnp.float32)
        c2 = jnp.maximum(acc2 + b2_ref[...], 0.0)                    # (3, 48): [r2, 16*c2+oc]
        # 2x2/2 maxpool of the 3x3 map keeps only r2, c2 in {0, 1}
        m = jnp.maximum(c2[0:2, 0:16], c2[0:2, 16:32])               # (2, 16)
        zfeat_ref[...] = jnp.maximum(m[0:1, :], m[1:2, :])           # (1, 16)

    # ---- fc_observation K tile: (1, TK) bf16 x (TK, 512) bf16 -> f32 accumulate ----
    acc_ref[...] += jnp.dot(x_ref[...].astype(jnp.bfloat16), wobs_ref[...],
                            preferred_element_type=jnp.float32)

    # ---- last K step: bias + ReLU, fc_merge (split, no lane concat), final ReLU ----
    @pl.when(k == pl.num_programs(0) - 1)
    def _():
        h = jnp.maximum(acc_ref[...] + bobs_ref[...], 0.0)           # (1, 512)
        y = (jnp.dot(h.astype(jnp.bfloat16), wmx_ref[...],
                     preferred_element_type=jnp.float32)
             + jnp.dot(zfeat_ref[...].astype(jnp.bfloat16), wmz_ref[...],
                       preferred_element_type=jnp.float32)
             + bm_ref[...])
        o_ref[...] = jnp.maximum(y, 0.0)                             # (1, 512) lane-dense


# ----------------------------------- forward wrapper -------------------------------------

def word2vec_notarget_forward(params, x, z):
    """x: any shape flattening to 8192; z: (1, 1, 16, 16) NCHW. Returns (512,)."""
    x_row = x.reshape(1, IN_OBS)                                     # (1, 8192)
    z_pad = jnp.concatenate([z.reshape(-1), jnp.zeros((1,), z.dtype)])
    x1 = z_pad[_X1_IDX]                                              # (32, 63) tiny gather

    nk = IN_OBS // TK
    grid_spec = pltpu.PrefetchScalarGridSpec(
        num_scalar_prefetch=0,
        grid=(nk,),
        in_specs=[
            pl.BlockSpec((1, TK), lambda k: (0, k)),                 # x_row     (K-tiled)
            pl.BlockSpec((32, 63), lambda k: (0, 0)),                # x1        (resident)
            pl.BlockSpec((TK, D_OUT), lambda k: (k, 0)),             # w_obs     (K-tiled)
            pl.BlockSpec((1, D_OUT), lambda k: (0, 0)),              # b_obs
            pl.BlockSpec((63, 56), lambda k: (0, 0)),                # w1bd
            pl.BlockSpec((1, 56), lambda k: (0, 0)),                 # b1row
            pl.BlockSpec((5, 56, 48), lambda k: (0, 0, 0)),          # w2band
            pl.BlockSpec((1, 48), lambda k: (0, 0)),                 # b2row
            pl.BlockSpec((D_OUT, D_OUT), lambda k: (0, 0)),          # wm_x
            pl.BlockSpec((FLAT_INPUT, D_OUT), lambda k: (0, 0)),     # wm_z
            pl.BlockSpec((1, D_OUT), lambda k: (0, 0)),              # b_m
        ],
        out_specs=pl.BlockSpec((1, D_OUT), lambda k: (0, 0)),
        scratch_shapes=[
            pltpu.VMEM((1, D_OUT), jnp.float32),                     # fc_observation acc
            pltpu.VMEM((1, FLAT_INPUT), jnp.float32),                # conv-branch feature
        ],
    )
    out = pl.pallas_call(
        _fused_forward_kernel,
        out_shape=jax.ShapeDtypeStruct((1, D_OUT), jnp.float32),
        grid_spec=grid_spec,
        compiler_params=pltpu.CompilerParams(
            dimension_semantics=("arbitrary",)),                     # K is a reduction axis
    )(x_row, x1,
      params['w_obs'], params['b_obs'],
      params['w1bd'], params['b1row'],
      params['w2band'], params['b2row'],
      params['wm_x'], params['wm_z'], params['b_m'])
    return out.reshape(-1)


# ------------------------------ parameter init & packing ---------------------------------

def init_raw_params(key):
    """PyTorch-layout (raw) parameters with PyTorch-like uniform init."""
    ks = jax.random.split(key, 8)

    def u(k, shape, fan_in):
        b = 1.0 / math.sqrt(fan_in)
        return jax.random.uniform(k, shape, jnp.float32, -b, b)

    return dict(
        fc_observation_w=u(ks[0], (512, IN_OBS), IN_OBS),
        fc_observation_b=u(ks[1], (512,), IN_OBS),
        conv1_w=u(ks[2], (8, 1, 3, 3), 9),
        conv1_b=u(ks[3], (8,), 9),
        conv2_w=u(ks[4], (16, 8, 5, 5), 8 * 25),
        conv2_b=u(ks[5], (16,), 8 * 25),
        fc_merge_w=u(ks[6], (512, 512 + FLAT_INPUT), 512 + FLAT_INPUT),
        fc_merge_b=u(ks[7], (512,), 512 + FLAT_INPUT),
    )


def _block_diag_np(block, n):
    r, c = block.shape
    out = np.zeros((n * r, n * c), np.float32)
    for i in range(n):
        out[i * r:(i + 1) * r, i * c:(i + 1) * c] = block
    return out


def prepare_params(raw):
    """One-time packing (outside jit) of PyTorch-layout weights into kernel layouts."""
    w_obs = np.asarray(raw['fc_observation_w'])              # (512, 8192)
    b_obs = np.asarray(raw['fc_observation_b'])
    w1 = np.asarray(raw['conv1_w'])                          # (8, 1, 3, 3)
    b1 = np.asarray(raw['conv1_b'])
    w2 = np.asarray(raw['conv2_w'])                          # (16, 8, 5, 5)
    b2 = np.asarray(raw['conv2_b'])
    wm = np.asarray(raw['fc_merge_w'])                       # (512, 528)
    bm = np.asarray(raw['fc_merge_b'])

    # conv1: block-diagonal (63, 56); block (9, 8) = [3*kh+kw, ci]
    w1m = w1.reshape(8, 9).T
    w1bd = _block_diag_np(w1m, 7)

    # conv2: banded per kh, (5, 56, 48): rows 8*pc + ci, cols 16*c2 + oc
    w2band = np.zeros((5, 56, 48), np.float32)
    for kh in range(5):
        for c2 in range(3):
            for kw in range(5):
                pc = c2 + kw
                w2band[kh, 8 * pc:8 * pc + 8, 16 * c2:16 * c2 + 16] = w2[:, :, kh, kw].T

    return dict(
        w_obs=jnp.asarray(w_obs.T, jnp.bfloat16),             # (8192, 512) bf16
        b_obs=jnp.asarray(b_obs.reshape(1, 512), jnp.float32),
        w1bd=jnp.asarray(w1bd, jnp.float32),                  # (63, 56)
        b1row=jnp.asarray(np.tile(b1, 7).reshape(1, 56), jnp.float32),
        w2band=jnp.asarray(w2band, jnp.float32),              # (5, 56, 48)
        b2row=jnp.asarray(np.tile(b2, 3).reshape(1, 48), jnp.float32),
        wm_x=jnp.asarray(wm[:, :512].T, jnp.bfloat16),        # (512, 512) bf16
        wm_z=jnp.asarray(wm[:, 512:].T, jnp.bfloat16),        # (16, 512) bf16
        b_m=jnp.asarray(bm.reshape(1, 512), jnp.float32),
    )


# ------------------------------------ pure-JAX reference ---------------------------------

def reference_forward(raw, x, z):
    """f32 reference implementing the PyTorch forward exactly (for validation only)."""
    h = jnp.maximum(x.reshape(-1) @ raw['fc_observation_w'].T + raw['fc_observation_b'], 0.0)
    c1 = lax.conv_general_dilated(z, raw['conv1_w'], (1, 1), 'VALID',
                                  dimension_numbers=('NCHW', 'OIHW', 'NCHW'))
    c1 = c1 + raw['conv1_b'].reshape(1, 8, 1, 1)
    p1 = lax.reduce_window(jnp.maximum(c1, 0.0), -jnp.inf, lax.max,
                           (1, 1, 2, 2), (1, 1, 2, 2), 'VALID')
    c2 = lax.conv_general_dilated(p1, raw['conv2_w'], (1, 1), 'VALID',
                                  dimension_numbers=('NCHW', 'OIHW', 'NCHW'))
    c2 = c2 + raw['conv2_b'].reshape(1, 16, 1, 1)
    p2 = lax.reduce_window(jnp.maximum(c2, 0.0), -jnp.inf, lax.max,
                           (1, 1, 2, 2), (1, 1, 2, 2), 'VALID')
    xyz = jnp.concatenate([h, p2.reshape(-1)])
    return jnp.maximum(xyz @ raw['fc_merge_w'].T + raw['fc_merge_b'], 0.0)


# ------------------------------------------ main -----------------------------------------

if __name__ == "__main__":
    key = jax.random.PRNGKey(0)
    kp, kx, kz = jax.random.split(key, 3)

    raw = init_raw_params(kp)
    params = prepare_params(raw)

    x = jax.random.normal(kx, (1, IN_OBS), jnp.float32)                   # observation
    z = jax.random.normal(kz, (1, 1, MASK_SIZE, MASK_SIZE), jnp.float32)  # NCHW mask image

    fwd = jax.jit(word2vec_notarget_forward)
    out = fwd(params, x, z)
    jax.block_until_ready(out)

    ref = reference_forward(raw, x, z)

    assert out.shape == (D_OUT,)
    assert bool(jnp.all(jnp.isfinite(out)))
    assert bool(jnp.all(out >= 0.0))                                      # final ReLU
    err = float(jnp.max(jnp.abs(out - ref)))
    scale = float(jnp.max(jnp.abs(ref)))
    assert err <= 0.05 * scale + 0.05, f"mismatch vs reference: err={err}, scale={scale}"
    print("KERNEL_OK")
</pallas_src>

<mosaic_0001>
module attributes {stable_mosaic.version = 11 : i64} {
  func.func @_fused_forward_kernel(%arg0: i32, %arg1: memref<1x2048xf32, #tpu.memory_space<vmem>>, %arg2: memref<32x63xf32, #tpu.memory_space<vmem>>, %arg3: memref<2048x512xbf16, #tpu.memory_space<vmem>>, %arg4: memref<1x512xf32, #tpu.memory_space<vmem>>, %arg5: memref<63x56xf32, #tpu.memory_space<vmem>>, %arg6: memref<1x56xf32, #tpu.memory_space<vmem>>, %arg7: memref<5x56x48xf32, #tpu.memory_space<vmem>>, %arg8: memref<1x48xf32, #tpu.memory_space<vmem>>, %arg9: memref<512x512xbf16, #tpu.memory_space<vmem>>, %arg10: memref<16x512xbf16, #tpu.memory_space<vmem>>, %arg11: memref<1x512xf32, #tpu.memory_space<vmem>>, %arg12: memref<1x512xf32, #tpu.memory_space<vmem>>, %arg13: memref<1x512xf32, #tpu.memory_space<vmem>>, %arg14: memref<1x16xf32, #tpu.memory_space<vmem>>) attributes {dimension_semantics = [#tpu.dimension_semantics<arbitrary>], iteration_bounds = array<i64: 4>, scalar_prefetch = 0 : i64, scratch_operands = 2 : i64, tpu.core_type = #tpu.core_type<tc>, window_params = [{transform_indices = @transform_0, window_bounds = array<i64: 1, 2048>}, {pipeline_mode = #tpu.pipeline_mode<synchronous>, transform_indices = @transform_1, window_bounds = array<i64: 32, 63>}, {transform_indices = @transform_2, window_bounds = array<i64: 2048, 512>}, {pipeline_mode = #tpu.pipeline_mode<synchronous>, transform_indices = @transform_3, window_bounds = array<i64: 1, 512>}, {pipeline_mode = #tpu.pipeline_mode<synchronous>, transform_indices = @transform_4, window_bounds = array<i64: 63, 56>}, {pipeline_mode = #tpu.pipeline_mode<synchronous>, transform_indices = @transform_5, window_bounds = array<i64: 1, 56>}, {pipeline_mode = #tpu.pipeline_mode<synchronous>, transform_indices = @transform_6, window_bounds = array<i64: 5, 56, 48>}, {pipeline_mode = #tpu.pipeline_mode<synchronous>, transform_indices = @transform_7, window_bounds = array<i64: 1, 48>}, {pipeline_mode = #tpu.pipeline_mode<synchronous>, transform_indices = @transform_8, window_bounds = array<i64: 512, 512>}, {pipeline_mode = #tpu.pipeline_mode<synchronous>, transform_indices = @transform_9, window_bounds = array<i64: 16, 512>}, {pipeline_mode = #tpu.pipeline_mode<synchronous>, transform_indices = @transform_10, window_bounds = array<i64: 1, 512>}, {pipeline_mode = #tpu.pipeline_mode<synchronous>, transform_indices = @transform_11, window_bounds = array<i64: 1, 512>}]} {
    %c0_i32 = arith.constant 0 : i32
    %0 = arith.cmpi eq, %arg0, %c0_i32 : i32
    %1 = arith.extui %0 : i1 to i32
    %c0_i32_0 = arith.constant 0 : i32
    %2 = arith.cmpi ne, %1, %c0_i32_0 : i32
    scf.if %2 {
      %cst_9 = arith.constant 0.000000e+00 : f32
      %13 = vector.broadcast %cst_9 : f32 to vector<1x512xf32>
      %c0_10 = arith.constant 0 : index
      %c0_11 = arith.constant 0 : index
      %14 = vector.load %arg13[%c0_10, %c0_11] : memref<1x512xf32, #tpu.memory_space<vmem>>, vector<1x512xf32>
      tpu.vector_store %arg13[%c0_10, %c0_11], %13 {strides = array<i32>} : memref<1x512xf32, #tpu.memory_space<vmem>>, vector<1x512xf32>,
      %c0_12 = arith.constant 0 : index
      %c0_13 = arith.constant 0 : index
      %15 = vector.load %arg2[%c0_12, %c0_13] : memref<32x63xf32, #tpu.memory_space<vmem>>, vector<32x63xf32>
      %c0_14 = arith.constant 0 : index
      %c0_15 = arith.constant 0 : index
      %16 = vector.load %arg5[%c0_14, %c0_15] : memref<63x56xf32, #tpu.memory_space<vmem>>, vector<63x56xf32>
      %cst_16 = arith.constant dense<0.000000e+00> : vector<32x56xf32>
      %17 = tpu.matmul %15, %16, %cst_16 {dimension_numbers = #tpu.dot_dimension_numbers<[1], [0], [0], [1], [0, 0, 1, 1], [], []>} : vector<32x63xf32>, vector<63x56xf32>, vector<32x56xf32> -> vector<32x56xf32>
      %18 = vector.extract_strided_slice %17 {offsets = [0, 0], sizes = [8, 56], strides = [1, 1]} : vector<32x56xf32> to vector<8x56xf32>
      %19 = vector.extract_strided_slice %17 {offsets = [8, 0], sizes = [8, 56], strides = [1, 1]} : vector<32x56xf32> to vector<8x56xf32>
      %20 = arith.maximumf %18, %19 : vector<8x56xf32>
      %21 = vector.extract_strided_slice %17 {offsets = [16, 0], sizes = [8, 56], strides = [1, 1]} : vector<32x56xf32> to vector<8x56xf32>
      %22 = vector.extract_strided_slice %17 {offsets = [24, 0], sizes = [8, 56], strides = [1, 1]} : vector<32x56xf32> to vector<8x56xf32>
      %23 = arith.maximumf %21, %22 : vector<8x56xf32>
      %24 = arith.maximumf %20, %23 : vector<8x56xf32>
      %c0_17 = arith.constant 0 : index
      %c0_18 = arith.constant 0 : index
      %25 = vector.load %arg6[%c0_17, %c0_18] : memref<1x56xf32, #tpu.memory_space<vmem>>, vector<1x56xf32>
      %26 = vector.broadcast %25 : vector<1x56xf32> to vector<8x56xf32>
      %27 = arith.addf %24, %26 : vector<8x56xf32>
      %cst_19 = arith.constant 0.000000e+00 : f32
      %28 = vector.broadcast %cst_19 : f32 to vector<8x56xf32>
      %29 = arith.maximumf %27, %28 : vector<8x56xf32>
      %30 = vector.extract_strided_slice %29 {offsets = [0, 0], sizes = [3, 56], strides = [1, 1]} : vector<8x56xf32> to vector<3x56xf32>
      %c0_20 = arith.constant 0 : index
      %c0_21 = arith.constant 0 : index
      %c0_22 = arith.constant 0 : index
      %31 = vector.load %arg7[%c0_20, %c0_21, %c0_22] : memref<5x56x48xf32, #tpu.memory_space<vmem>>, vector<1x56x48xf32>
      %32 = vector.shape_cast %31 : vector<1x56x48xf32> to vector<56x48xf32>
      %cst_23 = arith.constant dense<0.000000e+00> : vector<3x48xf32>
      %33 = tpu.matmul %30, %32, %cst_23 {dimension_numbers = #tpu.dot_dimension_numbers<[1], [0], [0], [1], [0, 0, 1, 1], [], []>} : vector<3x56xf32>, vector<56x48xf32>, vector<3x48xf32> -> vector<3x48xf32>
      %34 = vector.extract_strided_slice %29 {offsets = [1, 0], sizes = [3, 56], strides = [1, 1]} : vector<8x56xf32> to vector<3x56xf32>
      %c1 = arith.constant 1 : index
      %c0_24 = arith.constant 0 : index
      %c0_25 = arith.constant 0 : index
      %35 = vector.load %arg7[%c1, %c0_24, %c0_25] : memref<5x56x48xf32, #tpu.memory_space<vmem>>, vector<1x56x48xf32>
      %36 = vector.shape_cast %35 : vector<1x56x48xf32> to vector<56x48xf32>
      %cst_26 = arith.constant dense<0.000000e+00> : vector<3x48xf32>
      %37 = tpu.matmul %34, %36, %cst_26 {dimension_numbers = #tpu.dot_dimension_numbers<[1], [0], [0], [1], [0, 0, 1, 1], [], []>} : vector<3x56xf32>, vector<56x48xf32>, vector<3x48xf32> -> vector<3x48xf32>
      %38 = arith.addf %33, %37 : vector<3x48xf32>
      %39 = vector.extract_strided_slice %29 {offsets = [2, 0], sizes = [3, 56], strides = [1, 1]} : vector<8x56xf32> to vector<3x56xf32>
      %c2 = arith.constant 2 : index
      %c0_27 = arith.constant 0 : index
      %c0_28 = arith.constant 0 : index
      %40 = vector.load %arg7[%c2, %c0_27, %c0_28] : memref<5x56x48xf32, #tpu.memory_space<vmem>>, vector<1x56x48xf32>
      %41 = vector.shape_cast %40 : vector<1x56x48xf32> to vector<56x48xf32>
      %cst_29 = arith.constant dense<0.000000e+00> : vector<3x48xf32>
      %42 = tpu.matmul %39, %41, %cst_29 {dimension_numbers = #tpu.dot_dimension_numbers<[1], [0], [0], [1], [0, 0, 1, 1], [], []>} : vector<3x56xf32>, vector<56x48xf32>, vector<3x48xf32> -> vector<3x48xf32>
      %43 = arith.addf %38, %42 : vector<3x48xf32>
      %44 = vector.extract_strided_slice %29 {offsets = [3, 0], sizes = [3, 56], strides = [1, 1]} : vector<8x56xf32> to vector<3x56xf32>
      %c3 = arith.constant 3 : index
      %c0_30 = arith.constant 0 : index
      %c0_31 = arith.constant 0 : index
      %45 = vector.load %arg7[%c3, %c0_30, %c0_31] : memref<5x56x48xf32, #tpu.memory_space<vmem>>, vector<1x56x48xf32>
      %46 = vector.shape_cast %45 : vector<1x56x48xf32> to vector<56x48xf32>
      %cst_32 = arith.constant dense<0.000000e+00> : vector<3x48xf32>
      %47 = tpu.matmul %44, %46, %cst_32 {dimension_numbers = #tpu.dot_dimension_numbers<[1], [0], [0], [1], [0, 0, 1, 1], [], []>} : vector<3x56xf32>, vector<56x48xf32>, vector<3x48xf32> -> vector<3x48xf32>
      %48 = arith.addf %43, %47 : vector<3x48xf32>
      %49 = vector.extract_strided_slice %29 {offsets = [4, 0], sizes = [3, 56], strides = [1, 1]} : vector<8x56xf32> to vector<3x56xf32>
      %c4 = arith.constant 4 : index
      %c0_33 = arith.constant 0 : index
      %c0_34 = arith.constant 0 : index
      %50 = vector.load %arg7[%c4, %c0_33, %c0_34] : memref<5x56x48xf32, #tpu.memory_space<vmem>>, vector<1x56x48xf32>
      %51 = vector.shape_cast %50 : vector<1x56x48xf32> to vector<56x48xf32>
      %cst_35 = arith.constant dense<0.000000e+00> : vector<3x48xf32>
      %52 = tpu.matmul %49, %51, %cst_35 {dimension_numbers = #tpu.dot_dimension_numbers<[1], [0], [0], [1], [0, 0, 1, 1], [], []>} : vector<3x56xf32>, vector<56x48xf32>, vector<3x48xf32> -> vector<3x48xf32>
      %53 = arith.addf %48, %52 : vector<3x48xf32>
      %c0_36 = arith.constant 0 : index
      %c0_37 = arith.constant 0 : index
      %54 = vector.load %arg8[%c0_36, %c0_37] : memref<1x48xf32, #tpu.memory_space<vmem>>, vector<1x48xf32>
      %55 = vector.broadcast %54 : vector<1x48xf32> to vector<3x48xf32>
      %56 = arith.addf %53, %55 : vector<3x48xf32>
      %cst_38 = arith.constant 0.000000e+00 : f32
      %57 = vector.broadcast %cst_38 : f32 to vector<3x48xf32>
      %58 = arith.maximumf %56, %57 : vector<3x48xf32>
      %59 = vector.extract_strided_slice %58 {offsets = [0, 0], sizes = [2, 16], strides = [1, 1]} : vector<3x48xf32> to vector<2x16xf32>
      %60 = vector.extract_strided_slice %58 {offsets = [0, 16], sizes = [2, 16], strides = [1, 1]} : vector<3x48xf32> to vector<2x16xf32>
      %61 = arith.maximumf %59, %60 : vector<2x16xf32>
      %62 = vector.extract_strided_slice %61 {offsets = [0, 0], sizes = [1, 16], strides = [1, 1]} : vector<2x16xf32> to vector<1x16xf32>
      %63 = vector.extract_strided_slice %61 {offsets = [1, 0], sizes = [1, 16], strides = [1, 1]} : vector<2x16xf32> to vector<1x16xf32>
      %64 = arith.maximumf %62, %63 : vector<1x16xf32>
      %c0_39 = arith.constant 0 : index
      %c0_40 = arith.constant 0 : index
      %65 = vector.load %arg14[%c0_39, %c0_40] : memref<1x16xf32, #tpu.memory_space<vmem>>, vector<1x16xf32>
      tpu.vector_store %arg14[%c0_39, %c0_40], %64 {strides = array<i32>} : memref<1x16xf32, #tpu.memory_space<vmem>>, vector<1x16xf32>,
    } else {
    }
    %c0 = arith.constant 0 : index
    %c0_1 = arith.constant 0 : index
    %3 = vector.load %arg13[%c0, %c0_1] : memref<1x512xf32, #tpu.memory_space<vmem>>, vector<1x512xf32>
    %c0_2 = arith.constant 0 : index
    %c0_3 = arith.constant 0 : index
    %4 = vector.load %arg1[%c0_2, %c0_3] : memref<1x2048xf32, #tpu.memory_space<vmem>>, vector<1x2048xf32>
    %5 = arith.truncf %4 : vector<1x2048xf32> to vector<1x2048xbf16>
    %c0_4 = arith.constant 0 : index
    %c0_5 = arith.constant 0 : index
    %6 = vector.load %arg3[%c0_4, %c0_5] : memref<2048x512xbf16, #tpu.memory_space<vmem>>, vector<2048x512xbf16>
    %cst = arith.constant dense<0.000000e+00> : vector<1x512xf32>
    %7 = tpu.matmul %5, %6, %cst {dimension_numbers = #tpu.dot_dimension_numbers<[1], [0], [0], [1], [0, 0, 1, 1], [], []>} : vector<1x2048xbf16>, vector<2048x512xbf16>, vector<1x512xf32> -> vector<1x512xf32>
    %8 = arith.addf %3, %7 : vector<1x512xf32>
    %c0_6 = arith.constant 0 : index
    %c0_7 = arith.constant 0 : index
    %9 = vector.load %arg13[%c0_6, %c0_7] : memref<1x512xf32, #tpu.memory_space<vmem>>, vector<1x512xf32>
    tpu.vector_store %arg13[%c0_6, %c0_7], %8 {strides = array<i32>} : memref<1x512xf32, #tpu.memory_space<vmem>>, vector<1x512xf32>,
    %c3_i32 = arith.constant 3 : i32
    %10 = arith.cmpi eq, %arg0, %c3_i32 : i32
    %11 = arith.extui %10 : i1 to i32
    %c0_i32_8 = arith.constant 0 : i32
    %12 = arith.cmpi ne, %11, %c0_i32_8 : i32
    scf.if %12 {
      %c0_9 = arith.constant 0 : index
      %c0_10 = arith.constant 0 : index
      %13 = vector.load %arg13[%c0_9, %c0_10] : memref<1x512xf32, #tpu.memory_space<vmem>>, vector<1x512xf32>
      %c0_11 = arith.constant 0 : index
      %c0_12 = arith.constant 0 : index
      %14 = vector.load %arg4[%c0_11, %c0_12] : memref<1x512xf32, #tpu.memory_space<vmem>>, vector<1x512xf32>
      %15 = arith.addf %13, %14 : vector<1x512xf32>
      %cst_13 = arith.constant 0.000000e+00 : f32
      %16 = vector.broadcast %cst_13 : f32 to vector<1x512xf32>
      %17 = arith.maximumf %15, %16 : vector<1x512xf32>
      %18 = arith.truncf %17 : vector<1x512xf32> to vector<1x512xbf16>
      %c0_14 = arith.constant 0 : index
      %c0_15 = arith.constant 0 : index
      %19 = vector.load %arg9[%c0_14, %c0_15] : memref<512x512xbf16, #tpu.memory_space<vmem>>, vector<512x512xbf16>
      %cst_16 = arith.constant dense<0.000000e+00> : vector<1x512xf32>
      %20 = tpu.matmul %18, %19, %cst_16 {dimension_numbers = #tpu.dot_dimension_numbers<[1], [0], [0], [1], [0, 0, 1, 1], [], []>} : vector<1x512xbf16>, vector<512x512xbf16>, vector<1x512xf32> -> vector<1x512xf32>
      %c0_17 = arith.constant 0 : index
      %c0_18 = arith.constant 0 : index
      %21 = vector.load %arg14[%c0_17, %c0_18] : memref<1x16xf32, #tpu.memory_space<vmem>>, vector<1x16xf32>
      %22 = arith.truncf %21 : vector<1x16xf32> to vector<1x16xbf16>
      %c0_19 = arith.constant 0 : index
      %c0_20 = arith.constant 0 : index
      %23 = vector.load %arg10[%c0_19, %c0_20] : memref<16x512xbf16, #tpu.memory_space<vmem>>, vector<16x512xbf16>
      %cst_21 = arith.constant dense<0.000000e+00> : vector<1x512xf32>
      %24 = tpu.matmul %22, %23, %cst_21 {dimension_numbers = #tpu.dot_dimension_numbers<[1], [0], [0], [1], [0, 0, 1, 1], [], []>} : vector<1x16xbf16>, vector<16x512xbf16>, vector<1x512xf32> -> vector<1x512xf32>
      %25 = arith.addf %20, %24 : vector<1x512xf32>
      %c0_22 = arith.constant 0 : index
      %c0_23 = arith.constant 0 : index
      %26 = vector.load %arg11[%c0_22, %c0_23] : memref<1x512xf32, #tpu.memory_space<vmem>>, vector<1x512xf32>
      %27 = arith.addf %25, %26 : vector<1x512xf32>
      %cst_24 = arith.constant 0.000000e+00 : f32
      %28 = vector.broadcast %cst_24 : f32 to vector<1x512xf32>
      %29 = arith.maximumf %27, %28 : vector<1x512xf32>
      %c0_25 = arith.constant 0 : index
      %c0_26 = arith.constant 0 : index
      %30 = vector.load %arg12[%c0_25, %c0_26] : memref<1x512xf32, #tpu.memory_space<vmem>>, vector<1x512xf32>
      tpu.vector_store %arg12[%c0_25, %c0_26], %29 {strides = array<i32>} : memref<1x512xf32, #tpu.memory_space<vmem>>, vector<1x512xf32>,
    } else {
    }
    return
  }
  func.func @transform_0(%arg0: i32) -> (i32, i32) {
    %c0_i32 = arith.constant 0 : i32
    %c0_i32_0 = arith.constant 0 : i32
    return %c0_i32, %arg0 : i32, i32
  }
  func.func @transform_1(%arg0: i32) -> (i32, i32) {
    %c0_i32 = arith.constant 0 : i32
    %c0_i32_0 = arith.constant 0 : i32
    %c0_i32_1 = arith.constant 0 : i32
    return %c0_i32, %c0_i32_0 : i32, i32
  }
  func.func @transform_2(%arg0: i32) -> (i32, i32) {
    %c0_i32 = arith.constant 0 : i32
    %c0_i32_0 = arith.constant 0 : i32
    return %arg0, %c0_i32 : i32, i32
  }
  func.func @transform_3(%arg0: i32) -> (i32, i32) {
    %c0_i32 = arith.constant 0 : i32
    %c0_i32_0 = arith.constant 0 : i32
    %c0_i32_1 = arith.constant 0 : i32
    return %c0_i32, %c0_i32_0 : i32, i32
  }
  func.func @transform_4(%arg0: i32) -> (i32, i32) {
    %c0_i32 = arith.constant 0 : i32
    %c0_i32_0 = arith.constant 0 : i32
    %c0_i32_1 = arith.constant 0 : i32
    return %c0_i32, %c0_i32_0 : i32, i32
  }
  func.func @transform_5(%arg0: i32) -> (i32, i32) {
    %c0_i32 = arith.constant 0 : i32
    %c0_i32_0 = arith.constant 0 : i32
    %c0_i32_1 = arith.constant 0 : i32
    return %c0_i32, %c0_i32_0 : i32, i32
  }
  func.func @transform_6(%arg0: i32) -> (i32, i32, i32) {
    %c0_i32 = arith.constant 0 : i32
    %c0_i32_0 = arith.constant 0 : i32
    %c0_i32_1 = arith.constant 0 : i32
    %c0_i32_2 = arith.constant 0 : i32
    return %c0_i32, %c0_i32_0, %c0_i32_1 : i32, i32, i32
  }
  func.func @transform_7(%arg0: i32) -> (i32, i32) {
    %c0_i32 = arith.constant 0 : i32
    %c0_i32_0 = arith.constant 0 : i32
    %c0_i32_1 = arith.constant 0 : i32
    return %c0_i32, %c0_i32_0 : i32, i32
  }
  func.func @transform_8(%arg0: i32) -> (i32, i32) {
    %c0_i32 = arith.constant 0 : i32
    %c0_i32_0 = arith.constant 0 : i32
    %c0_i32_1 = arith.constant 0 : i32
    return %c0_i32, %c0_i32_0 : i32, i32
  }
  func.func @transform_9(%arg0: i32) -> (i32, i32) {
    %c0_i32 = arith.constant 0 : i32
    %c0_i32_0 = arith.constant 0 : i32
    %c0_i32_1 = arith.constant 0 : i32
    return %c0_i32, %c0_i32_0 : i32, i32
  }
  func.func @transform_10(%arg0: i32) -> (i32, i32) {
    %c0_i32 = arith.constant 0 : i32
    %c0_i32_0 = arith.constant 0 : i32
    %c0_i32_1 = arith.constant 0 : i32
    return %c0_i32, %c0_i32_0 : i32, i32
  }
  func.func @transform_11(%arg0: i32) -> (i32, i32) {
    %c0_i32 = arith.constant 0 : i32
    %c0_i32_0 = arith.constant 0 : i32
    %c0_i32_1 = arith.constant 0 : i32
    return %c0_i32, %c0_i32_0 : i32, i32
  }
}

</mosaic_0001>

<bundles_post_ra>
// kernel: word2vec_notarget_forward.1
= control target key start
LH: loop header
LB: loop body
LE: loop exit
PB: predicated region body
PF: predicated region fallthrough
CT: control target
= control target key end

     0   :  { %16 = vsyncpa [#allocation5], 0  ;;  %s8092_s17 = smov 0   ;;  %s9348_s0 = inlined_call_operand.vmem [shape: f32[1,8192], index: 0, kind: input, shape index: {}]   ;;  %s9349_s1 = inlined_call_operand.vmem [shape: f32[32,63], index: 1, kind: input, shape index: {}]   ;;  %s9350_s2 = inlined_call_operand.vmem [shape: bf16[8192,512], index: 2, kind: input, shape index: {}]   ;;  %s9351_s3 = inlined_call_operand.vmem [shape: f32[1,512], index: 3, kind: input, shape index: {}]   ;;  %s9352_s4 = inlined_call_operand.vmem [shape: f32[63,56], index: 4, kind: input, shape index: {}]   ;;  %s9353_s5 = inlined_call_operand.vmem [shape: f32[1,56], index: 5, kind: input, shape index: {}]   ;;  %s9354_s6 = inlined_call_operand.vmem [shape: f32[5,56,48], index: 6, kind: input, shape index: {}]   ;;  %s9355_s7 = inlined_call_operand.vmem [shape: f32[1,48], index: 7, kind: input, shape index: {}]   ;;  %s9356_s8 = inlined_call_operand.vmem [shape: bf16[512,512], index: 8, kind: input, shape index: {}]   ;;  %s9357_s9 = inlined_call_operand.vmem [shape: bf16[16,512], index: 9, kind: input, shape index: {}]   ;;  %s9358_s10 = inlined_call_operand.vmem [shape: f32[1,512], index: 10, kind: input, shape index: {}]   ;;  %s9359_s11 = inlined_call_operand.hbm [shape: f32[1,512], index: 11, kind: output, shape index: {}]  }
   0x1 LB: > { %s8098_s18 = sadd.s32 4294967295, %s8022_s17   ;;  %p6020_p0 = scmp.ge.s32.totalorder %s8022_s17, 1  ;;  %s8022_s17 = sphi %s8092_s17, %s22_s17  }
   0x2   : > { %p345_p1 = scmp.lt.s32.totalorder %s8022_s17, 5 }
   0x4   : > { %p346_p2 = pnand %p6020_p0, %p345_p1 }
   0x5   : > { %s6021_s19 = sshll.u32 (!%p346_p2), %s8098_s18, 4  ;;  %s6022_s20 = sshll.u32 (!%p346_p2), %s8098_s18, 8 }
   0x6   : > { %349 = sbr.rel (%p346_p2) target bundleno = 1740 (0x6cc), region = 64  ;;  %p386_p3 = scmp.lt.s32.totalorder (!%p346_p2), %s6021_s19, 63 }
   0x7   : > { %p391_p4 = scmp.lt.s32.totalorder (!%p346_p2), %s6022_s20, 1023  ;;  %p6025_p5 = scmp.ne.s32.totalorder (!%p346_p2), %s8098_s18, 0 }
   0xd   : > { %s9363_s19 = smov (!%p386_p3, %s6021_s19), 63  ;;  %s9365_s20 = smov (!%p391_p4, %s6022_s20), 1023 }
   0xe   : > { %s8107_s23 = scalar_lea.vmem %s9348_s0, %s9363_s19  ;;  %s6717_s24 = sshll.u32 %s9365_s20, 4  ;;  %v411_v0 = vld [vmem:[%s9352_s4] sm:$0xff] (!%p6025_p5)  ;;  %v412_v1 = vld [vmem:[%s9352_s4 + $0x8] sm:$0xff] (!%p6025_p5)  ;;  %v413_v2 = vld [vmem:[%s9352_s4 + $0x10] sm:$0xff] (!%p6025_p5)  ;;  %vm419_vm0 = vcmask (!%p6025_p5), 515072   ;;  %vm432_vm1 = vcmask (!%p6025_p5), 1046528   ;;  %v402_v35 = vlaneseq (!%p6025_p5) }
   0xf   : > { %s8112_s27 = scalar_lea.vmem %s9350_s2, %s6717_s24  ;;  %401 = sbr.rel (%p6025_p5) target bundleno = 630 (0x276), region = 68  ;;  %v6877_v3 = vpack.c.bf16 (!%p6025_p5), %v412_v1, %v411_v0  ;;  %v414_v4 = vld [vmem:[%s9352_s4 + $0x18] sm:$0xff] (!%p6025_p5)  ;;  %v415_v6 = vld [vmem:[%s9352_s4 + $0x20] sm:$0xff] (!%p6025_p5)  ;;  %v416_v7 = vld [vmem:[%s9352_s4 + $0x28] sm:$0xff] (!%p6025_p5)  ;;  %vm8024_vm2 = vmmov (!%p6025_p5), 1   ;;  %v8025_v21 = vmov (!%p6025_p5), 0.0|0.0  }
  0x10   : > { %v6881_v5 = vpack.c.bf16 (!%p6025_p5), %v414_v4, %v413_v2  ;;  %v407_v8 = vld [vmem:[%s9349_s1] sm:$0xff] (!%p6025_p5)  ;;  %v6885_v9 = vpack.c.bf16 (!%p6025_p5), %v416_v7, %v415_v6  ;;  %v417_v10 = vld [vmem:[%s9352_s4 + $0x30] sm:$0xff] (!%p6025_p5)  ;;  %v418_v11 = vld [vmem:[%s9352_s4 + $0x38] sm:$0x7f] (!%p6025_p5)  ;;  %6895 = vmatprep.subr.bf16.mxu1 (!%p6025_p5), %v8025_v21  ;;  %v8026_v38 = vmov (!%p6025_p5), 0.0   ;;  %vm404_vm4 = vcmp.lt.s32.totalorder (!%p6025_p5), %v402_v35, 512 }
  0x11   : > { %6878 = vmatprep.subr.bf16.mxu0 (!%p6025_p5), %v6877_v3  ;;  %6786 = vmatprep.mubr.msk.f32.mxu0 (!%p6025_p5), %vm419_vm0, %v407_v8  ;;  %v6889_v12 = vpack.c.bf16 (!%p6025_p5), %v418_v11, %v417_v10  ;;  %vm6890_vm3 = vmpackc.low (!%p6025_p5), %vm432_vm1, %vm8024_vm2  ;;  %v408_v13 = vld [vmem:[%s9349_s1 + $0x8] sm:$0xff] (!%p6025_p5)  ;;  %v409_v14 = vld [vmem:[%s9349_s1 + $0x10] sm:$0xff] (!%p6025_p5)  ;;  %vm8027_vm5 = vmmov (!%p6025_p5), 0   ;;  %406 = vst.msk [vmem:[#allocation2] sm:$0xf] (!%p6025_p5), %vm404_vm4, %v8026_v38  ;;  %vm550_vm6 = vcmask (!%p6025_p5), 457728  }
  0x12   : > { %6880 = vmatpush3.bf16.msra.mxu0 (!%p6025_p5), %v6877_v3  ;;  %v410_v15 = vld [vmem:[%s9349_s1 + $0x18] sm:$0xff] (!%p6025_p5)  ;;  %v6033_v17 = vld [vmem:[%s9354_s6 + $0x40] sm:$0xff] (!%p6025_p5)  ;;  %v6041_v18 = vld [vmem:[%s9354_s6 + $0x70] sm:$0xff] (!%p6025_p5)  ;;  %6806 = vmatprep.mubr.msk.f32.mxu1 (!%p6025_p5), %vm8027_vm5, %v8026_v38  ;;  %s8028_s19 = smov (!%p6025_p5), 112   ;;  %vm959_vm7 = vcmask (!%p6025_p5), 122880  }
  0x13   : > { %6882 = vmatprep.subr.bf16.mxu0 (!%p6025_p5), %v6881_v5  ;;  %v6032_v16 = vld [vmem:[%s9354_s6 + $0x38] sm:$0xff] (!%p6025_p5)  ;;  %v6034_v23 = vld [vmem:[%s9354_s6 + $0x48] sm:$0xff] (!%p6025_p5)  ;;  %v6035_v24 = vld [vmem:[%s9354_s6 + $0x50] sm:$0xff] (!%p6025_p5) }
  0x14   : > { %v6896_v19 = vpack.c.bf16 (!%p6025_p5), %v6033_v17, %v6032_v16  ;;  %v6042_v20 = vld [vmem:[%s9354_s6 + $0x78] sm:$0xff] (!%p6025_p5)  ;;  %v6043_v25 = vld [vmem:[%s9354_s6 + $0x80] sm:$0xff] (!%p6025_p5)  ;;  %v6899_v26 = vpack.c.bf16 (!%p6025_p5), %v6035_v24, %v6034_v23  ;;  %v6044_v27 = vld [vmem:[%s9354_s6 + $0x88] sm:$0xff] (!%p6025_p5) }
  0x15   : > { %v6914_v22 = vpack.c.bf16 (!%p6025_p5), %v6042_v20, %v6041_v18  ;;  %v6917_v28 = vpack.c.bf16 (!%p6025_p5), %v6044_v27, %v6043_v25  ;;  %v6036_v29 = vld [vmem:[%s9354_s6 + $0x58] sm:$0xff] (!%p6025_p5)  ;;  %v6037_v30 = vld [vmem:[%s9354_s6 + $0x60] sm:$0xff] (!%p6025_p5)  ;;  %v6045_v31 = vld [vmem:[%s9354_s6 + $0x90] sm:$0xff] (!%p6025_p5) }
  0x16   : > { %6884 = vmatpush3.bf16.msra.mxu0 %v6881_v5  ;;  %6897 = vmatpush3.bf16.msra.mxu1 %v6896_v19  ;;  %v6902_v32 = vpack.c.bf16 %v6037_v30, %v6036_v29  ;;  %v6046_v33 = vld [vmem:[%s9354_s6 + $0x98] sm:$0xff]  ;;  %v6038_v36 = vld [vmem:[%s9354_s6 + $0x68] sm:$0xff]  ;;  %v6047_v37 = vld [vmem:[%s9354_s6 + $0xa0] sm:$0xff] }
  0x17   : > { %6886 = vmatprep.subr.bf16.mxu0 %v6885_v9  ;;  %6898 = vmatprep.subr.bf16.mxu1 %v8025_v21  ;;  %v6920_v34 = vpack.c.bf16 %v6046_v33, %v6045_v31  ;;  %v6031_v45 = vld [vmem:[%s9353_s5] ss:$0 sm:$0xff]  ;;  %v534_v49 = vld [vmem:[%s9354_s6 + $0x8] sm:$0xff]  ;;  %v535_v55 = vld [vmem:[%s9354_s6 + $0x10] sm:$0xff] }
  0x18   : > { %v533_v47 = vld [vmem:[%s9354_s6] sm:$0xff]  ;;  %v6058_v51 = vld [vmem:[%s9354_s6 + $0xe8] sm:$0xff]  ;;  %v536_v58 = vld [vmem:[%s9354_s6 + $0x18] sm:$0xff] }
  0x19   : > { %v6057_v50 = vld [vmem:[%s9354_s6 + $0xe0] sm:$0xff]  ;;  %v6905_v53 = vpack.c.bf16 %v534_v49, %v533_v47  ;;  %v6059_v59 = vld [vmem:[%s9354_s6 + $0xf0] sm:$0xff]  ;;  %v6060_v60 = vld [vmem:[%s9354_s6 + $0xf8] sm:$0xff]  ;;  %v6908_v61 = vpack.c.bf16 %v536_v58, %v535_v55 }
  0x1a   : > { %6888 = vmatpush3.bf16.msra.mxu0 %v6885_v9  ;;  %6900 = vmatpush3.bf16.msra.mxu1 %v6899_v26  ;;  %v6932_v54 = vpack.c.bf16 %v6058_v51, %v6057_v50  ;;  %v6935_v62 = vpack.c.bf16 %v6060_v60, %v6059_v59  ;;  %v537_v63 = vld [vmem:[%s9354_s6 + $0x20] sm:$0xff]  ;;  %v538_v0 = vld [vmem:[%s9354_s6 + $0x28] sm:$0xff]  ;;  %v6050_v6 = vld [vmem:[%s9354_s6 + $0xb0] sm:$0xff] }
  0x1b   : > { %6891 = vmatprep.subr.msk.bf16.mxu0 %vm6890_vm3, %v6889_v12  ;;  %6901 = vmatprep.subr.bf16.mxu1 %v8025_v21  ;;  %v6061_v1 = vld [vmem:[%s9354_s6 + $0x100] sm:$0xff]  ;;  %v6062_v2 = vld [vmem:[%s9354_s6 + $0x108] sm:$0xff]  ;;  %v6911_v3 = vpack.c.bf16 %v538_v0, %v537_v63  ;;  %v539_v7 = vld [vmem:[%s9354_s6 + $0x30] sm:$0xff] }
  0x1c   : > { %v6938_v4 = vpack.c.bf16 %v6062_v2, %v6061_v1  ;;  %v6049_v5 = vld [vmem:[%s9354_s6 + $0xa8] sm:$0xff]  ;;  %v6063_v8 = vld [vmem:[%s9354_s6 + $0x110] sm:$0xff]  ;;  %v6051_v10 = vld [vmem:[%s9354_s6 + $0xb8] sm:$0xff] }
  0x1d   : > { %v6923_v9 = vpack.c.bf16 %v6050_v6, %v6049_v5  ;;  %v6052_v11 = vld [vmem:[%s9354_s6 + $0xc0] sm:$0xff]  ;;  %v6055_v17 = vld [vmem:[%s9354_s6 + $0xd8] sm:$0xff] }
  0x1e   : > { %6894 = vmatpush3.bf16.msk.msra.mxu0 %vm6890_vm3, %v6889_v12  ;;  %6903 = vmatpush3.bf16.msra.mxu1 %v6902_v32  ;;  %v6065_v32 = vld [vmem:[%s9355_s7] ss:$0 sm:$0xff] }
  0x1f   : > { %6913 = vmatprep.subr.bf16.mxu0 %v8025_v21  ;;  %6804 = vmatprep.subr.mxu1 %v8026_v38 }
  0x21   : > { %6787 = vmatmul.mubr.msk.f32.vlgmr.msra.gmra.mrb[0].mxu0 %vm419_vm0, %v408_v13  ;;  %v6926_v13 = vpack.c.bf16 %v6052_v11, %v6051_v10 }
  0x22   : > { %6789 = vmatprep.mubr.msk.f32.mxu0 %vm419_vm0, %v409_v14  ;;  %6915 = vmatpush3.bf16.msra.mxu0 %v6914_v22  ;;  %v6053_v14 = vld [vmem:[%s9354_s6 + $0xc8] sm:$0xff] }
  0x23   : > { %6916 = vmatprep.subr.bf16.mxu0 %v8025_v21  ;;  %6805 = vmatpush3.msra.mxu1 %v6038_v36 }
  0x24   : > { %6904 = vmatprep.subr.bf16.mxu1 %v8025_v21 }
  0x25   : > { %6790 = vmatmul.mubr.msk.f32.gmra.mrb[2].mxu0 %vm419_vm0, %v410_v15  ;;  %v6054_v15 = vld [vmem:[%s9354_s6 + $0xd0] sm:$0xff] }
  0x26   : > { %6918 = vmatpush3.bf16.msra.mxu0 %v6917_v28  ;;  %6840 = vmatprep.mubr.msk.f32.mxu0 %vm8027_vm5, %v8026_v38  ;;  %v6929_v16 = vpack.c.bf16 %v6054_v15, %v6053_v14 }
  0x27   : > { %6919 = vmatprep.subr.bf16.mxu0 %v8025_v21 }
  0x2a   : > { %6921 = vmatpush3.bf16.msra.mxu0 %v6920_v34 }
  0x2b   : > { %6838 = vmatprep.subr.mxu0 %v8026_v38 }
  0x2e   : > { %6839 = vmatpush3.msra.mxu0 %v6047_v37 }
  0x2f   : > { %6931 = vmatprep.subr.bf16.mxu0 %v8025_v21 }
  0xf4   : > { %v6788_v39 = vpop.f32.mrb[0].mxu0 }
  0xf5   : > { %v502_v40 = vpop.f32.mrb[1].mxu0 }
  0xf6   : > { %v521_v41 = vmax.f32 %v502_v40, %v6788_v39 }
  0xf8   : > { %v6791_v42 = vpop.f32.mrb[2].mxu0 }
  0xf9   : > { %v512_v43 = vpop.f32.mrb[3].mxu0 }
  0xfa   : > { %v522_v44 = vmax.f32 %v512_v43, %v6791_v42 }
  0xfc   : > { %v523_v46 = vmax.f32 %v521_v41, %v522_v44 }
  0xfe   : > { %v531_v48 = vadd.f32 %v6031_v45, %v523_v46 }
 0x100   : > { %v532_v52 = vmax.f32 %v531_v48, 0.0 }
 0x102   : > { %v549_v56 = vrot.slane %v532_v52, 1  ;;  %v703_v57 = vrot.slane %v532_v52, 2  ;;  %v867_v12 = vrot.slane %v532_v52, 4  ;;  %v785_v18 = vrot.slane %v532_v52, 3 }
 0x104   : > { %6807 = vmatmul.mubr.msk.f32.vlgmr.msra.gmra.mrb[0].mxu1 %vm550_vm6, %v549_v56  ;;  %6841 = vmatmul.mubr.msk.f32.vlgmr.msra.gmra.mrb[4].mxu0 %vm550_vm6, %v703_v57 }
 0x105   : > { %6906 = vmatpush3.bf16.msra.mxu1 %v6905_v53  ;;  %6933 = vmatpush3.bf16.msra.mxu0 %v6932_v54 }
 0x106   : > { %6907 = vmatprep.subr.bf16.mxu1 %v8025_v21  ;;  %6934 = vmatprep.subr.bf16.mxu0 %v8025_v21 }
 0x107   : > { %6823 = vmatprep.mubr.msk.f32.mxu1 %vm8027_vm5, %v8026_v38  ;;  %6874 = vmatprep.mubr.msk.f32.mxu0 %vm8027_vm5, %v8026_v38 }
 0x109   : > { %6909 = vmatpush3.bf16.msra.mxu1 %v6908_v61  ;;  %6936 = vmatpush3.bf16.msra.mxu0 %v6935_v62 }
 0x10a   : > { %6910 = vmatprep.subr.bf16.mxu1 %v8025_v21  ;;  %6937 = vmatprep.subr.bf16.mxu0 %v8025_v21 }
 0x10d   : > { %6912 = vmatpush3.bf16.msra.mxu1 %v6911_v3  ;;  %6939 = vmatpush3.bf16.msra.mxu0 %v6938_v4 }
 0x10e   : > { %6821 = vmatprep.subr.mxu1 %v8026_v38  ;;  %6872 = vmatprep.subr.mxu0 %v8026_v38 }
 0x111   : > { %6822 = vmatpush3.msra.mxu1 %v539_v7  ;;  %6873 = vmatpush3.msra.mxu0 %v6063_v8 }
 0x112   : > { %6824 = vmatmul.mubr.msk.f32.vlgmr.msra.gmra.mrb[2].mxu1 %vm550_vm6, %v532_v52  ;;  %6922 = vmatprep.subr.bf16.mxu1 %v8025_v21 }
 0x113   : > { %6875 = vmatmul.mubr.msk.f32.vlgmr.msra.gmra.mrb[6].mxu0 %vm550_vm6, %v867_v12  ;;  %6924 = vmatpush3.bf16.msra.mxu1 %v6923_v9 }
 0x114   : > { %6925 = vmatprep.subr.bf16.mxu1 %v8025_v21  ;;  %6857 = vmatprep.mubr.msk.f32.mxu1 %vm8027_vm5, %v8026_v38 }
 0x117   : > { %6927 = vmatpush3.bf16.msra.mxu1 %v6926_v13 }
 0x118   : > { %6928 = vmatprep.subr.bf16.mxu1 %v8025_v21 }
 0x11b   : > { %6930 = vmatpush3.bf16.msra.mxu1 %v6929_v16 }
 0x11c   : > { %6855 = vmatprep.subr.mxu1 %v8026_v38 }
 0x11f   : > { %6856 = vmatpush3.msra.mxu1 %v6055_v17 }
 0x120   : > { %6858 = vmatmul.mubr.msk.f32.vlgmr.msra.gmra.mrb[4].mxu1 %vm550_vm6, %v785_v18 }
 0x1d7   : > { %v619_v19 = vpop.f32.mrb[0].mxu1  ;;  %v772_v20 = vpop.f32.mrb[4].mxu0 }
 0x1d8   : > { %v6808_v22 = vpop.f32.mrb[1].mxu1  ;;  %v6842_v23 = vpop.f32.mrb[5].mxu0 }
 0x1e5   : > { %v691_v24 = vpop.f32.mrb[2].mxu1 }
 0x1e6   : > { %v692_v25 = vadd.f32 %v691_v24, %v619_v19  ;;  %v936_v26 = vpop.f32.mrb[6].mxu0  ;;  %v6825_v27 = vpop.f32.mrb[3].mxu1 }
 0x1e7   : > { %v6876_v21 = vpop.f32.mrb[7].mxu0 }
 0x1e8   : > { %v776_v28 = vadd.f32 %v772_v20, %v692_v25 }
 0x1f3   : > { %v854_v29 = vpop.f32.mrb[4].mxu1 }
 0x1f4   : > { %v858_v30 = vadd.f32 %v854_v29, %v776_v28  ;;  %v6859_v31 = vpop.f32.mrb[5].mxu1 }
 0x1f6   : > { %v940_v33 = vadd.f32 %v936_v26, %v858_v30 }
 0x1f8   : > { %v948_v34 = vadd.f32 %v6065_v32, %v940_v33 }
 0x1fa   : > { %v949_v35 = vmax.f32 %v948_v34, 0.0 }
 0x1fc   : > { %951 = vrot.lane.b32.xlu0 %v949_v35, %s8028_s19 }
 0x26e   : > { %v952_v36 = vpop.permute.xlu0 %951 }
 0x26f   : > { %v954_v37 = vmax.f32 %v949_v35, %v952_v36 }
 0x271   : > { %v956_v38 = vrot.slane %v954_v37, 1 }
 0x273   : > { %v958_v39 = vmax.f32 %v954_v37, %v956_v38 }
 0x275   : > { %960 = vst.msk [vmem:[#allocation3] sm:$0x1] %vm959_vm7, %v958_v39 }
 0x276 PF: > { %v7018_v40 = vld [vmem:[%s8112_s27 + $0x4] ss:$16 sps:$4 sm:$0xff]   ;;  %v7020_v41 = vld [vmem:[%s8112_s27 + $0xc] ss:$16 sps:$4 sm:$0xff]   ;;  %v7022_v42 = vld [vmem:[%s8112_s27] ss:$16 sps:$4 sm:$0xff]   ;;  %v966_v12 = vlaneseq }
 0x277   : > { %4134 = vmatprep.subr.bf16.mxu0 %v7018_v40  ;;  %v7023_v43 = vld [vmem:[%s8112_s27 + $0x8] ss:$16 sps:$4 sm:$0xff]   ;;  %4462 = vmatprep.subr.bf16.mxu1 %v7020_v41  ;;  %v7024_v44 = vld [vmem:[%s8112_s27 + $0x24] ss:$16 sps:$4 sm:$0xff]   ;;  %v7026_v45 = vld [vmem:[%s8112_s27 + $0x2c] ss:$16 sps:$4 sm:$0xff]  }
 0x278   : > { %4135 = vmatpush1.bf16.msra.mxu0 %v7022_v42  ;;  %4463 = vmatpush1.bf16.msra.mxu1 %v7023_v43  ;;  %v7028_v46 = vld [vmem:[%s8112_s27 + $0x20] ss:$16 sps:$4 sm:$0xff]   ;;  %v7029_v47 = vld [vmem:[%s8112_s27 + $0x28] ss:$16 sps:$4 sm:$0xff]   ;;  %v7030_v48 = vld [vmem:[%s8112_s27 + $0x44] ss:$16 sps:$4 sm:$0xff]  }
 0x279   : > { %4136 = vmatprep.subr.bf16.mxu0 %v7024_v44  ;;  %4464 = vmatprep.subr.bf16.mxu1 %v7026_v45  ;;  %v7032_v49 = vld [vmem:[%s8112_s27 + $0x4c] ss:$16 sps:$4 sm:$0xff]   ;;  %v7034_v50 = vld [vmem:[%s8112_s27 + $0x40] ss:$16 sps:$4 sm:$0xff]   ;;  %v7035_v51 = vld [vmem:[%s8112_s27 + $0x48] ss:$16 sps:$4 sm:$0xff]  }
 0x27a   : > { %v7036_v52 = vld [vmem:[%s8112_s27 + $0x64] ss:$16 sps:$4 sm:$0xff]   ;;  %v7038_v53 = vld [vmem:[%s8112_s27 + $0x6c] ss:$16 sps:$4 sm:$0xff]   ;;  %v7040_v54 = vld [vmem:[%s8112_s27 + $0x60] ss:$16 sps:$4 sm:$0xff]  }
 0x27b   : > { %v7041_v55 = vld [vmem:[%s8112_s27 + $0x68] ss:$16 sps:$4 sm:$0xff]   ;;  %v7042_v56 = vld [vmem:[%s8112_s27 + $0x84] ss:$16 sps:$4 sm:$0xff]   ;;  %v7044_v57 = vld [vmem:[%s8112_s27 + $0x8c] ss:$16 sps:$4 sm:$0xff]  }
 0x27c   : > { %4137 = vmatpush1.bf16.msra.mxu0 %v7028_v46  ;;  %4465 = vmatpush1.bf16.msra.mxu1 %v7029_v47  ;;  %v7046_v58 = vld [vmem:[%s8112_s27 + $0x80] ss:$16 sps:$4 sm:$0xff]   ;;  %v7047_v59 = vld [vmem:[%s8112_s27 + $0x88] ss:$16 sps:$4 sm:$0xff]   ;;  %v7048_v60 = vld [vmem:[%s8112_s27 + $0xa4] ss:$16 sps:$4 sm:$0xff]  }
 0x27d   : > { %4138 = vmatprep.subr.bf16.mxu0 %v7030_v48  ;;  %4466 = vmatprep.subr.bf16.mxu1 %v7032_v49  ;;  %v7050_v61 = vld [vmem:[%s8112_s27 + $0xac] ss:$16 sps:$4 sm:$0xff]   ;;  %v7052_v62 = vld [vmem:[%s8112_s27 + $0xa0] ss:$16 sps:$4 sm:$0xff]   ;;  %v7053_v63 = vld [vmem:[%s8112_s27 + $0xa8] ss:$16 sps:$4 sm:$0xff]  }
 0x27e   : > { %v7054_v0 = vld [vmem:[%s8112_s27 + $0xc4] ss:$16 sps:$4 sm:$0xff]   ;;  %v7056_v1 = vld [vmem:[%s8112_s27 + $0xcc] ss:$16 sps:$4 sm:$0xff]   ;;  %v7058_v2 = vld [vmem:[%s8112_s27 + $0xc0] ss:$16 sps:$4 sm:$0xff]  }
 0x27f   : > { %v7059_v3 = vld [vmem:[%s8112_s27 + $0xc8] ss:$16 sps:$4 sm:$0xff]   ;;  %v7060_v4 = vld [vmem:[%s8112_s27 + $0xe4] ss:$16 sps:$4 sm:$0xff]   ;;  %v7062_v5 = vld [vmem:[%s8112_s27 + $0xec] ss:$16 sps:$4 sm:$0xff]  }
 0x280   : > { %4139 = vmatpush1.bf16.msra.mxu0 %v7034_v50  ;;  %4467 = vmatpush1.bf16.msra.mxu1 %v7035_v51  ;;  %v7064_v6 = vld [vmem:[%s8112_s27 + $0xe0] ss:$16 sps:$4 sm:$0xff]   ;;  %v7065_v7 = vld [vmem:[%s8112_s27 + $0xe8] ss:$16 sps:$4 sm:$0xff]   ;;  %v7066_v8 = vld [vmem:[%s8112_s27 + $0x104] ss:$16 sps:$4 sm:$0xff]  }
 0x281   : > { %4140 = vmatprep.subr.bf16.mxu0 %v7036_v52  ;;  %4468 = vmatprep.subr.bf16.mxu1 %v7038_v53  ;;  %v7068_v9 = vld [vmem:[%s8112_s27 + $0x10c] ss:$16 sps:$4 sm:$0xff]   ;;  %v7070_v10 = vld [vmem:[%s8112_s27 + $0x100] ss:$16 sps:$4 sm:$0xff]   ;;  %v7071_v11 = vld [vmem:[%s8112_s27 + $0x108] ss:$16 sps:$4 sm:$0xff]  }
 0x282   : > { %v7072_v13 = vld [vmem:[%s8112_s27 + $0x124] ss:$16 sps:$4 sm:$0xff]   ;;  %v7074_v14 = vld [vmem:[%s8112_s27 + $0x12c] ss:$16 sps:$4 sm:$0xff]   ;;  %v7076_v15 = vld [vmem:[%s8112_s27 + $0x120] ss:$16 sps:$4 sm:$0xff]  }
 0x283   : > { %v8342_v16 = vshrl.u32 %v966_v12, 7  ;;  %v7077_v17 = vld [vmem:[%s8112_s27 + $0x128] ss:$16 sps:$4 sm:$0xff]   ;;  %v7078_v18 = vld [vmem:[%s8112_s27 + $0x144] ss:$16 sps:$4 sm:$0xff]   ;;  %vm8892_vm8 = vcmp.lt.s32.totalorder %v966_v12, 512 }
 0x284   : > { %4141 = vmatpush1.bf16.msra.mxu0 %v7040_v54  ;;  %4469 = vmatpush1.bf16.msra.mxu1 %v7041_v55  ;;  %v7080_v19 = vld [vmem:[%s8112_s27 + $0x14c] ss:$16 sps:$4 sm:$0xff]   ;;  %v7082_v20 = vld [vmem:[%s8112_s27 + $0x140] ss:$16 sps:$4 sm:$0xff]   ;;  %v7083_v22 = vld [vmem:[%s8112_s27 + $0x148] ss:$16 sps:$4 sm:$0xff]  }
 0x285   : > { %4142 = vmatprep.subr.bf16.mxu0 %v7042_v56  ;;  %4470 = vmatprep.subr.bf16.mxu1 %v7044_v57  ;;  %v8350_v23 = vsub.s32 1, %v8342_v16  ;;  %v7084_v24 = vld [vmem:[%s8112_s27 + $0x164] ss:$16 sps:$4 sm:$0xff]   ;;  %v7086_v25 = vld [vmem:[%s8112_s27 + $0x16c] ss:$16 sps:$4 sm:$0xff]   ;;  %v8373_v41 = vsub.s32 0, %v8342_v16 }
 0x286   : > { %v8355_v26 = vld [vmem:[%s8107_s23] sm:$0xff]  ;;  %v7089_v28 = vld [vmem:[%s8112_s27 + $0x168] ss:$16 sps:$4 sm:$0xff]   ;;  %v7092_v30 = vld [vmem:[%s8112_s27 + $0x18c] ss:$16 sps:$4 sm:$0xff]   ;;  %v8379_v45 = vsub.s32 3, %v8342_v16 }
 0x287   : > { %v7088_v27 = vld [vmem:[%s8112_s27 + $0x160] ss:$16 sps:$4 sm:$0xff]   ;;  %v973_v21 = vrot.slane %v8355_v26, %v8350_v23  ;;  %v7090_v29 = vld [vmem:[%s8112_s27 + $0x184] ss:$16 sps:$4 sm:$0xff]   ;;  %v7095_v33 = vld [vmem:[%s8112_s27 + $0x188] ss:$16 sps:$4 sm:$0xff]   ;;  %v969_v47 = vrot.slane %v8355_v26, %v8373_v41 }
 0x288   : > { %4143 = vmatpush1.bf16.msra.mxu0 %v7046_v58  ;;  %4471 = vmatpush1.bf16.msra.mxu1 %v7047_v59  ;;  %v7094_v32 = vld [vmem:[%s8112_s27 + $0x180] ss:$16 sps:$4 sm:$0xff]   ;;  %v7096_v34 = vld [vmem:[%s8112_s27 + $0x1a4] ss:$16 sps:$4 sm:$0xff]   ;;  %v7098_v35 = vld [vmem:[%s8112_s27 + $0x1ac] ss:$16 sps:$4 sm:$0xff]   ;;  %v981_v51 = vrot.slane %v8355_v26, %v8379_v45 }
 0x289   : > { %4144 = vmatprep.subr.bf16.mxu0 %v7048_v60  ;;  %4472 = vmatprep.subr.bf16.mxu1 %v7050_v61  ;;  %v1047_v31 = vpack.c.bf16 %v973_v21, %v973_v21  ;;  %v7100_v36 = vld [vmem:[%s8112_s27 + $0x1a0] ss:$16 sps:$4 sm:$0xff]   ;;  %v7101_v37 = vld [vmem:[%s8112_s27 + $0x1a8] ss:$16 sps:$4 sm:$0xff]   ;;  %v7102_v38 = vld [vmem:[%s8112_s27 + $0x1c4] ss:$16 sps:$4 sm:$0xff]   ;;  %v1046_v53 = vpack.c.bf16 %v969_v47, %v969_v47 }
 0x28a   : > { %v7104_v39 = vld [vmem:[%s8112_s27 + $0x1cc] ss:$16 sps:$4 sm:$0xff]   ;;  %v7106_v40 = vld [vmem:[%s8112_s27 + $0x1c0] ss:$16 sps:$4 sm:$0xff]   ;;  %v7107_v42 = vld [vmem:[%s8112_s27 + $0x1c8] ss:$16 sps:$4 sm:$0xff]   ;;  %v1049_v57 = vpack.c.bf16 %v981_v51, %v981_v51 }
 0x28b   : > { %4166 = vmatprep.mubr.bf16.mxu0 %v1047_v31  ;;  %4494 = vmatprep.mubr.bf16.mxu1 %v1047_v31  ;;  %v7108_v43 = vld [vmem:[%s8112_s27 + $0x1e4] ss:$16 sps:$4 sm:$0xff]   ;;  %v7110_v44 = vld [vmem:[%s8112_s27 + $0x1ec] ss:$16 sps:$4 sm:$0xff]   ;;  %v7112_v46 = vld [vmem:[%s8112_s27 + $0x1e0] ss:$16 sps:$4 sm:$0xff]  }
 0x28c   : > { %4145 = vmatpush1.bf16.msra.mxu0 %v7052_v62  ;;  %4473 = vmatpush1.bf16.msra.mxu1 %v7053_v63  ;;  %v7113_v48 = vld [vmem:[%s8112_s27 + $0x1e8] ss:$16 sps:$4 sm:$0xff]   ;;  %v7116_v49 = vld [vmem:[%s8112_s27 + $0x204] ss:$16 sps:$4 sm:$0xff]   ;;  %v7119_v50 = vld [vmem:[%s8112_s27 + $0x20c] ss:$16 sps:$4 sm:$0xff]  }
 0x28d   : > { %4146 = vmatprep.subr.bf16.mxu0 %v7054_v0  ;;  %4474 = vmatprep.subr.bf16.mxu1 %v7056_v1  ;;  %v7114_v52 = vld [vmem:[%s8112_s27 + $0x200] ss:$16 sps:$4 sm:$0xff]   ;;  %v7117_v54 = vld [vmem:[%s8112_s27 + $0x208] ss:$16 sps:$4 sm:$0xff]   ;;  %v7122_v55 = vld [vmem:[%s8112_s27 + $0x224] ss:$16 sps:$4 sm:$0xff]  }
 0x28e   : > { %v7125_v56 = vld [vmem:[%s8112_s27 + $0x22c] ss:$16 sps:$4 sm:$0xff]   ;;  %v7120_v58 = vld [vmem:[%s8112_s27 + $0x220] ss:$16 sps:$4 sm:$0xff]   ;;  %v7123_v59 = vld [vmem:[%s8112_s27 + $0x228] ss:$16 sps:$4 sm:$0xff]  }
 0x28f   : > { %v7128_v60 = vld [vmem:[%s8112_s27 + $0x244] ss:$16 sps:$4 sm:$0xff]   ;;  %v7131_v61 = vld [vmem:[%s8112_s27 + $0x24c] ss:$16 sps:$4 sm:$0xff]   ;;  %v7126_v62 = vld [vmem:[%s8112_s27 + $0x240] ss:$16 sps:$4 sm:$0xff]  }
 0x290   : > { %4147 = vmatpush1.bf16.msra.mxu0 %v7058_v2  ;;  %4475 = vmatpush1.bf16.msra.mxu1 %v7059_v3  ;;  %v7129_v63 = vld [vmem:[%s8112_s27 + $0x248] ss:$16 sps:$4 sm:$0xff]   ;;  %v7134_v0 = vld [vmem:[%s8112_s27 + $0x264] ss:$16 sps:$4 sm:$0xff]   ;;  %v7137_v1 = vld [vmem:[%s8112_s27 + $0x26c] ss:$16 sps:$4 sm:$0xff]  }
 0x291   : > { %4148 = vmatprep.subr.bf16.mxu0 %v7060_v4  ;;  %4476 = vmatprep.subr.bf16.mxu1 %v7062_v5  ;;  %v7132_v2 = vld [vmem:[%s8112_s27 + $0x260] ss:$16 sps:$4 sm:$0xff]   ;;  %v7135_v3 = vld [vmem:[%s8112_s27 + $0x268] ss:$16 sps:$4 sm:$0xff]   ;;  %v7140_v4 = vld [vmem:[%s8112_s27 + $0x284] ss:$16 sps:$4 sm:$0xff]  }
 0x292   : > { %v7143_v5 = vld [vmem:[%s8112_s27 + $0x28c] ss:$16 sps:$4 sm:$0xff]   ;;  %v7165_v21 = vld [vmem:[%s8112_s27 + $0x308] ss:$16 sps:$4 sm:$0xff]   ;;  %p6578_p6 = scmp.ne.s32.totalorder %s8098_s18, 3 }
 0x293   : > { %v7171_v31 = vld [vmem:[%s8112_s27 + $0x328] ss:$16 sps:$4 sm:$0xff]   ;;  %v7197_v47 = vld [vmem:[%s8112_s27 + $0x3ac] ss:$16 sps:$4 sm:$0xff]   ;;  %v7792_v12 = vld [vmem:[%s9357_s9] ss:$16 sps:$4 sm:$0xff] (!%p6578_p6)  }
 0x294   : > { %4149 = vmatpush1.bf16.msra.mxu0 %v7064_v6  ;;  %4477 = vmatpush1.bf16.msra.mxu1 %v7065_v7  ;;  %v7138_v6 = vld [vmem:[%s8112_s27 + $0x280] ss:$16 sps:$4 sm:$0xff]   ;;  %v7141_v7 = vld [vmem:[%s8112_s27 + $0x288] ss:$16 sps:$4 sm:$0xff]   ;;  %v7203_v51 = vld [vmem:[%s8112_s27 + $0x3cc] ss:$16 sps:$4 sm:$0xff]  }
 0x295   : > { %4150 = vmatprep.subr.bf16.mxu0 %v7066_v8  ;;  %4478 = vmatprep.subr.bf16.mxu1 %v7068_v9  ;;  %v7146_v8 = vld [vmem:[%s8112_s27 + $0x2a4] ss:$16 sps:$4 sm:$0xff]   ;;  %v7149_v9 = vld [vmem:[%s8112_s27 + $0x2ac] ss:$16 sps:$4 sm:$0xff]   ;;  %vm5012_vm9 = vcmask (!%p6578_p6), 130048  }
 0x298   : > { %4151 = vmatpush1.bf16.msra.mxu0 %v7070_v10  ;;  %4479 = vmatpush1.bf16.msra.mxu1 %v7071_v11  ;;  %v7144_v10 = vld [vmem:[%s8112_s27 + $0x2a0] ss:$16 sps:$4 sm:$0xff]   ;;  %v7147_v11 = vld [vmem:[%s8112_s27 + $0x2a8] ss:$16 sps:$4 sm:$0xff]  }
 0x299   : > { %4152 = vmatprep.subr.bf16.mxu0 %v7072_v13  ;;  %4480 = vmatprep.subr.bf16.mxu1 %v7074_v14  ;;  %v7152_v13 = vld [vmem:[%s8112_s27 + $0x2c4] ss:$16 sps:$4 sm:$0xff]   ;;  %v7155_v14 = vld [vmem:[%s8112_s27 + $0x2cc] ss:$16 sps:$4 sm:$0xff]  }
 0x29c   : > { %4153 = vmatpush1.bf16.msra.mxu0 %v7076_v15  ;;  %4481 = vmatpush1.bf16.msra.mxu1 %v7077_v17  ;;  %v7150_v15 = vld [vmem:[%s8112_s27 + $0x2c0] ss:$16 sps:$4 sm:$0xff]   ;;  %v7153_v17 = vld [vmem:[%s8112_s27 + $0x2c8] ss:$16 sps:$4 sm:$0xff]  }
 0x29d   : > { %4154 = vmatprep.subr.bf16.mxu0 %v7078_v18  ;;  %4482 = vmatprep.subr.bf16.mxu1 %v7080_v19  ;;  %v7158_v18 = vld [vmem:[%s8112_s27 + $0x2e4] ss:$16 sps:$4 sm:$0xff]   ;;  %v7161_v19 = vld [vmem:[%s8112_s27 + $0x2ec] ss:$16 sps:$4 sm:$0xff]  }
 0x2a0   : > { %4155 = vmatpush1.bf16.msra.mxu0 %v7082_v20  ;;  %4483 = vmatpush1.bf16.msra.mxu1 %v7083_v22  ;;  %v7156_v20 = vld [vmem:[%s8112_s27 + $0x2e0] ss:$16 sps:$4 sm:$0xff]   ;;  %v7159_v22 = vld [vmem:[%s8112_s27 + $0x2e8] ss:$16 sps:$4 sm:$0xff]  }
 0x2a1   : > { %4156 = vmatprep.subr.bf16.mxu0 %v7084_v24  ;;  %4484 = vmatprep.subr.bf16.mxu1 %v7086_v25  ;;  %v7164_v24 = vld [vmem:[%s8112_s27 + $0x304] ss:$16 sps:$4 sm:$0xff]   ;;  %v7167_v25 = vld [vmem:[%s8112_s27 + $0x30c] ss:$16 sps:$4 sm:$0xff]  }
 0x2a4   : > { %4157 = vmatpush1.bf16.msra.mxu0 %v7088_v27  ;;  %4485 = vmatpush1.bf16.msra.mxu1 %v7089_v28  ;;  %v7162_v27 = vld [vmem:[%s8112_s27 + $0x300] ss:$16 sps:$4 sm:$0xff]   ;;  %v7170_v28 = vld [vmem:[%s8112_s27 + $0x324] ss:$16 sps:$4 sm:$0xff]  }
 0x2a5   : > { %4158 = vmatprep.subr.bf16.mxu0 %v7090_v29  ;;  %4486 = vmatprep.subr.bf16.mxu1 %v7092_v30  ;;  %v7173_v29 = vld [vmem:[%s8112_s27 + $0x32c] ss:$16 sps:$4 sm:$0xff]   ;;  %v7168_v30 = vld [vmem:[%s8112_s27 + $0x320] ss:$16 sps:$4 sm:$0xff]  }
 0x2a8   : > { %4159 = vmatpush1.bf16.msra.mxu0 %v7094_v32  ;;  %4487 = vmatpush1.bf16.msra.mxu1 %v7095_v33  ;;  %v7176_v32 = vld [vmem:[%s8112_s27 + $0x344] ss:$16 sps:$4 sm:$0xff]   ;;  %v7179_v33 = vld [vmem:[%s8112_s27 + $0x34c] ss:$16 sps:$4 sm:$0xff]  }
 0x2a9   : > { %4160 = vmatprep.subr.bf16.mxu0 %v7096_v34  ;;  %4488 = vmatprep.subr.bf16.mxu1 %v7098_v35  ;;  %v7174_v34 = vld [vmem:[%s8112_s27 + $0x340] ss:$16 sps:$4 sm:$0xff]   ;;  %v7177_v35 = vld [vmem:[%s8112_s27 + $0x348] ss:$16 sps:$4 sm:$0xff]  }
 0x2ac   : > { %4161 = vmatpush1.bf16.msra.mxu0 %v7100_v36  ;;  %4489 = vmatpush1.bf16.msra.mxu1 %v7101_v37  ;;  %v7182_v36 = vld [vmem:[%s8112_s27 + $0x364] ss:$16 sps:$4 sm:$0xff]   ;;  %v7185_v37 = vld [vmem:[%s8112_s27 + $0x36c] ss:$16 sps:$4 sm:$0xff]  }
 0x2ad   : > { %4162 = vmatprep.subr.bf16.mxu0 %v7102_v38  ;;  %4490 = vmatprep.subr.bf16.mxu1 %v7104_v39  ;;  %v7180_v38 = vld [vmem:[%s8112_s27 + $0x360] ss:$16 sps:$4 sm:$0xff]   ;;  %v7183_v39 = vld [vmem:[%s8112_s27 + $0x368] ss:$16 sps:$4 sm:$0xff]  }
 0x2b0   : > { %4163 = vmatpush1.bf16.msra.mxu0 %v7106_v40  ;;  %4491 = vmatpush1.bf16.msra.mxu1 %v7107_v42  ;;  %v7188_v40 = vld [vmem:[%s8112_s27 + $0x384] ss:$16 sps:$4 sm:$0xff]   ;;  %v7191_v42 = vld [vmem:[%s8112_s27 + $0x38c] ss:$16 sps:$4 sm:$0xff]  }
 0x2b1   : > { %4164 = vmatprep.subr.bf16.mxu0 %v7108_v43  ;;  %4492 = vmatprep.subr.bf16.mxu1 %v7110_v44  ;;  %v7186_v43 = vld [vmem:[%s8112_s27 + $0x380] ss:$16 sps:$4 sm:$0xff]   ;;  %v7189_v44 = vld [vmem:[%s8112_s27 + $0x388] ss:$16 sps:$4 sm:$0xff]  }
 0x2b4   : > { %4165 = vmatpush1.bf16.msra.mxu0 %v7112_v46  ;;  %4493 = vmatpush1.bf16.msra.mxu1 %v7113_v48  ;;  %v7194_v46 = vld [vmem:[%s8112_s27 + $0x3a4] ss:$16 sps:$4 sm:$0xff]   ;;  %v7192_v48 = vld [vmem:[%s8112_s27 + $0x3a0] ss:$16 sps:$4 sm:$0xff]  }
 0x2b5   : > { %4175 = vmatprep.subr.bf16.mxu0 %v7116_v49  ;;  %4503 = vmatprep.subr.bf16.mxu1 %v7119_v50  ;;  %v7195_v49 = vld [vmem:[%s8112_s27 + $0x3a8] ss:$16 sps:$4 sm:$0xff]   ;;  %v7200_v50 = vld [vmem:[%s8112_s27 + $0x3c4] ss:$16 sps:$4 sm:$0xff]  }
 0x2b7   : > { %4167 = vmatmul.mubr.bf16.vlgmr.msra.gmra.mrb[0].mxu0 %v1046_v53  ;;  %4495 = vmatmul.mubr.bf16.vlgmr.msra.gmra.mrb[0].mxu1 %v1046_v53  ;;  %v8447_v53 = vsub.s32 2, %v8342_v16 }
 0x2b8   : > { %4176 = vmatpush1.bf16.msra.mxu0 %v7114_v52  ;;  %4504 = vmatpush1.bf16.msra.mxu1 %v7117_v54  ;;  %v7198_v52 = vld [vmem:[%s8112_s27 + $0x3c0] ss:$16 sps:$4 sm:$0xff]   ;;  %v7201_v54 = vld [vmem:[%s8112_s27 + $0x3c8] ss:$16 sps:$4 sm:$0xff]  }
 0x2b9   : > { %4177 = vmatprep.subr.bf16.mxu0 %v7122_v55  ;;  %4505 = vmatprep.subr.bf16.mxu1 %v7125_v56  ;;  %v7206_v55 = vld [vmem:[%s8112_s27 + $0x3e4] ss:$16 sps:$4 sm:$0xff]   ;;  %v7209_v56 = vld [vmem:[%s8112_s27 + $0x3ec] ss:$16 sps:$4 sm:$0xff]  }
 0x2ba   : > { %4207 = vmatprep.mubr.bf16.mxu0 %v1049_v57  ;;  %4535 = vmatprep.mubr.bf16.mxu1 %v1049_v57  ;;  %v988_v57 = vsub.s32 5, %v8342_v16 }
 0x2bc   : > { %4178 = vmatpush1.bf16.msra.mxu0 %v7120_v58  ;;  %4506 = vmatpush1.bf16.msra.mxu1 %v7123_v59  ;;  %v7204_v58 = vld [vmem:[%s8112_s27 + $0x3e0] ss:$16 sps:$4 sm:$0xff]   ;;  %v977_v59 = vrot.slane %v8355_v26, %v8447_v53 }
 0x2bd   : > { %4179 = vmatprep.subr.bf16.mxu0 %v7128_v60  ;;  %4507 = vmatprep.subr.bf16.mxu1 %v7131_v61  ;;  %v7207_v60 = vld [vmem:[%s8112_s27 + $0x3e8] ss:$16 sps:$4 sm:$0xff]   ;;  %v7212_v61 = vld [vmem:[%s8112_s27 + $0x404] ss:$16 sps:$4 sm:$0xff]  }
 0x2c0   : > { %4180 = vmatpush1.bf16.msra.mxu0 %v7126_v62  ;;  %4508 = vmatpush1.bf16.msra.mxu1 %v7129_v63  ;;  %v7215_v62 = vld [vmem:[%s8112_s27 + $0x40c] ss:$16 sps:$4 sm:$0xff]   ;;  %v989_v63 = vrot.slane %v8355_v26, %v988_v57  ;;  %v7219_v26 = vld [vmem:[%s8112_s27 + $0x428] ss:$16 sps:$4 sm:$0xff]  }
 0x2c1   : > { %4181 = vmatprep.subr.bf16.mxu0 %v7134_v0  ;;  %4509 = vmatprep.subr.bf16.mxu1 %v7137_v1  ;;  %v7210_v0 = vld [vmem:[%s8112_s27 + $0x400] ss:$16 sps:$4 sm:$0xff]   ;;  %v1048_v1 = vpack.c.bf16 %v977_v59, %v977_v59  ;;  %v7290_v59 = vld [vmem:[%s8112_s27 + $0x5a4] ss:$16 sps:$4 sm:$0xff]  }
 0x2c4   : > { %4182 = vmatpush1.bf16.msra.mxu0 %v7132_v2  ;;  %4510 = vmatpush1.bf16.msra.mxu1 %v7135_v3  ;;  %v7213_v2 = vld [vmem:[%s8112_s27 + $0x408] ss:$16 sps:$4 sm:$0xff]   ;;  %v7218_v3 = vld [vmem:[%s8112_s27 + $0x424] ss:$16 sps:$4 sm:$0xff]  }
 0x2c5   : > { %4183 = vmatprep.subr.bf16.mxu0 %v7140_v4  ;;  %4511 = vmatprep.subr.bf16.mxu1 %v7143_v5  ;;  %v7221_v4 = vld [vmem:[%s8112_s27 + $0x42c] ss:$16 sps:$4 sm:$0xff]   ;;  %v1051_v5 = vpack.c.bf16 %v989_v63, %v989_v63  ;;  %v7296_v63 = vld [vmem:[%s8112_s27 + $0x5c4] ss:$16 sps:$4 sm:$0xff]  }
 0x2c8   : > { %4184 = vmatpush1.bf16.msra.mxu0 %v7138_v6  ;;  %4512 = vmatpush1.bf16.msra.mxu1 %v7141_v7  ;;  %v7216_v6 = vld [vmem:[%s8112_s27 + $0x420] ss:$16 sps:$4 sm:$0xff]   ;;  %v7224_v7 = vld [vmem:[%s8112_s27 + $0x444] ss:$16 sps:$4 sm:$0xff]  }
 0x2c9   : > { %4185 = vmatprep.subr.bf16.mxu0 %v7146_v8  ;;  %4513 = vmatprep.subr.bf16.mxu1 %v7149_v9  ;;  %v7227_v8 = vld [vmem:[%s8112_s27 + $0x44c] ss:$16 sps:$4 sm:$0xff]   ;;  %v7222_v9 = vld [vmem:[%s8112_s27 + $0x440] ss:$16 sps:$4 sm:$0xff]  }
 0x2cc   : > { %4186 = vmatpush1.bf16.msra.mxu0 %v7144_v10  ;;  %4514 = vmatpush1.bf16.msra.mxu1 %v7147_v11  ;;  %v7225_v10 = vld [vmem:[%s8112_s27 + $0x448] ss:$16 sps:$4 sm:$0xff]   ;;  %v7230_v11 = vld [vmem:[%s8112_s27 + $0x464] ss:$16 sps:$4 sm:$0xff]  }
 0x2cd   : > { %4187 = vmatprep.subr.bf16.mxu0 %v7152_v13  ;;  %4515 = vmatprep.subr.bf16.mxu1 %v7155_v14  ;;  %v7233_v13 = vld [vmem:[%s8112_s27 + $0x46c] ss:$16 sps:$4 sm:$0xff]   ;;  %v7228_v14 = vld [vmem:[%s8112_s27 + $0x460] ss:$16 sps:$4 sm:$0xff]  }
 0x2d0   : > { %4188 = vmatpush1.bf16.msra.mxu0 %v7150_v15  ;;  %4516 = vmatpush1.bf16.msra.mxu1 %v7153_v17  ;;  %v7231_v15 = vld [vmem:[%s8112_s27 + $0x468] ss:$16 sps:$4 sm:$0xff]   ;;  %v7236_v17 = vld [vmem:[%s8112_s27 + $0x484] ss:$16 sps:$4 sm:$0xff]  }
 0x2d1   : > { %4189 = vmatprep.subr.bf16.mxu0 %v7158_v18  ;;  %4517 = vmatprep.subr.bf16.mxu1 %v7161_v19  ;;  %v7239_v18 = vld [vmem:[%s8112_s27 + $0x48c] ss:$16 sps:$4 sm:$0xff]   ;;  %v7234_v19 = vld [vmem:[%s8112_s27 + $0x480] ss:$16 sps:$4 sm:$0xff]  }
 0x2d4   : > { %4190 = vmatpush1.bf16.msra.mxu0 %v7156_v20  ;;  %4518 = vmatpush1.bf16.msra.mxu1 %v7159_v22  ;;  %v7237_v20 = vld [vmem:[%s8112_s27 + $0x488] ss:$16 sps:$4 sm:$0xff]   ;;  %v7242_v22 = vld [vmem:[%s8112_s27 + $0x4a4] ss:$16 sps:$4 sm:$0xff]  }
 0x2d5   : > { %4191 = vmatprep.subr.bf16.mxu0 %v7164_v24  ;;  %4519 = vmatprep.subr.bf16.mxu1 %v7167_v25  ;;  %v7245_v24 = vld [vmem:[%s8112_s27 + $0x4ac] ss:$16 sps:$4 sm:$0xff]   ;;  %v7240_v25 = vld [vmem:[%s8112_s27 + $0x4a0] ss:$16 sps:$4 sm:$0xff]  }
 0x2d8   : > { %4192 = vmatpush1.bf16.msra.mxu0 %v7162_v27  ;;  %4520 = vmatpush1.bf16.msra.mxu1 %v7165_v21  ;;  %v7243_v27 = vld [vmem:[%s8112_s27 + $0x4a8] ss:$16 sps:$4 sm:$0xff]   ;;  %v7248_v21 = vld [vmem:[%s8112_s27 + $0x4c4] ss:$16 sps:$4 sm:$0xff]  }
 0x2d9   : > { %4193 = vmatprep.subr.bf16.mxu0 %v7170_v28  ;;  %4521 = vmatprep.subr.bf16.mxu1 %v7173_v29  ;;  %v7251_v28 = vld [vmem:[%s8112_s27 + $0x4cc] ss:$16 sps:$4 sm:$0xff]   ;;  %v7246_v29 = vld [vmem:[%s8112_s27 + $0x4c0] ss:$16 sps:$4 sm:$0xff]  }
 0x2dc   : > { %4194 = vmatpush1.bf16.msra.mxu0 %v7168_v30  ;;  %4522 = vmatpush1.bf16.msra.mxu1 %v7171_v31  ;;  %v7249_v30 = vld [vmem:[%s8112_s27 + $0x4c8] ss:$16 sps:$4 sm:$0xff]   ;;  %v7254_v31 = vld [vmem:[%s8112_s27 + $0x4e4] ss:$16 sps:$4 sm:$0xff]  }
 0x2dd   : > { %4195 = vmatprep.subr.bf16.mxu0 %v7176_v32  ;;  %4523 = vmatprep.subr.bf16.mxu1 %v7179_v33  ;;  %v7257_v32 = vld [vmem:[%s8112_s27 + $0x4ec] ss:$16 sps:$4 sm:$0xff]   ;;  %v7252_v33 = vld [vmem:[%s8112_s27 + $0x4e0] ss:$16 sps:$4 sm:$0xff]  }
 0x2e0   : > { %4196 = vmatpush1.bf16.msra.mxu0 %v7174_v34  ;;  %4524 = vmatpush1.bf16.msra.mxu1 %v7177_v35  ;;  %v7255_v34 = vld [vmem:[%s8112_s27 + $0x4e8] ss:$16 sps:$4 sm:$0xff]   ;;  %v7260_v35 = vld [vmem:[%s8112_s27 + $0x504] ss:$16 sps:$4 sm:$0xff]  }
 0x2e1   : > { %4197 = vmatprep.subr.bf16.mxu0 %v7182_v36  ;;  %4525 = vmatprep.subr.bf16.mxu1 %v7185_v37  ;;  %v7263_v36 = vld [vmem:[%s8112_s27 + $0x50c] ss:$16 sps:$4 sm:$0xff]   ;;  %v7258_v37 = vld [vmem:[%s8112_s27 + $0x500] ss:$16 sps:$4 sm:$0xff]  }
 0x2e4   : > { %4198 = vmatpush1.bf16.msra.mxu0 %v7180_v38  ;;  %4526 = vmatpush1.bf16.msra.mxu1 %v7183_v39  ;;  %v7261_v38 = vld [vmem:[%s8112_s27 + $0x508] ss:$16 sps:$4 sm:$0xff]   ;;  %v7266_v39 = vld [vmem:[%s8112_s27 + $0x524] ss:$16 sps:$4 sm:$0xff]  }
 0x2e5   : > { %4199 = vmatprep.subr.bf16.mxu0 %v7188_v40  ;;  %4527 = vmatprep.subr.bf16.mxu1 %v7191_v42  ;;  %v7269_v40 = vld [vmem:[%s8112_s27 + $0x52c] ss:$16 sps:$4 sm:$0xff]   ;;  %v7264_v42 = vld [vmem:[%s8112_s27 + $0x520] ss:$16 sps:$4 sm:$0xff]  }
 0x2e8   : > { %4200 = vmatpush1.bf16.msra.mxu0 %v7186_v43  ;;  %4528 = vmatpush1.bf16.msra.mxu1 %v7189_v44  ;;  %v7267_v43 = vld [vmem:[%s8112_s27 + $0x528] ss:$16 sps:$4 sm:$0xff]   ;;  %v7272_v44 = vld [vmem:[%s8112_s27 + $0x544] ss:$16 sps:$4 sm:$0xff]  }
 0x2e9   : > { %4201 = vmatprep.subr.bf16.mxu0 %v7194_v46  ;;  %4529 = vmatprep.subr.bf16.mxu1 %v7197_v47  ;;  %v7275_v46 = vld [vmem:[%s8112_s27 + $0x54c] ss:$16 sps:$4 sm:$0xff]   ;;  %v7270_v47 = vld [vmem:[%s8112_s27 + $0x540] ss:$16 sps:$4 sm:$0xff]  }
 0x2ec   : > { %4202 = vmatpush1.bf16.msra.mxu0 %v7192_v48  ;;  %4530 = vmatpush1.bf16.msra.mxu1 %v7195_v49  ;;  %v7273_v48 = vld [vmem:[%s8112_s27 + $0x548] ss:$16 sps:$4 sm:$0xff]   ;;  %v7278_v49 = vld [vmem:[%s8112_s27 + $0x564] ss:$16 sps:$4 sm:$0xff]  }
 0x2ed   : > { %4203 = vmatprep.subr.bf16.mxu0 %v7200_v50  ;;  %4531 = vmatprep.subr.bf16.mxu1 %v7203_v51  ;;  %v7281_v50 = vld [vmem:[%s8112_s27 + $0x56c] ss:$16 sps:$4 sm:$0xff]   ;;  %v7276_v51 = vld [vmem:[%s8112_s27 + $0x560] ss:$16 sps:$4 sm:$0xff]  }
 0x2f0   : > { %4204 = vmatpush1.bf16.msra.mxu0 %v7198_v52  ;;  %4532 = vmatpush1.bf16.msra.mxu1 %v7201_v54  ;;  %v7279_v52 = vld [vmem:[%s8112_s27 + $0x568] ss:$16 sps:$4 sm:$0xff]   ;;  %v7284_v54 = vld [vmem:[%s8112_s27 + $0x584] ss:$16 sps:$4 sm:$0xff]  }
 0x2f1   : > { %4205 = vmatprep.subr.bf16.mxu0 %v7206_v55  ;;  %4533 = vmatprep.subr.bf16.mxu1 %v7209_v56  ;;  %v7287_v55 = vld [vmem:[%s8112_s27 + $0x58c] ss:$16 sps:$4 sm:$0xff]   ;;  %v7282_v56 = vld [vmem:[%s8112_s27 + $0x580] ss:$16 sps:$4 sm:$0xff]  }
 0x2f4   : > { %4206 = vmatpush1.bf16.msra.mxu0 %v7204_v58  ;;  %4534 = vmatpush1.bf16.msra.mxu1 %v7207_v60  ;;  %v7285_v58 = vld [vmem:[%s8112_s27 + $0x588] ss:$16 sps:$4 sm:$0xff]   ;;  %v7293_v60 = vld [vmem:[%s8112_s27 + $0x5ac] ss:$16 sps:$4 sm:$0xff]  }
 0x2f5   : > { %4216 = vmatprep.subr.bf16.mxu0 %v7212_v61  ;;  %4544 = vmatprep.subr.bf16.mxu1 %v7215_v62  ;;  %v7288_v61 = vld [vmem:[%s8112_s27 + $0x5a0] ss:$16 sps:$4 sm:$0xff]   ;;  %v7291_v62 = vld [vmem:[%s8112_s27 + $0x5a8] ss:$16 sps:$4 sm:$0xff]  }
 0x2f7   : > { %4208 = vmatmul.mubr.bf16.vlgmr.msra.gmra.mrb[0].mxu0 %v1048_v1  ;;  %4536 = vmatmul.mubr.bf16.vlgmr.msra.gmra.mrb[0].mxu1 %v1048_v1  ;;  %v7294_v1 = vld [vmem:[%s8112_s27 + $0x5c0] ss:$16 sps:$4 sm:$0xff]  }
 0x2f8   : > { %4217 = vmatpush1.bf16.msra.mxu0 %v7210_v0  ;;  %4545 = vmatpush1.bf16.msra.mxu1 %v7213_v2  ;;  %v7299_v0 = vld [vmem:[%s8112_s27 + $0x5cc] ss:$16 sps:$4 sm:$0xff]   ;;  %v984_v2 = vsub.s32 4, %v8342_v16 }
 0x2f9   : > { %4218 = vmatprep.subr.bf16.mxu0 %v7218_v3  ;;  %4546 = vmatprep.subr.bf16.mxu1 %v7221_v4  ;;  %v7297_v3 = vld [vmem:[%s8112_s27 + $0x5c8] ss:$16 sps:$4 sm:$0xff]   ;;  %v7302_v4 = vld [vmem:[%s8112_s27 + $0x5e4] ss:$16 sps:$4 sm:$0xff]  }
 0x2fa   : > { %4248 = vmatprep.mubr.bf16.mxu0 %v1051_v5  ;;  %4576 = vmatprep.mubr.bf16.mxu1 %v1051_v5  ;;  %v7305_v5 = vld [vmem:[%s8112_s27 + $0x5ec] ss:$16 sps:$4 sm:$0xff]  }
 0x2fc   : > { %4219 = vmatpush1.bf16.msra.mxu0 %v7216_v6  ;;  %4547 = vmatpush1.bf16.msra.mxu1 %v7219_v26  ;;  %v996_v6 = vsub.s32 7, %v8342_v16  ;;  %v7300_v26 = vld [vmem:[%s8112_s27 + $0x5e0] ss:$16 sps:$4 sm:$0xff]  }
 0x2fd   : > { %4220 = vmatprep.subr.bf16.mxu0 %v7224_v7  ;;  %4548 = vmatprep.subr.bf16.mxu1 %v7227_v8  ;;  %v8526_v7 = vld [vmem:[%s8107_s23] sm:$0xff] }
 0x2fe   : > { %v985_v8 = vrot.slane %v8526_v7, %v984_v2 }
 0x300   : > { %4221 = vmatpush1.bf16.msra.mxu0 %v7222_v9  ;;  %4549 = vmatpush1.bf16.msra.mxu1 %v7225_v10  ;;  %v7303_v9 = vld [vmem:[%s8112_s27 + $0x5e8] ss:$16 sps:$4 sm:$0xff]   ;;  %v7308_v10 = vld [vmem:[%s8112_s27 + $0x604] ss:$16 sps:$4 sm:$0xff]  }
 0x301   : > { %4222 = vmatprep.subr.bf16.mxu0 %v7230_v11  ;;  %4550 = vmatprep.subr.bf16.mxu1 %v7233_v13  ;;  %v7311_v11 = vld [vmem:[%s8112_s27 + $0x60c] ss:$16 sps:$4 sm:$0xff]   ;;  %v997_v13 = vrot.slane %v8526_v7, %v996_v6 }
 0x304   : > { %4223 = vmatpush1.bf16.msra.mxu0 %v7228_v14  ;;  %4551 = vmatpush1.bf16.msra.mxu1 %v7231_v15  ;;  %v7306_v14 = vld [vmem:[%s8112_s27 + $0x600] ss:$16 sps:$4 sm:$0xff]   ;;  %v1050_v15 = vpack.c.bf16 %v985_v8, %v985_v8  ;;  %v7383_v8 = vld [vmem:[%s8112_s27 + $0x78c] ss:$16 sps:$4 sm:$0xff]  }
 0x305   : > { %4224 = vmatprep.subr.bf16.mxu0 %v7236_v17  ;;  %4552 = vmatprep.subr.bf16.mxu1 %v7239_v18  ;;  %v7309_v17 = vld [vmem:[%s8112_s27 + $0x608] ss:$16 sps:$4 sm:$0xff]   ;;  %v7314_v18 = vld [vmem:[%s8112_s27 + $0x624] ss:$16 sps:$4 sm:$0xff]  }
 0x308   : > { %4225 = vmatpush1.bf16.msra.mxu0 %v7234_v19  ;;  %4553 = vmatpush1.bf16.msra.mxu1 %v7237_v20  ;;  %v7317_v19 = vld [vmem:[%s8112_s27 + $0x62c] ss:$16 sps:$4 sm:$0xff]   ;;  %v1053_v20 = vpack.c.bf16 %v997_v13, %v997_v13 }
 0x309   : > { %4226 = vmatprep.subr.bf16.mxu0 %v7242_v22  ;;  %4554 = vmatprep.subr.bf16.mxu1 %v7245_v24  ;;  %v7312_v22 = vld [vmem:[%s8112_s27 + $0x620] ss:$16 sps:$4 sm:$0xff]   ;;  %v7315_v24 = vld [vmem:[%s8112_s27 + $0x628] ss:$16 sps:$4 sm:$0xff]   ;;  %v7389_v13 = vld [vmem:[%s8112_s27 + $0x7ac] ss:$16 sps:$4 sm:$0xff]  }
 0x30c   : > { %4227 = vmatpush1.bf16.msra.mxu0 %v7240_v25  ;;  %4555 = vmatpush1.bf16.msra.mxu1 %v7243_v27  ;;  %v7320_v25 = vld [vmem:[%s8112_s27 + $0x644] ss:$16 sps:$4 sm:$0xff]   ;;  %v7323_v27 = vld [vmem:[%s8112_s27 + $0x64c] ss:$16 sps:$4 sm:$0xff]  }
 0x30d   : > { %4228 = vmatprep.subr.bf16.mxu0 %v7248_v21  ;;  %4556 = vmatprep.subr.bf16.mxu1 %v7251_v28  ;;  %v7318_v21 = vld [vmem:[%s8112_s27 + $0x640] ss:$16 sps:$4 sm:$0xff]   ;;  %v7321_v28 = vld [vmem:[%s8112_s27 + $0x648] ss:$16 sps:$4 sm:$0xff]  }
 0x310   : > { %4229 = vmatpush1.bf16.msra.mxu0 %v7246_v29  ;;  %4557 = vmatpush1.bf16.msra.mxu1 %v7249_v30  ;;  %v7326_v29 = vld [vmem:[%s8112_s27 + $0x664] ss:$16 sps:$4 sm:$0xff]   ;;  %v7329_v30 = vld [vmem:[%s8112_s27 + $0x66c] ss:$16 sps:$4 sm:$0xff]  }
 0x311   : > { %4230 = vmatprep.subr.bf16.mxu0 %v7254_v31  ;;  %4558 = vmatprep.subr.bf16.mxu1 %v7257_v32  ;;  %v7324_v31 = vld [vmem:[%s8112_s27 + $0x660] ss:$16 sps:$4 sm:$0xff]   ;;  %v7327_v32 = vld [vmem:[%s8112_s27 + $0x668] ss:$16 sps:$4 sm:$0xff]  }
 0x314   : > { %4231 = vmatpush1.bf16.msra.mxu0 %v7252_v33  ;;  %4559 = vmatpush1.bf16.msra.mxu1 %v7255_v34  ;;  %v7332_v33 = vld [vmem:[%s8112_s27 + $0x684] ss:$16 sps:$4 sm:$0xff]   ;;  %v7335_v34 = vld [vmem:[%s8112_s27 + $0x68c] ss:$16 sps:$4 sm:$0xff]  }
 0x315   : > { %4232 = vmatprep.subr.bf16.mxu0 %v7260_v35  ;;  %4560 = vmatprep.subr.bf16.mxu1 %v7263_v36  ;;  %v7330_v35 = vld [vmem:[%s8112_s27 + $0x680] ss:$16 sps:$4 sm:$0xff]   ;;  %v7333_v36 = vld [vmem:[%s8112_s27 + $0x688] ss:$16 sps:$4 sm:$0xff]  }
 0x318   : > { %4233 = vmatpush1.bf16.msra.mxu0 %v7258_v37  ;;  %4561 = vmatpush1.bf16.msra.mxu1 %v7261_v38  ;;  %v7338_v37 = vld [vmem:[%s8112_s27 + $0x6a4] ss:$16 sps:$4 sm:$0xff]   ;;  %v7341_v38 = vld [vmem:[%s8112_s27 + $0x6ac] ss:$16 sps:$4 sm:$0xff]  }
 0x319   : > { %4234 = vmatprep.subr.bf16.mxu0 %v7266_v39  ;;  %4562 = vmatprep.subr.bf16.mxu1 %v7269_v40  ;;  %v7336_v39 = vld [vmem:[%s8112_s27 + $0x6a0] ss:$16 sps:$4 sm:$0xff]   ;;  %v7339_v40 = vld [vmem:[%s8112_s27 + $0x6a8] ss:$16 sps:$4 sm:$0xff]  }
 0x31c   : > { %4235 = vmatpush1.bf16.msra.mxu0 %v7264_v42  ;;  %4563 = vmatpush1.bf16.msra.mxu1 %v7267_v43  ;;  %v7344_v42 = vld [vmem:[%s8112_s27 + $0x6c4] ss:$16 sps:$4 sm:$0xff]   ;;  %v7347_v43 = vld [vmem:[%s8112_s27 + $0x6cc] ss:$16 sps:$4 sm:$0xff]  }
 0x31d   : > { %4236 = vmatprep.subr.bf16.mxu0 %v7272_v44  ;;  %4564 = vmatprep.subr.bf16.mxu1 %v7275_v46  ;;  %v7342_v44 = vld [vmem:[%s8112_s27 + $0x6c0] ss:$16 sps:$4 sm:$0xff]   ;;  %v7345_v46 = vld [vmem:[%s8112_s27 + $0x6c8] ss:$16 sps:$4 sm:$0xff]  }
 0x320   : > { %4237 = vmatpush1.bf16.msra.mxu0 %v7270_v47  ;;  %4565 = vmatpush1.bf16.msra.mxu1 %v7273_v48  ;;  %v7350_v47 = vld [vmem:[%s8112_s27 + $0x6e4] ss:$16 sps:$4 sm:$0xff]   ;;  %v7353_v48 = vld [vmem:[%s8112_s27 + $0x6ec] ss:$16 sps:$4 sm:$0xff]  }
 0x321   : > { %4238 = vmatprep.subr.bf16.mxu0 %v7278_v49  ;;  %4566 = vmatprep.subr.bf16.mxu1 %v7281_v50  ;;  %v7348_v49 = vld [vmem:[%s8112_s27 + $0x6e0] ss:$16 sps:$4 sm:$0xff]   ;;  %v7351_v50 = vld [vmem:[%s8112_s27 + $0x6e8] ss:$16 sps:$4 sm:$0xff]  }
 0x324   : > { %4239 = vmatpush1.bf16.msra.mxu0 %v7276_v51  ;;  %4567 = vmatpush1.bf16.msra.mxu1 %v7279_v52  ;;  %v7356_v51 = vld [vmem:[%s8112_s27 + $0x704] ss:$16 sps:$4 sm:$0xff]   ;;  %v7359_v52 = vld [vmem:[%s8112_s27 + $0x70c] ss:$16 sps:$4 sm:$0xff]  }
 0x325   : > { %4240 = vmatprep.subr.bf16.mxu0 %v7284_v54  ;;  %4568 = vmatprep.subr.bf16.mxu1 %v7287_v55  ;;  %v7354_v54 = vld [vmem:[%s8112_s27 + $0x700] ss:$16 sps:$4 sm:$0xff]   ;;  %v7357_v55 = vld [vmem:[%s8112_s27 + $0x708] ss:$16 sps:$4 sm:$0xff]  }
 0x328   : > { %4241 = vmatpush1.bf16.msra.mxu0 %v7282_v56  ;;  %4569 = vmatpush1.bf16.msra.mxu1 %v7285_v58  ;;  %v7362_v56 = vld [vmem:[%s8112_s27 + $0x724] ss:$16 sps:$4 sm:$0xff]   ;;  %v7365_v58 = vld [vmem:[%s8112_s27 + $0x72c] ss:$16 sps:$4 sm:$0xff]  }
 0x329   : > { %4242 = vmatprep.subr.bf16.mxu0 %v7290_v59  ;;  %4570 = vmatprep.subr.bf16.mxu1 %v7293_v60  ;;  %v7360_v59 = vld [vmem:[%s8112_s27 + $0x720] ss:$16 sps:$4 sm:$0xff]   ;;  %v7363_v60 = vld [vmem:[%s8112_s27 + $0x728] ss:$16 sps:$4 sm:$0xff]  }
 0x32c   : > { %4243 = vmatpush1.bf16.msra.mxu0 %v7288_v61  ;;  %4571 = vmatpush1.bf16.msra.mxu1 %v7291_v62  ;;  %v7368_v61 = vld [vmem:[%s8112_s27 + $0x744] ss:$16 sps:$4 sm:$0xff]   ;;  %v7371_v62 = vld [vmem:[%s8112_s27 + $0x74c] ss:$16 sps:$4 sm:$0xff]  }
 0x32d   : > { %4244 = vmatprep.subr.bf16.mxu0 %v7296_v63  ;;  %4572 = vmatprep.subr.bf16.mxu1 %v7299_v0  ;;  %v7366_v63 = vld [vmem:[%s8112_s27 + $0x740] ss:$16 sps:$4 sm:$0xff]   ;;  %v7369_v0 = vld [vmem:[%s8112_s27 + $0x748] ss:$16 sps:$4 sm:$0xff]  }
 0x330   : > { %4245 = vmatpush1.bf16.msra.mxu0 %v7294_v1  ;;  %4573 = vmatpush1.bf16.msra.mxu1 %v7297_v3  ;;  %v7374_v1 = vld [vmem:[%s8112_s27 + $0x764] ss:$16 sps:$4 sm:$0xff]   ;;  %v7377_v3 = vld [vmem:[%s8112_s27 + $0x76c] ss:$16 sps:$4 sm:$0xff]  }
 0x331   : > { %4246 = vmatprep.subr.bf16.mxu0 %v7302_v4  ;;  %4574 = vmatprep.subr.bf16.mxu1 %v7305_v5  ;;  %v7372_v4 = vld [vmem:[%s8112_s27 + $0x760] ss:$16 sps:$4 sm:$0xff]   ;;  %v7375_v5 = vld [vmem:[%s8112_s27 + $0x768] ss:$16 sps:$4 sm:$0xff]  }
 0x334   : > { %4247 = vmatpush1.bf16.msra.mxu0 %v7300_v26  ;;  %4575 = vmatpush1.bf16.msra.mxu1 %v7303_v9  ;;  %v7380_v26 = vld [vmem:[%s8112_s27 + $0x784] ss:$16 sps:$4 sm:$0xff]   ;;  %v7378_v9 = vld [vmem:[%s8112_s27 + $0x780] ss:$16 sps:$4 sm:$0xff]  }
 0x335   : > { %4257 = vmatprep.subr.bf16.mxu0 %v7308_v10  ;;  %4585 = vmatprep.subr.bf16.mxu1 %v7311_v11  ;;  %v7381_v10 = vld [vmem:[%s8112_s27 + $0x788] ss:$16 sps:$4 sm:$0xff]   ;;  %v7386_v11 = vld [vmem:[%s8112_s27 + $0x7a4] ss:$16 sps:$4 sm:$0xff]  }
 0x337   : > { %4249 = vmatmul.mubr.bf16.vlgmr.msra.gmra.mrb[0].mxu0 %v1050_v15  ;;  %4577 = vmatmul.mubr.bf16.vlgmr.msra.gmra.mrb[0].mxu1 %v1050_v15  ;;  %v7387_v15 = vld [vmem:[%s8112_s27 + $0x7a8] ss:$16 sps:$4 sm:$0xff]  }
 0x338   : > { %4258 = vmatpush1.bf16.msra.mxu0 %v7306_v14  ;;  %4586 = vmatpush1.bf16.msra.mxu1 %v7309_v17  ;;  %v7384_v14 = vld [vmem:[%s8112_s27 + $0x7a0] ss:$16 sps:$4 sm:$0xff]   ;;  %v7392_v17 = vld [vmem:[%s8112_s27 + $0x7c4] ss:$16 sps:$4 sm:$0xff]  }
 0x339   : > { %4259 = vmatprep.subr.bf16.mxu0 %v7314_v18  ;;  %4587 = vmatprep.subr.bf16.mxu1 %v7317_v19  ;;  %v7395_v18 = vld [vmem:[%s8112_s27 + $0x7cc] ss:$16 sps:$4 sm:$0xff]   ;;  %v992_v19 = vsub.s32 6, %v8342_v16 }
 0x33a   : > { %4289 = vmatprep.mubr.bf16.mxu0 %v1053_v20  ;;  %4617 = vmatprep.mubr.bf16.mxu1 %v1053_v20  ;;  %v7390_v20 = vld [vmem:[%s8112_s27 + $0x7c0] ss:$16 sps:$4 sm:$0xff]  }
 0x33c   : > { %4260 = vmatpush1.bf16.msra.mxu0 %v7312_v22  ;;  %4588 = vmatpush1.bf16.msra.mxu1 %v7315_v24  ;;  %v7393_v22 = vld [vmem:[%s8112_s27 + $0x7c8] ss:$16 sps:$4 sm:$0xff]   ;;  %v7398_v24 = vld [vmem:[%s8112_s27 + $0x7e4] ss:$16 sps:$4 sm:$0xff]  }
 0x33d   : > { %4261 = vmatprep.subr.bf16.mxu0 %v7320_v25  ;;  %4589 = vmatprep.subr.bf16.mxu1 %v7323_v27  ;;  %v7401_v25 = vld [vmem:[%s8112_s27 + $0x7ec] ss:$16 sps:$4 sm:$0xff]   ;;  %v993_v27 = vrot.slane %v8526_v7, %v992_v19  ;;  %v7402_v7 = vld [vmem:[%s8112_s27 + $0x800] ss:$16 sps:$4 sm:$0xff]  }
 0x340   : > { %4262 = vmatpush1.bf16.msra.mxu0 %v7318_v21  ;;  %4590 = vmatpush1.bf16.msra.mxu1 %v7321_v28  ;;  %v8602_v21 = vld [vmem:[%s8107_s23 + $0x8] sm:$0xff]  ;;  %v7396_v28 = vld [vmem:[%s8112_s27 + $0x7e0] ss:$16 sps:$4 sm:$0xff]  }
 0x341   : > { %4263 = vmatprep.subr.bf16.mxu0 %v7326_v29  ;;  %4591 = vmatprep.subr.bf16.mxu1 %v7329_v30  ;;  %v7399_v29 = vld [vmem:[%s8112_s27 + $0x7e8] ss:$16 sps:$4 sm:$0xff]   ;;  %v7404_v30 = vld [vmem:[%s8112_s27 + $0x804] ss:$16 sps:$4 sm:$0xff]  }
 0x344   : > { %4264 = vmatpush1.bf16.msra.mxu0 %v7324_v31  ;;  %4592 = vmatpush1.bf16.msra.mxu1 %v7327_v32  ;;  %v7407_v31 = vld [vmem:[%s8112_s27 + $0x80c] ss:$16 sps:$4 sm:$0xff]   ;;  %v1005_v32 = vrot.slane %v8602_v21, %v8350_v23 }
 0x345   : > { %4265 = vmatprep.subr.bf16.mxu0 %v7332_v33  ;;  %4593 = vmatprep.subr.bf16.mxu1 %v7335_v34  ;;  %v1052_v33 = vpack.c.bf16 %v993_v27, %v993_v27  ;;  %v7405_v34 = vld [vmem:[%s8112_s27 + $0x808] ss:$16 sps:$4 sm:$0xff]  }
 0x346   : > { %v7471_v27 = vld [vmem:[%s8112_s27 + $0x968] ss:$16 sps:$4 sm:$0xff]  }
 0x348   : > { %4266 = vmatpush1.bf16.msra.mxu0 %v7330_v35  ;;  %4594 = vmatpush1.bf16.msra.mxu1 %v7333_v36  ;;  %v7410_v35 = vld [vmem:[%s8112_s27 + $0x824] ss:$16 sps:$4 sm:$0xff]   ;;  %v7413_v36 = vld [vmem:[%s8112_s27 + $0x82c] ss:$16 sps:$4 sm:$0xff]  }
 0x349   : > { %4267 = vmatprep.subr.bf16.mxu0 %v7338_v37  ;;  %4595 = vmatprep.subr.bf16.mxu1 %v7341_v38  ;;  %v1055_v37 = vpack.c.bf16 %v1005_v32, %v1005_v32  ;;  %v7408_v38 = vld [vmem:[%s8112_s27 + $0x820] ss:$16 sps:$4 sm:$0xff]   ;;  %v7482_v32 = vld [vmem:[%s8112_s27 + $0x9a4] ss:$16 sps:$4 sm:$0xff]  }
 0x34c   : > { %4268 = vmatpush1.bf16.msra.mxu0 %v7336_v39  ;;  %4596 = vmatpush1.bf16.msra.mxu1 %v7339_v40  ;;  %v7411_v39 = vld [vmem:[%s8112_s27 + $0x828] ss:$16 sps:$4 sm:$0xff]   ;;  %v7416_v40 = vld [vmem:[%s8112_s27 + $0x844] ss:$16 sps:$4 sm:$0xff]  }
 0x34d   : > { %4269 = vmatprep.subr.bf16.mxu0 %v7344_v42  ;;  %4597 = vmatprep.subr.bf16.mxu1 %v7347_v43  ;;  %v7419_v42 = vld [vmem:[%s8112_s27 + $0x84c] ss:$16 sps:$4 sm:$0xff]   ;;  %v7414_v43 = vld [vmem:[%s8112_s27 + $0x840] ss:$16 sps:$4 sm:$0xff]  }
 0x350   : > { %4270 = vmatpush1.bf16.msra.mxu0 %v7342_v44  ;;  %4598 = vmatpush1.bf16.msra.mxu1 %v7345_v46  ;;  %v7417_v44 = vld [vmem:[%s8112_s27 + $0x848] ss:$16 sps:$4 sm:$0xff]   ;;  %v7422_v46 = vld [vmem:[%s8112_s27 + $0x864] ss:$16 sps:$4 sm:$0xff]  }
 0x351   : > { %4271 = vmatprep.subr.bf16.mxu0 %v7350_v47  ;;  %4599 = vmatprep.subr.bf16.mxu1 %v7353_v48  ;;  %v7425_v47 = vld [vmem:[%s8112_s27 + $0x86c] ss:$16 sps:$4 sm:$0xff]   ;;  %v7420_v48 = vld [vmem:[%s8112_s27 + $0x860] ss:$16 sps:$4 sm:$0xff]  }
 0x354   : > { %4272 = vmatpush1.bf16.msra.mxu0 %v7348_v49  ;;  %4600 = vmatpush1.bf16.msra.mxu1 %v7351_v50  ;;  %v7423_v49 = vld [vmem:[%s8112_s27 + $0x868] ss:$16 sps:$4 sm:$0xff]   ;;  %v7428_v50 = vld [vmem:[%s8112_s27 + $0x884] ss:$16 sps:$4 sm:$0xff]  }
 0x355   : > { %4273 = vmatprep.subr.bf16.mxu0 %v7356_v51  ;;  %4601 = vmatprep.subr.bf16.mxu1 %v7359_v52  ;;  %v7431_v51 = vld [vmem:[%s8112_s27 + $0x88c] ss:$16 sps:$4 sm:$0xff]   ;;  %v7426_v52 = vld [vmem:[%s8112_s27 + $0x880] ss:$16 sps:$4 sm:$0xff]  }
 0x358   : > { %4274 = vmatpush1.bf16.msra.mxu0 %v7354_v54  ;;  %4602 = vmatpush1.bf16.msra.mxu1 %v7357_v55  ;;  %v7429_v54 = vld [vmem:[%s8112_s27 + $0x888] ss:$16 sps:$4 sm:$0xff]   ;;  %v7434_v55 = vld [vmem:[%s8112_s27 + $0x8a4] ss:$16 sps:$4 sm:$0xff]  }
 0x359   : > { %4275 = vmatprep.subr.bf16.mxu0 %v7362_v56  ;;  %4603 = vmatprep.subr.bf16.mxu1 %v7365_v58  ;;  %v7437_v56 = vld [vmem:[%s8112_s27 + $0x8ac] ss:$16 sps:$4 sm:$0xff]   ;;  %v7432_v58 = vld [vmem:[%s8112_s27 + $0x8a0] ss:$16 sps:$4 sm:$0xff]  }
 0x35c   : > { %4276 = vmatpush1.bf16.msra.mxu0 %v7360_v59  ;;  %4604 = vmatpush1.bf16.msra.mxu1 %v7363_v60  ;;  %v7435_v59 = vld [vmem:[%s8112_s27 + $0x8a8] ss:$16 sps:$4 sm:$0xff]   ;;  %v7440_v60 = vld [vmem:[%s8112_s27 + $0x8c4] ss:$16 sps:$4 sm:$0xff]  }
 0x35d   : > { %4277 = vmatprep.subr.bf16.mxu0 %v7368_v61  ;;  %4605 = vmatprep.subr.bf16.mxu1 %v7371_v62  ;;  %v7443_v61 = vld [vmem:[%s8112_s27 + $0x8cc] ss:$16 sps:$4 sm:$0xff]   ;;  %v7438_v62 = vld [vmem:[%s8112_s27 + $0x8c0] ss:$16 sps:$4 sm:$0xff]  }
 0x360   : > { %4278 = vmatpush1.bf16.msra.mxu0 %v7366_v63  ;;  %4606 = vmatpush1.bf16.msra.mxu1 %v7369_v0  ;;  %v7441_v63 = vld [vmem:[%s8112_s27 + $0x8c8] ss:$16 sps:$4 sm:$0xff]   ;;  %v7446_v0 = vld [vmem:[%s8112_s27 + $0x8e4] ss:$16 sps:$4 sm:$0xff]  }
 0x361   : > { %4279 = vmatprep.subr.bf16.mxu0 %v7374_v1  ;;  %4607 = vmatprep.subr.bf16.mxu1 %v7377_v3  ;;  %v7449_v1 = vld [vmem:[%s8112_s27 + $0x8ec] ss:$16 sps:$4 sm:$0xff]   ;;  %v7444_v3 = vld [vmem:[%s8112_s27 + $0x8e0] ss:$16 sps:$4 sm:$0xff]  }
 0x364   : > { %4280 = vmatpush1.bf16.msra.mxu0 %v7372_v4  ;;  %4608 = vmatpush1.bf16.msra.mxu1 %v7375_v5  ;;  %v7447_v4 = vld [vmem:[%s8112_s27 + $0x8e8] ss:$16 sps:$4 sm:$0xff]   ;;  %v7452_v5 = vld [vmem:[%s8112_s27 + $0x904] ss:$16 sps:$4 sm:$0xff]  }
 0x365   : > { %4281 = vmatprep.subr.bf16.mxu0 %v7380_v26  ;;  %4609 = vmatprep.subr.bf16.mxu1 %v7383_v8  ;;  %v7455_v26 = vld [vmem:[%s8112_s27 + $0x90c] ss:$16 sps:$4 sm:$0xff]   ;;  %v7450_v8 = vld [vmem:[%s8112_s27 + $0x900] ss:$16 sps:$4 sm:$0xff]  }
 0x368   : > { %4282 = vmatpush1.bf16.msra.mxu0 %v7378_v9  ;;  %4610 = vmatpush1.bf16.msra.mxu1 %v7381_v10  ;;  %v7453_v9 = vld [vmem:[%s8112_s27 + $0x908] ss:$16 sps:$4 sm:$0xff]   ;;  %v7458_v10 = vld [vmem:[%s8112_s27 + $0x924] ss:$16 sps:$4 sm:$0xff]  }
 0x369   : > { %4283 = vmatprep.subr.bf16.mxu0 %v7386_v11  ;;  %4611 = vmatprep.subr.bf16.mxu1 %v7389_v13  ;;  %v7461_v11 = vld [vmem:[%s8112_s27 + $0x92c] ss:$16 sps:$4 sm:$0xff]   ;;  %v7456_v13 = vld [vmem:[%s8112_s27 + $0x920] ss:$16 sps:$4 sm:$0xff]  }
 0x36c   : > { %4284 = vmatpush1.bf16.msra.mxu0 %v7384_v14  ;;  %4612 = vmatpush1.bf16.msra.mxu1 %v7387_v15  ;;  %v7459_v14 = vld [vmem:[%s8112_s27 + $0x928] ss:$16 sps:$4 sm:$0xff]   ;;  %v7464_v15 = vld [vmem:[%s8112_s27 + $0x944] ss:$16 sps:$4 sm:$0xff]  }
 0x36d   : > { %4285 = vmatprep.subr.bf16.mxu0 %v7392_v17  ;;  %4613 = vmatprep.subr.bf16.mxu1 %v7395_v18  ;;  %v7467_v17 = vld [vmem:[%s8112_s27 + $0x94c] ss:$16 sps:$4 sm:$0xff]   ;;  %v7462_v18 = vld [vmem:[%s8112_s27 + $0x940] ss:$16 sps:$4 sm:$0xff]  }
 0x370   : > { %4286 = vmatpush1.bf16.msra.mxu0 %v7390_v20  ;;  %4614 = vmatpush1.bf16.msra.mxu1 %v7393_v22  ;;  %v7465_v20 = vld [vmem:[%s8112_s27 + $0x948] ss:$16 sps:$4 sm:$0xff]   ;;  %v7470_v22 = vld [vmem:[%s8112_s27 + $0x964] ss:$16 sps:$4 sm:$0xff]  }
 0x371   : > { %4287 = vmatprep.subr.bf16.mxu0 %v7398_v24  ;;  %4615 = vmatprep.subr.bf16.mxu1 %v7401_v25  ;;  %v7473_v24 = vld [vmem:[%s8112_s27 + $0x96c] ss:$16 sps:$4 sm:$0xff]   ;;  %v7468_v25 = vld [vmem:[%s8112_s27 + $0x960] ss:$16 sps:$4 sm:$0xff]  }
 0x374   : > { %4288 = vmatpush1.bf16.msra.mxu0 %v7396_v28  ;;  %4616 = vmatpush1.bf16.msra.mxu1 %v7399_v29  ;;  %v7476_v28 = vld [vmem:[%s8112_s27 + $0x984] ss:$16 sps:$4 sm:$0xff]   ;;  %v7479_v29 = vld [vmem:[%s8112_s27 + $0x98c] ss:$16 sps:$4 sm:$0xff]  }
 0x375   : > { %4298 = vmatprep.subr.bf16.mxu0 %v7404_v30  ;;  %4626 = vmatprep.subr.bf16.mxu1 %v7407_v31  ;;  %v7474_v30 = vld [vmem:[%s8112_s27 + $0x980] ss:$16 sps:$4 sm:$0xff]   ;;  %v7477_v31 = vld [vmem:[%s8112_s27 + $0x988] ss:$16 sps:$4 sm:$0xff]  }
 0x377   : > { %4290 = vmatmul.mubr.bf16.vlgmr.msra.gmra.mrb[0].mxu0 %v1052_v33  ;;  %4618 = vmatmul.mubr.bf16.vlgmr.msra.gmra.mrb[0].mxu1 %v1052_v33  ;;  %v7485_v33 = vld [vmem:[%s8112_s27 + $0x9ac] ss:$16 sps:$4 sm:$0xff]  }
 0x378   : > { %4299 = vmatpush1.bf16.msra.mxu0 %v7402_v7  ;;  %4627 = vmatpush1.bf16.msra.mxu1 %v7405_v34  ;;  %v7480_v7 = vld [vmem:[%s8112_s27 + $0x9a0] ss:$16 sps:$4 sm:$0xff]   ;;  %v7483_v34 = vld [vmem:[%s8112_s27 + $0x9a8] ss:$16 sps:$4 sm:$0xff]  }
 0x379   : > { %4300 = vmatprep.subr.bf16.mxu0 %v7410_v35  ;;  %4628 = vmatprep.subr.bf16.mxu1 %v7413_v36  ;;  %v7488_v35 = vld [vmem:[%s8112_s27 + $0x9c4] ss:$16 sps:$4 sm:$0xff]   ;;  %v7491_v36 = vld [vmem:[%s8112_s27 + $0x9cc] ss:$16 sps:$4 sm:$0xff]  }
 0x37a   : > { %4330 = vmatprep.mubr.bf16.mxu0 %v1055_v37  ;;  %4658 = vmatprep.mubr.bf16.mxu1 %v1055_v37  ;;  %v7486_v37 = vld [vmem:[%s8112_s27 + $0x9c0] ss:$16 sps:$4 sm:$0xff]  }
 0x37c   : > { %4301 = vmatpush1.bf16.msra.mxu0 %v7408_v38  ;;  %4629 = vmatpush1.bf16.msra.mxu1 %v7411_v39  ;;  %v7489_v38 = vld [vmem:[%s8112_s27 + $0x9c8] ss:$16 sps:$4 sm:$0xff]   ;;  %v7494_v39 = vld [vmem:[%s8112_s27 + $0x9e4] ss:$16 sps:$4 sm:$0xff]  }
 0x37d   : > { %4302 = vmatprep.subr.bf16.mxu0 %v7416_v40  ;;  %4630 = vmatprep.subr.bf16.mxu1 %v7419_v42  ;;  %v7497_v40 = vld [vmem:[%s8112_s27 + $0x9ec] ss:$16 sps:$4 sm:$0xff]   ;;  %v1001_v42 = vrot.slane %v8602_v21, %v8373_v41 }
 0x380   : > { %4303 = vmatpush1.bf16.msra.mxu0 %v7414_v43  ;;  %4631 = vmatpush1.bf16.msra.mxu1 %v7417_v44  ;;  %v7492_v43 = vld [vmem:[%s8112_s27 + $0x9e0] ss:$16 sps:$4 sm:$0xff]   ;;  %v7495_v44 = vld [vmem:[%s8112_s27 + $0x9e8] ss:$16 sps:$4 sm:$0xff]  }
 0x381   : > { %4304 = vmatprep.subr.bf16.mxu0 %v7422_v46  ;;  %4632 = vmatprep.subr.bf16.mxu1 %v7425_v47  ;;  %v7500_v46 = vld [vmem:[%s8112_s27 + $0xa04] ss:$16 sps:$4 sm:$0xff]   ;;  %v7503_v47 = vld [vmem:[%s8112_s27 + $0xa0c] ss:$16 sps:$4 sm:$0xff]  }
 0x384   : > { %4305 = vmatpush1.bf16.msra.mxu0 %v7420_v48  ;;  %4633 = vmatpush1.bf16.msra.mxu1 %v7423_v49  ;;  %v1013_v48 = vrot.slane %v8602_v21, %v8379_v45  ;;  %v1054_v49 = vpack.c.bf16 %v1001_v42, %v1001_v42  ;;  %v7567_v42 = vld [vmem:[%s8112_s27 + $0xb68] ss:$16 sps:$4 sm:$0xff]  }
 0x385   : > { %4306 = vmatprep.subr.bf16.mxu0 %v7428_v50  ;;  %4634 = vmatprep.subr.bf16.mxu1 %v7431_v51  ;;  %v7498_v50 = vld [vmem:[%s8112_s27 + $0xa00] ss:$16 sps:$4 sm:$0xff]   ;;  %v7501_v51 = vld [vmem:[%s8112_s27 + $0xa08] ss:$16 sps:$4 sm:$0xff]  }
 0x388   : > { %4307 = vmatpush1.bf16.msra.mxu0 %v7426_v52  ;;  %4635 = vmatpush1.bf16.msra.mxu1 %v7429_v54  ;;  %v7506_v52 = vld [vmem:[%s8112_s27 + $0xa24] ss:$16 sps:$4 sm:$0xff]   ;;  %v7509_v54 = vld [vmem:[%s8112_s27 + $0xa2c] ss:$16 sps:$4 sm:$0xff]  }
 0x389   : > { %4308 = vmatprep.subr.bf16.mxu0 %v7434_v55  ;;  %4636 = vmatprep.subr.bf16.mxu1 %v7437_v56  ;;  %v1057_v55 = vpack.c.bf16 %v1013_v48, %v1013_v48  ;;  %v7504_v56 = vld [vmem:[%s8112_s27 + $0xa20] ss:$16 sps:$4 sm:$0xff]   ;;  %v7578_v48 = vld [vmem:[%s8112_s27 + $0xba4] ss:$16 sps:$4 sm:$0xff]  }
 0x38c   : > { %4309 = vmatpush1.bf16.msra.mxu0 %v7432_v58  ;;  %4637 = vmatpush1.bf16.msra.mxu1 %v7435_v59  ;;  %v7507_v58 = vld [vmem:[%s8112_s27 + $0xa28] ss:$16 sps:$4 sm:$0xff]   ;;  %v7512_v59 = vld [vmem:[%s8112_s27 + $0xa44] ss:$16 sps:$4 sm:$0xff]  }
 0x38d   : > { %4310 = vmatprep.subr.bf16.mxu0 %v7440_v60  ;;  %4638 = vmatprep.subr.bf16.mxu1 %v7443_v61  ;;  %v7515_v60 = vld [vmem:[%s8112_s27 + $0xa4c] ss:$16 sps:$4 sm:$0xff]   ;;  %v7510_v61 = vld [vmem:[%s8112_s27 + $0xa40] ss:$16 sps:$4 sm:$0xff]  }
 0x390   : > { %4311 = vmatpush1.bf16.msra.mxu0 %v7438_v62  ;;  %4639 = vmatpush1.bf16.msra.mxu1 %v7441_v63  ;;  %v7513_v62 = vld [vmem:[%s8112_s27 + $0xa48] ss:$16 sps:$4 sm:$0xff]   ;;  %v7518_v63 = vld [vmem:[%s8112_s27 + $0xa64] ss:$16 sps:$4 sm:$0xff]  }
 0x391   : > { %4312 = vmatprep.subr.bf16.mxu0 %v7446_v0  ;;  %4640 = vmatprep.subr.bf16.mxu1 %v7449_v1  ;;  %v7521_v0 = vld [vmem:[%s8112_s27 + $0xa6c] ss:$16 sps:$4 sm:$0xff]   ;;  %v7516_v1 = vld [vmem:[%s8112_s27 + $0xa60] ss:$16 sps:$4 sm:$0xff]  }
 0x394   : > { %4313 = vmatpush1.bf16.msra.mxu0 %v7444_v3  ;;  %4641 = vmatpush1.bf16.msra.mxu1 %v7447_v4  ;;  %v7519_v3 = vld [vmem:[%s8112_s27 + $0xa68] ss:$16 sps:$4 sm:$0xff]   ;;  %v7524_v4 = vld [vmem:[%s8112_s27 + $0xa84] ss:$16 sps:$4 sm:$0xff]  }
 0x395   : > { %4314 = vmatprep.subr.bf16.mxu0 %v7452_v5  ;;  %4642 = vmatprep.subr.bf16.mxu1 %v7455_v26  ;;  %v7527_v5 = vld [vmem:[%s8112_s27 + $0xa8c] ss:$16 sps:$4 sm:$0xff]   ;;  %v7522_v26 = vld [vmem:[%s8112_s27 + $0xa80] ss:$16 sps:$4 sm:$0xff]  }
 0x398   : > { %4315 = vmatpush1.bf16.msra.mxu0 %v7450_v8  ;;  %4643 = vmatpush1.bf16.msra.mxu1 %v7453_v9  ;;  %v7525_v8 = vld [vmem:[%s8112_s27 + $0xa88] ss:$16 sps:$4 sm:$0xff]   ;;  %v7530_v9 = vld [vmem:[%s8112_s27 + $0xaa4] ss:$16 sps:$4 sm:$0xff]  }
 0x399   : > { %4316 = vmatprep.subr.bf16.mxu0 %v7458_v10  ;;  %4644 = vmatprep.subr.bf16.mxu1 %v7461_v11  ;;  %v7533_v10 = vld [vmem:[%s8112_s27 + $0xaac] ss:$16 sps:$4 sm:$0xff]   ;;  %v7528_v11 = vld [vmem:[%s8112_s27 + $0xaa0] ss:$16 sps:$4 sm:$0xff]  }
 0x39c   : > { %4317 = vmatpush1.bf16.msra.mxu0 %v7456_v13  ;;  %4645 = vmatpush1.bf16.msra.mxu1 %v7459_v14  ;;  %v7531_v13 = vld [vmem:[%s8112_s27 + $0xaa8] ss:$16 sps:$4 sm:$0xff]   ;;  %v7536_v14 = vld [vmem:[%s8112_s27 + $0xac4] ss:$16 sps:$4 sm:$0xff]  }
 0x39d   : > { %4318 = vmatprep.subr.bf16.mxu0 %v7464_v15  ;;  %4646 = vmatprep.subr.bf16.mxu1 %v7467_v17  ;;  %v7539_v15 = vld [vmem:[%s8112_s27 + $0xacc] ss:$16 sps:$4 sm:$0xff]   ;;  %v7534_v17 = vld [vmem:[%s8112_s27 + $0xac0] ss:$16 sps:$4 sm:$0xff]  }
 0x3a0   : > { %4319 = vmatpush1.bf16.msra.mxu0 %v7462_v18  ;;  %4647 = vmatpush1.bf16.msra.mxu1 %v7465_v20  ;;  %v7537_v18 = vld [vmem:[%s8112_s27 + $0xac8] ss:$16 sps:$4 sm:$0xff]   ;;  %v7542_v20 = vld [vmem:[%s8112_s27 + $0xae4] ss:$16 sps:$4 sm:$0xff]  }
 0x3a1   : > { %4320 = vmatprep.subr.bf16.mxu0 %v7470_v22  ;;  %4648 = vmatprep.subr.bf16.mxu1 %v7473_v24  ;;  %v7545_v22 = vld [vmem:[%s8112_s27 + $0xaec] ss:$16 sps:$4 sm:$0xff]   ;;  %v7540_v24 = vld [vmem:[%s8112_s27 + $0xae0] ss:$16 sps:$4 sm:$0xff]  }
 0x3a4   : > { %4321 = vmatpush1.bf16.msra.mxu0 %v7468_v25  ;;  %4649 = vmatpush1.bf16.msra.mxu1 %v7471_v27  ;;  %v7543_v25 = vld [vmem:[%s8112_s27 + $0xae8] ss:$16 sps:$4 sm:$0xff]   ;;  %v7548_v27 = vld [vmem:[%s8112_s27 + $0xb04] ss:$16 sps:$4 sm:$0xff]  }
 0x3a5   : > { %4322 = vmatprep.subr.bf16.mxu0 %v7476_v28  ;;  %4650 = vmatprep.subr.bf16.mxu1 %v7479_v29  ;;  %v7551_v28 = vld [vmem:[%s8112_s27 + $0xb0c] ss:$16 sps:$4 sm:$0xff]   ;;  %v7546_v29 = vld [vmem:[%s8112_s27 + $0xb00] ss:$16 sps:$4 sm:$0xff]  }
 0x3a8   : > { %4323 = vmatpush1.bf16.msra.mxu0 %v7474_v30  ;;  %4651 = vmatpush1.bf16.msra.mxu1 %v7477_v31  ;;  %v7549_v30 = vld [vmem:[%s8112_s27 + $0xb08] ss:$16 sps:$4 sm:$0xff]   ;;  %v7554_v31 = vld [vmem:[%s8112_s27 + $0xb24] ss:$16 sps:$4 sm:$0xff]  }
 0x3a9   : > { %4324 = vmatprep.subr.bf16.mxu0 %v7482_v32  ;;  %4652 = vmatprep.subr.bf16.mxu1 %v7485_v33  ;;  %v7557_v32 = vld [vmem:[%s8112_s27 + $0xb2c] ss:$16 sps:$4 sm:$0xff]   ;;  %v7552_v33 = vld [vmem:[%s8112_s27 + $0xb20] ss:$16 sps:$4 sm:$0xff]  }
 0x3ac   : > { %4325 = vmatpush1.bf16.msra.mxu0 %v7480_v7  ;;  %4653 = vmatpush1.bf16.msra.mxu1 %v7483_v34  ;;  %v7555_v7 = vld [vmem:[%s8112_s27 + $0xb28] ss:$16 sps:$4 sm:$0xff]   ;;  %v7560_v34 = vld [vmem:[%s8112_s27 + $0xb44] ss:$16 sps:$4 sm:$0xff]  }
 0x3ad   : > { %4326 = vmatprep.subr.bf16.mxu0 %v7488_v35  ;;  %4654 = vmatprep.subr.bf16.mxu1 %v7491_v36  ;;  %v7563_v35 = vld [vmem:[%s8112_s27 + $0xb4c] ss:$16 sps:$4 sm:$0xff]   ;;  %v7558_v36 = vld [vmem:[%s8112_s27 + $0xb40] ss:$16 sps:$4 sm:$0xff]  }
 0x3b0   : > { %4327 = vmatpush1.bf16.msra.mxu0 %v7486_v37  ;;  %4655 = vmatpush1.bf16.msra.mxu1 %v7489_v38  ;;  %v7561_v37 = vld [vmem:[%s8112_s27 + $0xb48] ss:$16 sps:$4 sm:$0xff]   ;;  %v7566_v38 = vld [vmem:[%s8112_s27 + $0xb64] ss:$16 sps:$4 sm:$0xff]  }
 0x3b1   : > { %4328 = vmatprep.subr.bf16.mxu0 %v7494_v39  ;;  %4656 = vmatprep.subr.bf16.mxu1 %v7497_v40  ;;  %v7569_v39 = vld [vmem:[%s8112_s27 + $0xb6c] ss:$16 sps:$4 sm:$0xff]   ;;  %v7564_v40 = vld [vmem:[%s8112_s27 + $0xb60] ss:$16 sps:$4 sm:$0xff]  }
 0x3b4   : > { %4329 = vmatpush1.bf16.msra.mxu0 %v7492_v43  ;;  %4657 = vmatpush1.bf16.msra.mxu1 %v7495_v44  ;;  %v7572_v43 = vld [vmem:[%s8112_s27 + $0xb84] ss:$16 sps:$4 sm:$0xff]   ;;  %v7575_v44 = vld [vmem:[%s8112_s27 + $0xb8c] ss:$16 sps:$4 sm:$0xff]  }
 0x3b5   : > { %4339 = vmatprep.subr.bf16.mxu0 %v7500_v46  ;;  %4667 = vmatprep.subr.bf16.mxu1 %v7503_v47  ;;  %v7570_v46 = vld [vmem:[%s8112_s27 + $0xb80] ss:$16 sps:$4 sm:$0xff]   ;;  %v7573_v47 = vld [vmem:[%s8112_s27 + $0xb88] ss:$16 sps:$4 sm:$0xff]  }
 0x3b7   : > { %4331 = vmatmul.mubr.bf16.vlgmr.msra.gmra.mrb[0].mxu0 %v1054_v49  ;;  %4659 = vmatmul.mubr.bf16.vlgmr.msra.gmra.mrb[0].mxu1 %v1054_v49  ;;  %v7581_v49 = vld [vmem:[%s8112_s27 + $0xbac] ss:$16 sps:$4 sm:$0xff]  }
 0x3b8   : > { %4340 = vmatpush1.bf16.msra.mxu0 %v7498_v50  ;;  %4668 = vmatpush1.bf16.msra.mxu1 %v7501_v51  ;;  %v7576_v50 = vld [vmem:[%s8112_s27 + $0xba0] ss:$16 sps:$4 sm:$0xff]   ;;  %v7579_v51 = vld [vmem:[%s8112_s27 + $0xba8] ss:$16 sps:$4 sm:$0xff]  }
 0x3b9   : > { %4341 = vmatprep.subr.bf16.mxu0 %v7506_v52  ;;  %4669 = vmatprep.subr.bf16.mxu1 %v7509_v54  ;;  %v7584_v52 = vld [vmem:[%s8112_s27 + $0xbc4] ss:$16 sps:$4 sm:$0xff]   ;;  %v7587_v54 = vld [vmem:[%s8112_s27 + $0xbcc] ss:$16 sps:$4 sm:$0xff]  }
 0x3ba   : > { %4371 = vmatprep.mubr.bf16.mxu0 %v1057_v55  ;;  %4699 = vmatprep.mubr.bf16.mxu1 %v1057_v55  ;;  %v7582_v55 = vld [vmem:[%s8112_s27 + $0xbc0] ss:$16 sps:$4 sm:$0xff]  }
 0x3bc   : > { %4342 = vmatpush1.bf16.msra.mxu0 %v7504_v56  ;;  %4670 = vmatpush1.bf16.msra.mxu1 %v7507_v58  ;;  %v7585_v56 = vld [vmem:[%s8112_s27 + $0xbc8] ss:$16 sps:$4 sm:$0xff]   ;;  %v7590_v58 = vld [vmem:[%s8112_s27 + $0xbe4] ss:$16 sps:$4 sm:$0xff]  }
 0x3bd   : > { %4343 = vmatprep.subr.bf16.mxu0 %v7512_v59  ;;  %4671 = vmatprep.subr.bf16.mxu1 %v7515_v60  ;;  %v7593_v59 = vld [vmem:[%s8112_s27 + $0xbec] ss:$16 sps:$4 sm:$0xff]   ;;  %v1009_v60 = vrot.slane %v8602_v21, %v8447_v53 }
 0x3c0   : > { %4344 = vmatpush1.bf16.msra.mxu0 %v7510_v61  ;;  %4672 = vmatpush1.bf16.msra.mxu1 %v7513_v62  ;;  %v7588_v61 = vld [vmem:[%s8112_s27 + $0xbe0] ss:$16 sps:$4 sm:$0xff]   ;;  %v7591_v62 = vld [vmem:[%s8112_s27 + $0xbe8] ss:$16 sps:$4 sm:$0xff]  }
 0x3c1   : > { %4345 = vmatprep.subr.bf16.mxu0 %v7518_v63  ;;  %4673 = vmatprep.subr.bf16.mxu1 %v7521_v0  ;;  %v7596_v63 = vld [vmem:[%s8112_s27 + $0xc04] ss:$16 sps:$4 sm:$0xff]   ;;  %v7599_v0 = vld [vmem:[%s8112_s27 + $0xc0c] ss:$16 sps:$4 sm:$0xff]  }
 0x3c4   : > { %4346 = vmatpush1.bf16.msra.mxu0 %v7516_v1  ;;  %4674 = vmatpush1.bf16.msra.mxu1 %v7519_v3  ;;  %v1021_v1 = vrot.slane %v8602_v21, %v988_v57  ;;  %v1056_v3 = vpack.c.bf16 %v1009_v60, %v1009_v60  ;;  %v7600_v57 = vld [vmem:[%s8112_s27 + $0xc20] ss:$16 sps:$4 sm:$0xff]   ;;  %v7603_v21 = vld [vmem:[%s8112_s27 + $0xc28] ss:$16 sps:$4 sm:$0xff]   ;;  %v7671_v60 = vld [vmem:[%s8112_s27 + $0xd8c] ss:$16 sps:$4 sm:$0xff]  }
 0x3c5   : > { %4347 = vmatprep.subr.bf16.mxu0 %v7524_v4  ;;  %4675 = vmatprep.subr.bf16.mxu1 %v7527_v5  ;;  %v7594_v4 = vld [vmem:[%s8112_s27 + $0xc00] ss:$16 sps:$4 sm:$0xff]   ;;  %v7597_v5 = vld [vmem:[%s8112_s27 + $0xc08] ss:$16 sps:$4 sm:$0xff]  }
 0x3c8   : > { %4348 = vmatpush1.bf16.msra.mxu0 %v7522_v26  ;;  %4676 = vmatpush1.bf16.msra.mxu1 %v7525_v8  ;;  %v7602_v26 = vld [vmem:[%s8112_s27 + $0xc24] ss:$16 sps:$4 sm:$0xff]   ;;  %v7605_v8 = vld [vmem:[%s8112_s27 + $0xc2c] ss:$16 sps:$4 sm:$0xff]  }
 0x3c9   : > { %4349 = vmatprep.subr.bf16.mxu0 %v7530_v9  ;;  %4677 = vmatprep.subr.bf16.mxu1 %v7533_v10  ;;  %v1059_v9 = vpack.c.bf16 %v1021_v1, %v1021_v1  ;;  %v7608_v10 = vld [vmem:[%s8112_s27 + $0xc44] ss:$16 sps:$4 sm:$0xff]   ;;  %v7672_v1 = vld [vmem:[%s8112_s27 + $0xda0] ss:$16 sps:$4 sm:$0xff]  }
 0x3cc   : > { %4350 = vmatpush1.bf16.msra.mxu0 %v7528_v11  ;;  %4678 = vmatpush1.bf16.msra.mxu1 %v7531_v13  ;;  %v7611_v11 = vld [vmem:[%s8112_s27 + $0xc4c] ss:$16 sps:$4 sm:$0xff]   ;;  %v7606_v13 = vld [vmem:[%s8112_s27 + $0xc40] ss:$16 sps:$4 sm:$0xff]  }
 0x3cd   : > { %4351 = vmatprep.subr.bf16.mxu0 %v7536_v14  ;;  %4679 = vmatprep.subr.bf16.mxu1 %v7539_v15  ;;  %v7609_v14 = vld [vmem:[%s8112_s27 + $0xc48] ss:$16 sps:$4 sm:$0xff]   ;;  %v7614_v15 = vld [vmem:[%s8112_s27 + $0xc64] ss:$16 sps:$4 sm:$0xff]  }
 0x3d0   : > { %4352 = vmatpush1.bf16.msra.mxu0 %v7534_v17  ;;  %4680 = vmatpush1.bf16.msra.mxu1 %v7537_v18  ;;  %v7617_v17 = vld [vmem:[%s8112_s27 + $0xc6c] ss:$16 sps:$4 sm:$0xff]   ;;  %v7612_v18 = vld [vmem:[%s8112_s27 + $0xc60] ss:$16 sps:$4 sm:$0xff]  }
 0x3d1   : > { %4353 = vmatprep.subr.bf16.mxu0 %v7542_v20  ;;  %4681 = vmatprep.subr.bf16.mxu1 %v7545_v22  ;;  %v7615_v20 = vld [vmem:[%s8112_s27 + $0xc68] ss:$16 sps:$4 sm:$0xff]   ;;  %v7620_v22 = vld [vmem:[%s8112_s27 + $0xc84] ss:$16 sps:$4 sm:$0xff]  }
 0x3d4   : > { %4354 = vmatpush1.bf16.msra.mxu0 %v7540_v24  ;;  %4682 = vmatpush1.bf16.msra.mxu1 %v7543_v25  ;;  %v7623_v24 = vld [vmem:[%s8112_s27 + $0xc8c] ss:$16 sps:$4 sm:$0xff]   ;;  %v7618_v25 = vld [vmem:[%s8112_s27 + $0xc80] ss:$16 sps:$4 sm:$0xff]  }
 0x3d5   : > { %4355 = vmatprep.subr.bf16.mxu0 %v7548_v27  ;;  %4683 = vmatprep.subr.bf16.mxu1 %v7551_v28  ;;  %v7621_v27 = vld [vmem:[%s8112_s27 + $0xc88] ss:$16 sps:$4 sm:$0xff]   ;;  %v7626_v28 = vld [vmem:[%s8112_s27 + $0xca4] ss:$16 sps:$4 sm:$0xff]  }
 0x3d8   : > { %4356 = vmatpush1.bf16.msra.mxu0 %v7546_v29  ;;  %4684 = vmatpush1.bf16.msra.mxu1 %v7549_v30  ;;  %v7629_v29 = vld [vmem:[%s8112_s27 + $0xcac] ss:$16 sps:$4 sm:$0xff]   ;;  %v7624_v30 = vld [vmem:[%s8112_s27 + $0xca0] ss:$16 sps:$4 sm:$0xff]  }
 0x3d9   : > { %4357 = vmatprep.subr.bf16.mxu0 %v7554_v31  ;;  %4685 = vmatprep.subr.bf16.mxu1 %v7557_v32  ;;  %v7627_v31 = vld [vmem:[%s8112_s27 + $0xca8] ss:$16 sps:$4 sm:$0xff]   ;;  %v7632_v32 = vld [vmem:[%s8112_s27 + $0xcc4] ss:$16 sps:$4 sm:$0xff]  }
 0x3dc   : > { %4358 = vmatpush1.bf16.msra.mxu0 %v7552_v33  ;;  %4686 = vmatpush1.bf16.msra.mxu1 %v7555_v7  ;;  %v7635_v33 = vld [vmem:[%s8112_s27 + $0xccc] ss:$16 sps:$4 sm:$0xff]   ;;  %v7630_v7 = vld [vmem:[%s8112_s27 + $0xcc0] ss:$16 sps:$4 sm:$0xff]  }
 0x3dd   : > { %4359 = vmatprep.subr.bf16.mxu0 %v7560_v34  ;;  %4687 = vmatprep.subr.bf16.mxu1 %v7563_v35  ;;  %v7633_v34 = vld [vmem:[%s8112_s27 + $0xcc8] ss:$16 sps:$4 sm:$0xff]   ;;  %v7638_v35 = vld [vmem:[%s8112_s27 + $0xce4] ss:$16 sps:$4 sm:$0xff]  }
 0x3e0   : > { %4360 = vmatpush1.bf16.msra.mxu0 %v7558_v36  ;;  %4688 = vmatpush1.bf16.msra.mxu1 %v7561_v37  ;;  %v7641_v36 = vld [vmem:[%s8112_s27 + $0xcec] ss:$16 sps:$4 sm:$0xff]   ;;  %v7636_v37 = vld [vmem:[%s8112_s27 + $0xce0] ss:$16 sps:$4 sm:$0xff]  }
 0x3e1   : > { %4361 = vmatprep.subr.bf16.mxu0 %v7566_v38  ;;  %4689 = vmatprep.subr.bf16.mxu1 %v7569_v39  ;;  %v7639_v38 = vld [vmem:[%s8112_s27 + $0xce8] ss:$16 sps:$4 sm:$0xff]   ;;  %v7644_v39 = vld [vmem:[%s8112_s27 + $0xd04] ss:$16 sps:$4 sm:$0xff]  }
 0x3e4   : > { %4362 = vmatpush1.bf16.msra.mxu0 %v7564_v40  ;;  %4690 = vmatpush1.bf16.msra.mxu1 %v7567_v42  ;;  %v7647_v40 = vld [vmem:[%s8112_s27 + $0xd0c] ss:$16 sps:$4 sm:$0xff]   ;;  %v7642_v42 = vld [vmem:[%s8112_s27 + $0xd00] ss:$16 sps:$4 sm:$0xff]  }
 0x3e5   : > { %4363 = vmatprep.subr.bf16.mxu0 %v7572_v43  ;;  %4691 = vmatprep.subr.bf16.mxu1 %v7575_v44  ;;  %v7645_v43 = vld [vmem:[%s8112_s27 + $0xd08] ss:$16 sps:$4 sm:$0xff]   ;;  %v7650_v44 = vld [vmem:[%s8112_s27 + $0xd24] ss:$16 sps:$4 sm:$0xff]  }
 0x3e8   : > { %4364 = vmatpush1.bf16.msra.mxu0 %v7570_v46  ;;  %4692 = vmatpush1.bf16.msra.mxu1 %v7573_v47  ;;  %v7653_v46 = vld [vmem:[%s8112_s27 + $0xd2c] ss:$16 sps:$4 sm:$0xff]   ;;  %v7648_v47 = vld [vmem:[%s8112_s27 + $0xd20] ss:$16 sps:$4 sm:$0xff]  }
 0x3e9   : > { %4365 = vmatprep.subr.bf16.mxu0 %v7578_v48  ;;  %4693 = vmatprep.subr.bf16.mxu1 %v7581_v49  ;;  %v7651_v48 = vld [vmem:[%s8112_s27 + $0xd28] ss:$16 sps:$4 sm:$0xff]   ;;  %v7656_v49 = vld [vmem:[%s8112_s27 + $0xd44] ss:$16 sps:$4 sm:$0xff]  }
 0x3ec   : > { %4366 = vmatpush1.bf16.msra.mxu0 %v7576_v50  ;;  %4694 = vmatpush1.bf16.msra.mxu1 %v7579_v51  ;;  %v7659_v50 = vld [vmem:[%s8112_s27 + $0xd4c] ss:$16 sps:$4 sm:$0xff]   ;;  %v7654_v51 = vld [vmem:[%s8112_s27 + $0xd40] ss:$16 sps:$4 sm:$0xff]  }
 0x3ed   : > { %4367 = vmatprep.subr.bf16.mxu0 %v7584_v52  ;;  %4695 = vmatprep.subr.bf16.mxu1 %v7587_v54  ;;  %v7657_v52 = vld [vmem:[%s8112_s27 + $0xd48] ss:$16 sps:$4 sm:$0xff]   ;;  %v7662_v54 = vld [vmem:[%s8112_s27 + $0xd64] ss:$16 sps:$4 sm:$0xff]  }
 0x3f0   : > { %4368 = vmatpush1.bf16.msra.mxu0 %v7582_v55  ;;  %4696 = vmatpush1.bf16.msra.mxu1 %v7585_v56  ;;  %v7665_v55 = vld [vmem:[%s8112_s27 + $0xd6c] ss:$16 sps:$4 sm:$0xff]   ;;  %v7660_v56 = vld [vmem:[%s8112_s27 + $0xd60] ss:$16 sps:$4 sm:$0xff]  }
 0x3f1   : > { %4369 = vmatprep.subr.bf16.mxu0 %v7590_v58  ;;  %4697 = vmatprep.subr.bf16.mxu1 %v7593_v59  ;;  %v7663_v58 = vld [vmem:[%s8112_s27 + $0xd68] ss:$16 sps:$4 sm:$0xff]   ;;  %v7668_v59 = vld [vmem:[%s8112_s27 + $0xd84] ss:$16 sps:$4 sm:$0xff]  }
 0x3f4   : > { %4370 = vmatpush1.bf16.msra.mxu0 %v7588_v61  ;;  %4698 = vmatpush1.bf16.msra.mxu1 %v7591_v62  ;;  %v7666_v61 = vld [vmem:[%s8112_s27 + $0xd80] ss:$16 sps:$4 sm:$0xff]   ;;  %v7669_v62 = vld [vmem:[%s8112_s27 + $0xd88] ss:$16 sps:$4 sm:$0xff]  }
 0x3f5   : > { %4380 = vmatprep.subr.bf16.mxu0 %v7596_v63  ;;  %4708 = vmatprep.subr.bf16.mxu1 %v7599_v0  ;;  %v7674_v63 = vld [vmem:[%s8112_s27 + $0xda4] ss:$16 sps:$4 sm:$0xff]   ;;  %v7677_v0 = vld [vmem:[%s8112_s27 + $0xdac] ss:$16 sps:$4 sm:$0xff]  }
 0x3f7   : > { %4372 = vmatmul.mubr.bf16.vlgmr.msra.gmra.mrb[0].mxu0 %v1056_v3  ;;  %4700 = vmatmul.mubr.bf16.vlgmr.msra.gmra.mrb[0].mxu1 %v1056_v3  ;;  %v7675_v3 = vld [vmem:[%s8112_s27 + $0xda8] ss:$16 sps:$4 sm:$0xff]  }
 0x3f8   : > { %4381 = vmatpush1.bf16.msra.mxu0 %v7594_v4  ;;  %4709 = vmatpush1.bf16.msra.mxu1 %v7597_v5  ;;  %v7680_v4 = vld [vmem:[%s8112_s27 + $0xdc4] ss:$16 sps:$4 sm:$0xff]   ;;  %v7683_v5 = vld [vmem:[%s8112_s27 + $0xdcc] ss:$16 sps:$4 sm:$0xff]  }
 0x3f9   : > { %4382 = vmatprep.subr.bf16.mxu0 %v7602_v26  ;;  %4710 = vmatprep.subr.bf16.mxu1 %v7605_v8  ;;  %v7678_v26 = vld [vmem:[%s8112_s27 + $0xdc0] ss:$16 sps:$4 sm:$0xff]   ;;  %v7681_v8 = vld [vmem:[%s8112_s27 + $0xdc8] ss:$16 sps:$4 sm:$0xff]  }
 0x3fa   : > { %4412 = vmatprep.mubr.bf16.mxu0 %v1059_v9  ;;  %4740 = vmatprep.mubr.bf16.mxu1 %v1059_v9  ;;  %v7686_v9 = vld [vmem:[%s8112_s27 + $0xde4] ss:$16 sps:$4 sm:$0xff]  }
 0x3fc   : > { %4383 = vmatpush1.bf16.msra.mxu0 %v7600_v57  ;;  %4711 = vmatpush1.bf16.msra.mxu1 %v7603_v21  ;;  %v7689_v57 = vld [vmem:[%s8112_s27 + $0xdec] ss:$16 sps:$4 sm:$0xff]  }
 0x3fd   : > { %4384 = vmatprep.subr.bf16.mxu0 %v7608_v10  ;;  %4712 = vmatprep.subr.bf16.mxu1 %v7611_v11  ;;  %v8808_v21 = vld [vmem:[%s8107_s23 + $0x8] sm:$0xff]  ;;  %v7684_v11 = vld [vmem:[%s8112_s27 + $0xde0] ss:$16 sps:$4 sm:$0xff]  }
 0x3fe   : > { %v1017_v10 = vrot.slane %v8808_v21, %v984_v2  ;;  %v7690_v2 = vld [vmem:[%s8112_s27 + $0xe00] ss:$16 sps:$4 sm:$0xff]  }
 0x400   : > { %4385 = vmatpush1.bf16.msra.mxu0 %v7606_v13  ;;  %4713 = vmatpush1.bf16.msra.mxu1 %v7609_v14  ;;  %v7687_v13 = vld [vmem:[%s8112_s27 + $0xde8] ss:$16 sps:$4 sm:$0xff]   ;;  %v7692_v14 = vld [vmem:[%s8112_s27 + $0xe04] ss:$16 sps:$4 sm:$0xff]  }
 0x401   : > { %4386 = vmatprep.subr.bf16.mxu0 %v7614_v15  ;;  %4714 = vmatprep.subr.bf16.mxu1 %v7617_v17  ;;  %v7695_v15 = vld [vmem:[%s8112_s27 + $0xe0c] ss:$16 sps:$4 sm:$0xff]   ;;  %v1029_v17 = vrot.slane %v8808_v21, %v996_v6  ;;  %v7696_v6 = vld [vmem:[%s8112_s27 + $0xe20] ss:$16 sps:$4 sm:$0xff]  }
 0x404   : > { %4387 = vmatpush1.bf16.msra.mxu0 %v7612_v18  ;;  %4715 = vmatpush1.bf16.msra.mxu1 %v7615_v20  ;;  %v1058_v18 = vpack.c.bf16 %v1017_v10, %v1017_v10  ;;  %v7693_v20 = vld [vmem:[%s8112_s27 + $0xe08] ss:$16 sps:$4 sm:$0xff]   ;;  %v7762_v10 = vld [vmem:[%s8112_s27 + $0xf80] ss:$16 sps:$4 sm:$0xff]  }
 0x405   : > { %4388 = vmatprep.subr.bf16.mxu0 %v7620_v22  ;;  %4716 = vmatprep.subr.bf16.mxu1 %v7623_v24  ;;  %v7698_v22 = vld [vmem:[%s8112_s27 + $0xe24] ss:$16 sps:$4 sm:$0xff]   ;;  %v7701_v24 = vld [vmem:[%s8112_s27 + $0xe2c] ss:$16 sps:$4 sm:$0xff]  }
 0x408   : > { %4389 = vmatpush1.bf16.msra.mxu0 %v7618_v25  ;;  %4717 = vmatpush1.bf16.msra.mxu1 %v7621_v27  ;;  %v1061_v25 = vpack.c.bf16 %v1029_v17, %v1029_v17  ;;  %v7699_v27 = vld [vmem:[%s8112_s27 + $0xe28] ss:$16 sps:$4 sm:$0xff]  }
 0x409   : > { %4390 = vmatprep.subr.bf16.mxu0 %v7626_v28  ;;  %4718 = vmatprep.subr.bf16.mxu1 %v7629_v29  ;;  %v7704_v28 = vld [vmem:[%s8112_s27 + $0xe44] ss:$16 sps:$4 sm:$0xff]   ;;  %v7707_v29 = vld [vmem:[%s8112_s27 + $0xe4c] ss:$16 sps:$4 sm:$0xff]   ;;  %v7771_v17 = vld [vmem:[%s8112_s27 + $0xfa8] ss:$16 sps:$4 sm:$0xff]  }
 0x40c   : > { %4391 = vmatpush1.bf16.msra.mxu0 %v7624_v30  ;;  %4719 = vmatpush1.bf16.msra.mxu1 %v7627_v31  ;;  %v7702_v30 = vld [vmem:[%s8112_s27 + $0xe40] ss:$16 sps:$4 sm:$0xff]   ;;  %v7705_v31 = vld [vmem:[%s8112_s27 + $0xe48] ss:$16 sps:$4 sm:$0xff]  }
 0x40d   : > { %4392 = vmatprep.subr.bf16.mxu0 %v7632_v32  ;;  %4720 = vmatprep.subr.bf16.mxu1 %v7635_v33  ;;  %v7710_v32 = vld [vmem:[%s8112_s27 + $0xe64] ss:$16 sps:$4 sm:$0xff]   ;;  %v7713_v33 = vld [vmem:[%s8112_s27 + $0xe6c] ss:$16 sps:$4 sm:$0xff]  }
 0x410   : > { %4393 = vmatpush1.bf16.msra.mxu0 %v7630_v7  ;;  %4721 = vmatpush1.bf16.msra.mxu1 %v7633_v34  ;;  %v7708_v7 = vld [vmem:[%s8112_s27 + $0xe60] ss:$16 sps:$4 sm:$0xff]   ;;  %v7711_v34 = vld [vmem:[%s8112_s27 + $0xe68] ss:$16 sps:$4 sm:$0xff]  }
 0x411   : > { %4394 = vmatprep.subr.bf16.mxu0 %v7638_v35  ;;  %4722 = vmatprep.subr.bf16.mxu1 %v7641_v36  ;;  %v7716_v35 = vld [vmem:[%s8112_s27 + $0xe84] ss:$16 sps:$4 sm:$0xff]   ;;  %v7719_v36 = vld [vmem:[%s8112_s27 + $0xe8c] ss:$16 sps:$4 sm:$0xff]  }
 0x414   : > { %4395 = vmatpush1.bf16.msra.mxu0 %v7636_v37  ;;  %4723 = vmatpush1.bf16.msra.mxu1 %v7639_v38  ;;  %v7714_v37 = vld [vmem:[%s8112_s27 + $0xe80] ss:$16 sps:$4 sm:$0xff]   ;;  %v7717_v38 = vld [vmem:[%s8112_s27 + $0xe88] ss:$16 sps:$4 sm:$0xff]  }
 0x415   : > { %4396 = vmatprep.subr.bf16.mxu0 %v7644_v39  ;;  %4724 = vmatprep.subr.bf16.mxu1 %v7647_v40  ;;  %v7722_v39 = vld [vmem:[%s8112_s27 + $0xea4] ss:$16 sps:$4 sm:$0xff]   ;;  %v7725_v40 = vld [vmem:[%s8112_s27 + $0xeac] ss:$16 sps:$4 sm:$0xff]  }
 0x418   : > { %4397 = vmatpush1.bf16.msra.mxu0 %v7642_v42  ;;  %4725 = vmatpush1.bf16.msra.mxu1 %v7645_v43  ;;  %v7720_v42 = vld [vmem:[%s8112_s27 + $0xea0] ss:$16 sps:$4 sm:$0xff]   ;;  %v7723_v43 = vld [vmem:[%s8112_s27 + $0xea8] ss:$16 sps:$4 sm:$0xff]  }
 0x419   : > { %4398 = vmatprep.subr.bf16.mxu0 %v7650_v44  ;;  %4726 = vmatprep.subr.bf16.mxu1 %v7653_v46  ;;  %v7728_v44 = vld [vmem:[%s8112_s27 + $0xec4] ss:$16 sps:$4 sm:$0xff]   ;;  %v7731_v46 = vld [vmem:[%s8112_s27 + $0xecc] ss:$16 sps:$4 sm:$0xff]  }
 0x41c   : > { %4399 = vmatpush1.bf16.msra.mxu0 %v7648_v47  ;;  %4727 = vmatpush1.bf16.msra.mxu1 %v7651_v48  ;;  %v7726_v47 = vld [vmem:[%s8112_s27 + $0xec0] ss:$16 sps:$4 sm:$0xff]   ;;  %v7729_v48 = vld [vmem:[%s8112_s27 + $0xec8] ss:$16 sps:$4 sm:$0xff]  }
 0x41d   : > { %4400 = vmatprep.subr.bf16.mxu0 %v7656_v49  ;;  %4728 = vmatprep.subr.bf16.mxu1 %v7659_v50  ;;  %v7734_v49 = vld [vmem:[%s8112_s27 + $0xee4] ss:$16 sps:$4 sm:$0xff]   ;;  %v7737_v50 = vld [vmem:[%s8112_s27 + $0xeec] ss:$16 sps:$4 sm:$0xff]  }
 0x420   : > { %4401 = vmatpush1.bf16.msra.mxu0 %v7654_v51  ;;  %4729 = vmatpush1.bf16.msra.mxu1 %v7657_v52  ;;  %v7732_v51 = vld [vmem:[%s8112_s27 + $0xee0] ss:$16 sps:$4 sm:$0xff]   ;;  %v7735_v52 = vld [vmem:[%s8112_s27 + $0xee8] ss:$16 sps:$4 sm:$0xff]  }
 0x421   : > { %4402 = vmatprep.subr.bf16.mxu0 %v7662_v54  ;;  %4730 = vmatprep.subr.bf16.mxu1 %v7665_v55  ;;  %v7740_v54 = vld [vmem:[%s8112_s27 + $0xf04] ss:$16 sps:$4 sm:$0xff]   ;;  %v7743_v55 = vld [vmem:[%s8112_s27 + $0xf0c] ss:$16 sps:$4 sm:$0xff]  }
 0x424   : > { %4403 = vmatpush1.bf16.msra.mxu0 %v7660_v56  ;;  %4731 = vmatpush1.bf16.msra.mxu1 %v7663_v58  ;;  %v7738_v56 = vld [vmem:[%s8112_s27 + $0xf00] ss:$16 sps:$4 sm:$0xff]   ;;  %v7741_v58 = vld [vmem:[%s8112_s27 + $0xf08] ss:$16 sps:$4 sm:$0xff]  }
 0x425   : > { %4404 = vmatprep.subr.bf16.mxu0 %v7668_v59  ;;  %4732 = vmatprep.subr.bf16.mxu1 %v7671_v60  ;;  %v7746_v59 = vld [vmem:[%s8112_s27 + $0xf24] ss:$16 sps:$4 sm:$0xff]   ;;  %v7749_v60 = vld [vmem:[%s8112_s27 + $0xf2c] ss:$16 sps:$4 sm:$0xff]  }
 0x428   : > { %4405 = vmatpush1.bf16.msra.mxu0 %v7666_v61  ;;  %4733 = vmatpush1.bf16.msra.mxu1 %v7669_v62  ;;  %v7744_v61 = vld [vmem:[%s8112_s27 + $0xf20] ss:$16 sps:$4 sm:$0xff]   ;;  %v7747_v62 = vld [vmem:[%s8112_s27 + $0xf28] ss:$16 sps:$4 sm:$0xff]  }
 0x429   : > { %4406 = vmatprep.subr.bf16.mxu0 %v7674_v63  ;;  %4734 = vmatprep.subr.bf16.mxu1 %v7677_v0  ;;  %v7752_v63 = vld [vmem:[%s8112_s27 + $0xf44] ss:$16 sps:$4 sm:$0xff]   ;;  %v7755_v0 = vld [vmem:[%s8112_s27 + $0xf4c] ss:$16 sps:$4 sm:$0xff]  }
 0x42c   : > { %4407 = vmatpush1.bf16.msra.mxu0 %v7672_v1  ;;  %4735 = vmatpush1.bf16.msra.mxu1 %v7675_v3  ;;  %v7750_v1 = vld [vmem:[%s8112_s27 + $0xf40] ss:$16 sps:$4 sm:$0xff]   ;;  %v7753_v3 = vld [vmem:[%s8112_s27 + $0xf48] ss:$16 sps:$4 sm:$0xff]  }
 0x42d   : > { %4408 = vmatprep.subr.bf16.mxu0 %v7680_v4  ;;  %4736 = vmatprep.subr.bf16.mxu1 %v7683_v5  ;;  %v7758_v4 = vld [vmem:[%s8112_s27 + $0xf64] ss:$16 sps:$4 sm:$0xff]   ;;  %v7761_v5 = vld [vmem:[%s8112_s27 + $0xf6c] ss:$16 sps:$4 sm:$0xff]  }
 0x430   : > { %4409 = vmatpush1.bf16.msra.mxu0 %v7678_v26  ;;  %4737 = vmatpush1.bf16.msra.mxu1 %v7681_v8  ;;  %v7756_v26 = vld [vmem:[%s8112_s27 + $0xf60] ss:$16 sps:$4 sm:$0xff]   ;;  %v7759_v8 = vld [vmem:[%s8112_s27 + $0xf68] ss:$16 sps:$4 sm:$0xff]  }
 0x431   : > { %4410 = vmatprep.subr.bf16.mxu0 %v7686_v9  ;;  %4738 = vmatprep.subr.bf16.mxu1 %v7689_v57  ;;  %v7764_v9 = vld [vmem:[%s8112_s27 + $0xf84] ss:$16 sps:$4 sm:$0xff]   ;;  %v7767_v57 = vld [vmem:[%s8112_s27 + $0xf8c] ss:$16 sps:$4 sm:$0xff]  }
 0x434   : > { %4411 = vmatpush1.bf16.msra.mxu0 %v7684_v11  ;;  %4739 = vmatpush1.bf16.msra.mxu1 %v7687_v13  ;;  %v7765_v11 = vld [vmem:[%s8112_s27 + $0xf88] ss:$16 sps:$4 sm:$0xff]   ;;  %v7770_v13 = vld [vmem:[%s8112_s27 + $0xfa4] ss:$16 sps:$4 sm:$0xff]  }
 0x435   : > { %4421 = vmatprep.subr.bf16.mxu0 %v7692_v14  ;;  %4749 = vmatprep.subr.bf16.mxu1 %v7695_v15  ;;  %v7773_v14 = vld [vmem:[%s8112_s27 + $0xfac] ss:$16 sps:$4 sm:$0xff]   ;;  %v7768_v15 = vld [vmem:[%s8112_s27 + $0xfa0] ss:$16 sps:$4 sm:$0xff]  }
 0x437   : > { %4413 = vmatmul.mubr.bf16.vlgmr.msra.gmra.mrb[0].mxu0 %v1058_v18  ;;  %4741 = vmatmul.mubr.bf16.vlgmr.msra.gmra.mrb[0].mxu1 %v1058_v18  ;;  %v7776_v18 = vld [vmem:[%s8112_s27 + $0xfc4] ss:$16 sps:$4 sm:$0xff]  }
 0x438   : > { %4422 = vmatpush1.bf16.msra.mxu0 %v7690_v2  ;;  %4750 = vmatpush1.bf16.msra.mxu1 %v7693_v20  ;;  %v7779_v2 = vld [vmem:[%s8112_s27 + $0xfcc] ss:$16 sps:$4 sm:$0xff]   ;;  %v7774_v20 = vld [vmem:[%s8112_s27 + $0xfc0] ss:$16 sps:$4 sm:$0xff]  }
 0x439   : > { %4423 = vmatprep.subr.bf16.mxu0 %v7698_v22  ;;  %4751 = vmatprep.subr.bf16.mxu1 %v7701_v24  ;;  %v7777_v22 = vld [vmem:[%s8112_s27 + $0xfc8] ss:$16 sps:$4 sm:$0xff]   ;;  %v7782_v24 = vld [vmem:[%s8112_s27 + $0xfe4] ss:$16 sps:$4 sm:$0xff]  }
 0x43a   : > { %4453 = vmatprep.mubr.bf16.mxu0 %v1061_v25  ;;  %4781 = vmatprep.mubr.bf16.mxu1 %v1061_v25  ;;  %v7785_v25 = vld [vmem:[%s8112_s27 + $0xfec] ss:$16 sps:$4 sm:$0xff]  }
 0x43c   : > { %4424 = vmatpush1.bf16.msra.mxu0 %v7696_v6  ;;  %4752 = vmatpush1.bf16.msra.mxu1 %v7699_v27  ;;  %v1025_v6 = vrot.slane %v8808_v21, %v992_v19  ;;  %v7780_v27 = vld [vmem:[%s8112_s27 + $0xfe0] ss:$16 sps:$4 sm:$0xff]  }
 0x43d   : > { %4425 = vmatprep.subr.bf16.mxu0 %v7704_v28  ;;  %4753 = vmatprep.subr.bf16.mxu1 %v7707_v29  ;;  %v7783_v28 = vld [vmem:[%s8112_s27 + $0xfe8] ss:$16 sps:$4 sm:$0xff]  }
 0x43e   : > { %v1060_v29 = vpack.c.bf16 %v1025_v6, %v1025_v6  ;;  %v7838_v6 = vld [vmem:[%s9356_s8 + $0xe4] ss:$16 sps:$4 sm:$0xff] (!%p6578_p6)  }
 0x440   : > { %4426 = vmatpush1.bf16.msra.mxu0 %v7702_v30  ;;  %4754 = vmatpush1.bf16.msra.mxu1 %v7705_v31  ;;  %v8029_v30 = vmov 1966171168  }
 0x441   : > { %4427 = vmatprep.subr.bf16.mxu0 %v7710_v32  ;;  %4755 = vmatprep.subr.bf16.mxu1 %v7713_v33  ;;  %v4797_v31 = vunpack.c.l.s4 %v8029_v30  ;;  %v7844_v30 = vld [vmem:[%s9356_s8 + $0x104] ss:$16 sps:$4 sm:$0xff] (!%p6578_p6)  }
 0x443   : > { %v4798_v32 = vunpack.c.0.s8 %v4797_v31  ;;  %v7847_v31 = vld [vmem:[%s9356_s8 + $0x304] ss:$16 sps:$4 sm:$0xff] (!%p6578_p6)  }
 0x444   : > { %4428 = vmatpush1.bf16.msra.mxu0 %v7708_v7  ;;  %4756 = vmatpush1.bf16.msra.mxu1 %v7711_v34 }
 0x445   : > { %4429 = vmatprep.subr.bf16.mxu0 %v7716_v35  ;;  %4757 = vmatprep.subr.bf16.mxu1 %v7719_v36  ;;  %v8886_v34 = vsub.s32 %v4798_v32, %v8342_v16  ;;  %v7842_v32 = vld [vmem:[%s9356_s8 + $0x100] ss:$16 sps:$4 sm:$0xff] (!%p6578_p6)  }
 0x448   : > { %4430 = vmatpush1.bf16.msra.mxu0 %v7714_v37  ;;  %4758 = vmatpush1.bf16.msra.mxu1 %v7717_v38 }
 0x449   : > { %4431 = vmatprep.subr.bf16.mxu0 %v7722_v39  ;;  %4759 = vmatprep.subr.bf16.mxu1 %v7725_v40 }
 0x44c   : > { %4432 = vmatpush1.bf16.msra.mxu0 %v7720_v42  ;;  %4760 = vmatpush1.bf16.msra.mxu1 %v7723_v43 }
 0x44d   : > { %4433 = vmatprep.subr.bf16.mxu0 %v7728_v44  ;;  %4761 = vmatprep.subr.bf16.mxu1 %v7731_v46  ;;  %v961_v46 = vld [vmem:[#allocation2] sm:$0xf] }
 0x450   : > { %4434 = vmatpush1.bf16.msra.mxu0 %v7726_v47  ;;  %4762 = vmatpush1.bf16.msra.mxu1 %v7729_v48 }
 0x451   : > { %4435 = vmatprep.subr.bf16.mxu0 %v7734_v49  ;;  %4763 = vmatprep.subr.bf16.mxu1 %v7737_v50  ;;  %v7788_v49 = vld [vmem:[%s9357_s9 + $0x4] ss:$16 sps:$4 sm:$0xff] (!%p6578_p6)   ;;  %v7790_v50 = vld [vmem:[%s9357_s9 + $0xc] ss:$16 sps:$4 sm:$0xff] (!%p6578_p6)  }
 0x454   : > { %4436 = vmatpush1.bf16.msra.mxu0 %v7732_v51  ;;  %4764 = vmatpush1.bf16.msra.mxu1 %v7735_v52  ;;  %v8030_v51 = vmov (!%p6578_p6), 0   ;;  %v7793_v52 = vld [vmem:[%s9357_s9 + $0x8] ss:$16 sps:$4 sm:$0xff] (!%p6578_p6)  }
 0x455   : > { %4437 = vmatprep.subr.bf16.mxu0 %v7740_v54  ;;  %4765 = vmatprep.subr.bf16.mxu1 %v7743_v55  ;;  %v4986_v54 = vld [vmem:[#allocation3] sm:$0x1] (!%p6578_p6) }
 0x456   : > { %v4987_v55 = vpack.c.bf16 (!%p6578_p6), %v4986_v54, %v4986_v54  ;;  %v7866_v54 = vld [vmem:[%s9356_s8 + $0x180] ss:$16 sps:$4 sm:$0xff] (!%p6578_p6)  }
 0x458   : > { %4438 = vmatpush1.bf16.msra.mxu0 %v7738_v56  ;;  %4766 = vmatpush1.bf16.msra.mxu1 %v7741_v58  ;;  %v7794_v56 = vld [vmem:[%s9356_s8] ss:$16 sps:$4 sm:$0xff] (!%p6578_p6)   ;;  %v7796_v58 = vld [vmem:[%s9356_s8 + $0x4] ss:$16 sps:$4 sm:$0xff] (!%p6578_p6)  }
 0x459   : > { %4439 = vmatprep.subr.bf16.mxu0 %v7746_v59  ;;  %4767 = vmatprep.subr.bf16.mxu1 %v7749_v60  ;;  %v7797_v59 = vld [vmem:[%s9356_s8 + $0x200] ss:$16 sps:$4 sm:$0xff] (!%p6578_p6)   ;;  %v7799_v60 = vld [vmem:[%s9356_s8 + $0x204] ss:$16 sps:$4 sm:$0xff] (!%p6578_p6)  }
 0x45c   : > { %4440 = vmatpush1.bf16.msra.mxu0 %v7744_v61  ;;  %4768 = vmatpush1.bf16.msra.mxu1 %v7747_v62  ;;  %v7802_v61 = vld [vmem:[%s9356_s8 + $0x24] ss:$16 sps:$4 sm:$0xff] (!%p6578_p6)   ;;  %v7800_v62 = vld [vmem:[%s9356_s8 + $0x20] ss:$16 sps:$4 sm:$0xff] (!%p6578_p6)  }
 0x45d   : > { %4441 = vmatprep.subr.bf16.mxu0 %v7752_v63  ;;  %4769 = vmatprep.subr.bf16.mxu1 %v7755_v0  ;;  %v7805_v63 = vld [vmem:[%s9356_s8 + $0x224] ss:$16 sps:$4 sm:$0xff] (!%p6578_p6)   ;;  %v7803_v0 = vld [vmem:[%s9356_s8 + $0x220] ss:$16 sps:$4 sm:$0xff] (!%p6578_p6)  }
 0x460   : > { %4442 = vmatpush1.bf16.msra.mxu0 %v7750_v1  ;;  %4770 = vmatpush1.bf16.msra.mxu1 %v7753_v3  ;;  %v7808_v1 = vld [vmem:[%s9356_s8 + $0x44] ss:$16 sps:$4 sm:$0xff] (!%p6578_p6)  }
 0x461   : > { %4443 = vmatprep.subr.bf16.mxu0 %v7758_v4  ;;  %4771 = vmatprep.subr.bf16.mxu1 %v7761_v5  ;;  %v7811_v3 = vld [vmem:[%s9356_s8 + $0x244] ss:$16 sps:$4 sm:$0xff] (!%p6578_p6)   ;;  %v7806_v4 = vld [vmem:[%s9356_s8 + $0x40] ss:$16 sps:$4 sm:$0xff] (!%p6578_p6)  }
 0x462   : > { %v7809_v5 = vld [vmem:[%s9356_s8 + $0x240] ss:$16 sps:$4 sm:$0xff] (!%p6578_p6)  }
 0x464   : > { %4444 = vmatpush1.bf16.msra.mxu0 %v7756_v26  ;;  %4772 = vmatpush1.bf16.msra.mxu1 %v7759_v8  ;;  %v7814_v26 = vld [vmem:[%s9356_s8 + $0x64] ss:$16 sps:$4 sm:$0xff] (!%p6578_p6)  }
 0x465   : > { %4445 = vmatprep.subr.bf16.mxu0 %v7764_v9  ;;  %4773 = vmatprep.subr.bf16.mxu1 %v7767_v57  ;;  %v7817_v8 = vld [vmem:[%s9356_s8 + $0x264] ss:$16 sps:$4 sm:$0xff] (!%p6578_p6)   ;;  %v7812_v9 = vld [vmem:[%s9356_s8 + $0x60] ss:$16 sps:$4 sm:$0xff] (!%p6578_p6)  }
 0x466   : > { %v7815_v57 = vld [vmem:[%s9356_s8 + $0x260] ss:$16 sps:$4 sm:$0xff] (!%p6578_p6)  }
 0x468   : > { %4446 = vmatpush1.bf16.msra.mxu0 %v7762_v10  ;;  %4774 = vmatpush1.bf16.msra.mxu1 %v7765_v11  ;;  %v7820_v10 = vld [vmem:[%s9356_s8 + $0x84] ss:$16 sps:$4 sm:$0xff] (!%p6578_p6)  }
 0x469   : > { %4447 = vmatprep.subr.bf16.mxu0 %v7770_v13  ;;  %4775 = vmatprep.subr.bf16.mxu1 %v7773_v14  ;;  %v7823_v11 = vld [vmem:[%s9356_s8 + $0x284] ss:$16 sps:$4 sm:$0xff] (!%p6578_p6)   ;;  %v7818_v13 = vld [vmem:[%s9356_s8 + $0x80] ss:$16 sps:$4 sm:$0xff] (!%p6578_p6)  }
 0x46a   : > { %v7821_v14 = vld [vmem:[%s9356_s8 + $0x280] ss:$16 sps:$4 sm:$0xff] (!%p6578_p6)  }
 0x46c   : > { %4448 = vmatpush1.bf16.msra.mxu0 %v7768_v15  ;;  %4776 = vmatpush1.bf16.msra.mxu1 %v7771_v17  ;;  %v7826_v15 = vld [vmem:[%s9356_s8 + $0xa4] ss:$16 sps:$4 sm:$0xff] (!%p6578_p6)  }
 0x46d   : > { %4449 = vmatprep.subr.bf16.mxu0 %v7776_v18  ;;  %4777 = vmatprep.subr.bf16.mxu1 %v7779_v2  ;;  %v7829_v17 = vld [vmem:[%s9356_s8 + $0x2a4] ss:$16 sps:$4 sm:$0xff] (!%p6578_p6)   ;;  %v7824_v18 = vld [vmem:[%s9356_s8 + $0xa0] ss:$16 sps:$4 sm:$0xff] (!%p6578_p6)  }
 0x46e   : > { %v7827_v2 = vld [vmem:[%s9356_s8 + $0x2a0] ss:$16 sps:$4 sm:$0xff] (!%p6578_p6)  }
 0x470   : > { %4450 = vmatpush1.bf16.msra.mxu0 %v7774_v20  ;;  %4778 = vmatpush1.bf16.msra.mxu1 %v7777_v22  ;;  %v7832_v20 = vld [vmem:[%s9356_s8 + $0xc4] ss:$16 sps:$4 sm:$0xff] (!%p6578_p6)  }
 0x471   : > { %4451 = vmatprep.subr.bf16.mxu0 %v7782_v24  ;;  %4779 = vmatprep.subr.bf16.mxu1 %v7785_v25  ;;  %v7835_v22 = vld [vmem:[%s9356_s8 + $0x2c4] ss:$16 sps:$4 sm:$0xff] (!%p6578_p6)   ;;  %v7830_v24 = vld [vmem:[%s9356_s8 + $0xc0] ss:$16 sps:$4 sm:$0xff] (!%p6578_p6)  }
 0x472   : > { %v7833_v25 = vld [vmem:[%s9356_s8 + $0x2c0] ss:$16 sps:$4 sm:$0xff] (!%p6578_p6)  }
 0x474   : > { %4452 = vmatpush1.bf16.msra.mxu0 %v7780_v27  ;;  %4780 = vmatpush1.bf16.msra.mxu1 %v7783_v28  ;;  %v7841_v27 = vld [vmem:[%s9356_s8 + $0x2e4] ss:$16 sps:$4 sm:$0xff] (!%p6578_p6)   ;;  %v7836_v28 = vld [vmem:[%s9356_s8 + $0xe0] ss:$16 sps:$4 sm:$0xff] (!%p6578_p6)  }
 0x475   : > { %5016 = vmatprep.subr.bf16.mxu0 (!%p6578_p6), %v7788_v49  ;;  %5057 = vmatprep.subr.bf16.mxu1 (!%p6578_p6), %v7790_v50  ;;  %v7868_v49 = vld [vmem:[%s9356_s8 + $0x184] ss:$16 sps:$4 sm:$0xff] (!%p6578_p6)  }
 0x477   : > { %4454 = vmatmul.mubr.bf16.vlgmr.msra.gmra.mrb[0].mxu0 %v1060_v29  ;;  %4782 = vmatmul.mubr.bf16.vlgmr.msra.gmra.mrb[0].mxu1 %v1060_v29  ;;  %v7839_v29 = vld [vmem:[%s9356_s8 + $0x2e0] ss:$16 sps:$4 sm:$0xff] (!%p6578_p6)  }
 0x478   : > { %5048 = vmatprep.mubr.bf16.mxu0 (!%p6578_p6), %v8030_v51  ;;  %5089 = vmatprep.mubr.bf16.mxu1 (!%p6578_p6), %v8030_v51  ;;  %v7871_v51 = vld [vmem:[%s9356_s8 + $0x384] ss:$16 sps:$4 sm:$0xff] (!%p6578_p6)  }
 0x479   : > { %5017 = vmatpush1.bf16.msra.mxu0 (!%p6578_p6), %v7792_v12  ;;  %5058 = vmatpush1.bf16.msra.mxu1 (!%p6578_p6), %v7793_v52 }
 0x47a   : > { %5738 = vmatprep.subr.bf16.mxu0 (!%p6578_p6), %v7796_v58  ;;  %5779 = vmatprep.subr.bf16.mxu1 (!%p6578_p6), %v7799_v60  ;;  %v7877_v60 = vld [vmem:[%s9356_s8 + $0x3a4] ss:$16 sps:$4 sm:$0xff] (!%p6578_p6)  }
 0x54a   : > { %v4455_v33 = vpop.f32.mrb[0].mxu0  ;;  %v4783_v7 = vpop.f32.mrb[0].mxu1 }
 0x54b   : > { %v4457_v19 = vpop.f32.mrb[1].mxu0  ;;  %v4785_v21 = vpop.f32.mrb[1].mxu1 }
 0x54c   : > { %v4794_v35 = vcombine.low %v4455_v33, %v4457_v19  ;;  %v4795_v36 = vcombine.low %v4783_v7, %v4785_v21  ;;  %v4459_v37 = vpop.f32.mrb[2].mxu0  ;;  %v4787_v38 = vpop.f32.mrb[2].mxu1  ;;  %v7845_v33 = vld [vmem:[%s9356_s8 + $0x300] ss:$16 sps:$4 sm:$0xff] (!%p6578_p6)   ;;  %v7850_v7 = vld [vmem:[%s9356_s8 + $0x124] ss:$16 sps:$4 sm:$0xff] (!%p6578_p6)  }
 0x54d   : > { %v4460_v39 = vpop.f32.mrb[3].mxu0  ;;  %v4788_v40 = vpop.f32.mrb[3].mxu1  ;;  %6583 = vmatmul.mubr.msk.bf16.vlgmr.msra.gmra.mrb[0].mxu0 (!%p6578_p6), %vm5012_vm9, %v4987_v55  ;;  %6584 = vmatmul.mubr.msk.bf16.vlgmr.msra.gmra.mrb[0].mxu1 (!%p6578_p6), %vm5012_vm9, %v4987_v55  ;;  %v7853_v19 = vld [vmem:[%s9356_s8 + $0x324] ss:$16 sps:$4 sm:$0xff] (!%p6578_p6)   ;;  %v7848_v21 = vld [vmem:[%s9356_s8 + $0x120] ss:$16 sps:$4 sm:$0xff] (!%p6578_p6)  }
 0x54e   : > { %v4802_v42 = vrot.slane %v4794_v35, %v8886_v34  ;;  %v4809_v43 = vrot.slane %v4795_v36, %v8886_v34  ;;  %5739 = vmatpush1.bf16.msra.mxu0 (!%p6578_p6), %v7794_v56  ;;  %5780 = vmatpush1.bf16.msra.mxu1 (!%p6578_p6), %v7797_v59  ;;  %v7851_v35 = vld [vmem:[%s9356_s8 + $0x320] ss:$16 sps:$4 sm:$0xff] (!%p6578_p6)   ;;  %v7856_v36 = vld [vmem:[%s9356_s8 + $0x144] ss:$16 sps:$4 sm:$0xff] (!%p6578_p6)  }
 0x54f   : > { %5740 = vmatprep.subr.bf16.mxu0 (!%p6578_p6), %v7802_v61  ;;  %5781 = vmatprep.subr.bf16.mxu1 (!%p6578_p6), %v7805_v63  ;;  %v7859_v37 = vld [vmem:[%s9356_s8 + $0x344] ss:$16 sps:$4 sm:$0xff] (!%p6578_p6)   ;;  %v7854_v38 = vld [vmem:[%s9356_s8 + $0x140] ss:$16 sps:$4 sm:$0xff] (!%p6578_p6)  }
 0x550   : > { %v4810_v44 = vcombine.low %v4802_v42, %v4809_v43  ;;  %4828 = sbr.rel (%p6578_p6) target bundleno = 1715 (0x6b3), region = 72  ;;  %v7857_v39 = vld [vmem:[%s9356_s8 + $0x340] ss:$16 sps:$4 sm:$0xff] (!%p6578_p6)   ;;  %v7862_v40 = vld [vmem:[%s9356_s8 + $0x164] ss:$16 sps:$4 sm:$0xff] (!%p6578_p6)  }
 0x551   : > { %v7865_v42 = vld [vmem:[%s9356_s8 + $0x364] ss:$16 sps:$4 sm:$0xff] (!%p6578_p6)   ;;  %v7869_v55 = vld [vmem:[%s9356_s8 + $0x380] ss:$16 sps:$4 sm:$0xff] (!%p6578_p6)  }
 0x552   : > { %v4817_v47 = vrot.slane %v4810_v44, %v8886_v34  ;;  %5741 = vmatpush1.bf16.msra.mxu0 (!%p6578_p6), %v7800_v62  ;;  %5782 = vmatpush1.bf16.msra.mxu1 (!%p6578_p6), %v7803_v0  ;;  %v4830_v44 = vld [vmem:[%s9351_s3] sm:$0xf] (!%p6578_p6)  ;;  %v7874_v56 = vld [vmem:[%s9356_s8 + $0x1a4] ss:$16 sps:$4 sm:$0xff] (!%p6578_p6)  }
 0x553   : > { %5742 = vmatprep.subr.bf16.mxu0 (!%p6578_p6), %v7808_v1  ;;  %5783 = vmatprep.subr.bf16.mxu1 (!%p6578_p6), %v7811_v3  ;;  %v7872_v61 = vld [vmem:[%s9356_s8 + $0x1a0] ss:$16 sps:$4 sm:$0xff] (!%p6578_p6)   ;;  %v7880_v63 = vld [vmem:[%s9356_s8 + $0x1c4] ss:$16 sps:$4 sm:$0xff] (!%p6578_p6)  }
 0x554   : > { %v4819_v48 = vadd.f32 %v4817_v47, %v961_v46  ;;  %v7860_v47 = vld [vmem:[%s9356_s8 + $0x160] ss:$16 sps:$4 sm:$0xff] (!%p6578_p6)   ;;  %v7883_v0 = vld [vmem:[%s9356_s8 + $0x3c4] ss:$16 sps:$4 sm:$0xff] (!%p6578_p6)  }
 0x555   : > { %v7875_v62 = vld [vmem:[%s9356_s8 + $0x3a0] ss:$16 sps:$4 sm:$0xff] (!%p6578_p6)  }
 0x556   : > { %4824 = vst.msk [vmem:[#allocation2] sm:$0xf] %vm8892_vm8, %v4819_v48  ;;  %5743 = vmatpush1.bf16.msra.mxu0 (!%p6578_p6), %v7806_v4  ;;  %5784 = vmatpush1.bf16.msra.mxu1 (!%p6578_p6), %v7809_v5  ;;  %v7863_v48 = vld [vmem:[%s9356_s8 + $0x360] ss:$16 sps:$4 sm:$0xff] (!%p6578_p6)   ;;  %v7886_v4 = vld [vmem:[%s9356_s8 + $0x1e4] ss:$16 sps:$4 sm:$0xff] (!%p6578_p6)  }
 0x557   : > { %5744 = vmatprep.subr.bf16.mxu0 %v7814_v26  ;;  %5785 = vmatprep.subr.bf16.mxu1 %v7817_v8  ;;  %v7878_v1 = vld [vmem:[%s9356_s8 + $0x1c0] ss:$16 sps:$4 sm:$0xff]   ;;  %v7889_v5 = vld [vmem:[%s9356_s8 + $0x3e4] ss:$16 sps:$4 sm:$0xff]  }
 0x558   : > { %v7881_v3 = vld [vmem:[%s9356_s8 + $0x3c0] ss:$16 sps:$4 sm:$0xff]  }
 0x559   : > { %v7884_v8 = vld [vmem:[%s9356_s8 + $0x1e0] ss:$16 sps:$4 sm:$0xff]  }
 0x55a   : > { %5745 = vmatpush1.bf16.msra.mxu0 %v7812_v9  ;;  %5786 = vmatpush1.bf16.msra.mxu1 %v7815_v57  ;;  %v7887_v9 = vld [vmem:[%s9356_s8 + $0x3e0] ss:$16 sps:$4 sm:$0xff]  }
 0x55b   : > { %5746 = vmatprep.subr.bf16.mxu0 %v7820_v10  ;;  %5787 = vmatprep.subr.bf16.mxu1 %v7823_v11  ;;  %v7892_v10 = vld [vmem:[%s9356_s8 + $0xc] ss:$16 sps:$4 sm:$0xff]  }
 0x55c   : > { %v7895_v11 = vld [vmem:[%s9356_s8 + $0x20c] ss:$16 sps:$4 sm:$0xff]  }
 0x55d   : > { %v4829_v43 = vld [vmem:[#allocation2] sm:$0xf] }
 0x55e   : > { %5747 = vmatpush1.bf16.msra.mxu0 %v7818_v13  ;;  %5788 = vmatpush1.bf16.msra.mxu1 %v7821_v14  ;;  %v4831_v46 = vadd.f32 %v4830_v44, %v4829_v43  ;;  %v7934_v43 = vld [vmem:[%s9356_s8 + $0xec] ss:$16 sps:$4 sm:$0xff]  }
 0x55f   : > { %5748 = vmatprep.subr.bf16.mxu0 %v7826_v15  ;;  %5789 = vmatprep.subr.bf16.mxu1 %v7829_v17  ;;  %v7890_v15 = vld [vmem:[%s9356_s8 + $0x8] ss:$16 sps:$4 sm:$0xff]   ;;  %v7937_v44 = vld [vmem:[%s9356_s8 + $0x2ec] ss:$16 sps:$4 sm:$0xff]  }
 0x560   : > { %v4832_v50 = vmax.f32 %v4831_v46, 0.0  ;;  %v7893_v17 = vld [vmem:[%s9356_s8 + $0x208] ss:$16 sps:$4 sm:$0xff]  }
 0x561   : > { %v7932_v46 = vld [vmem:[%s9356_s8 + $0xe8] ss:$16 sps:$4 sm:$0xff]  }
 0x562   : > { %5749 = vmatpush1.bf16.msra.mxu0 %v7824_v18  ;;  %5790 = vmatpush1.bf16.msra.mxu1 %v7827_v2  ;;  %v4841_v12 = vrot.slane %v4832_v50, %v8350_v23  ;;  %v4849_v52 = vrot.slane %v4832_v50, %v8379_v45  ;;  %v4837_v26 = vrot.slane %v4832_v50, %v8373_v41  ;;  %v7898_v18 = vld [vmem:[%s9356_s8 + $0x2c] ss:$16 sps:$4 sm:$0xff]  }
 0x563   : > { %5750 = vmatprep.subr.bf16.mxu0 %v7832_v20  ;;  %5791 = vmatprep.subr.bf16.mxu1 %v7835_v22  ;;  %v4845_v57 = vrot.slane %v4832_v50, %v8447_v53  ;;  %v7901_v2 = vld [vmem:[%s9356_s8 + $0x22c] ss:$16 sps:$4 sm:$0xff]   ;;  %v7896_v20 = vld [vmem:[%s9356_s8 + $0x28] ss:$16 sps:$4 sm:$0xff]  }
 0x564   : > { %v4855_v58 = vpack.c.bf16 %v4841_v12, %v4841_v12  ;;  %v4857_v59 = vpack.c.bf16 %v4849_v52, %v4849_v52  ;;  %v9116_v13 = vpack.c.bf16 %v4837_v26, %v4837_v26  ;;  %v7899_v22 = vld [vmem:[%s9356_s8 + $0x228] ss:$16 sps:$4 sm:$0xff]   ;;  %v7946_v12 = vld [vmem:[%s9356_s8 + $0x12c] ss:$16 sps:$4 sm:$0xff]  }
 0x565   : > { %v9118_v14 = vpack.c.bf16 %v4845_v57, %v4845_v57  ;;  %v7938_v50 = vld [vmem:[%s9356_s8 + $0x108] ss:$16 sps:$4 sm:$0xff]   ;;  %v7949_v52 = vld [vmem:[%s9356_s8 + $0x32c] ss:$16 sps:$4 sm:$0xff]  }
 0x566   : > { %5751 = vmatpush1.bf16.msra.mxu0 %v7830_v24  ;;  %5792 = vmatpush1.bf16.msra.mxu1 %v7833_v25  ;;  %v7904_v24 = vld [vmem:[%s9356_s8 + $0x4c] ss:$16 sps:$4 sm:$0xff]   ;;  %v7971_v57 = vld [vmem:[%s9356_s8 + $0x3a8] ss:$16 sps:$4 sm:$0xff]  }
 0x567   : > { %5752 = vmatprep.subr.bf16.mxu0 %v7838_v6  ;;  %5793 = vmatprep.subr.bf16.mxu1 %v7841_v27  ;;  %v7907_v25 = vld [vmem:[%s9356_s8 + $0x24c] ss:$16 sps:$4 sm:$0xff]   ;;  %v7902_v6 = vld [vmem:[%s9356_s8 + $0x48] ss:$16 sps:$4 sm:$0xff]  }
 0x568   : > { %5770 = vmatprep.mubr.bf16.mxu0 %v4855_v58  ;;  %5811 = vmatprep.mubr.bf16.mxu1 %v4857_v59  ;;  %v7905_v27 = vld [vmem:[%s9356_s8 + $0x248] ss:$16 sps:$4 sm:$0xff]   ;;  %v7970_v26 = vld [vmem:[%s9356_s8 + $0x1ac] ss:$16 sps:$4 sm:$0xff]  }
 0x56a   : > { %5753 = vmatpush1.bf16.msra.mxu0 %v7836_v28  ;;  %5794 = vmatpush1.bf16.msra.mxu1 %v7839_v29  ;;  %v7910_v28 = vld [vmem:[%s9356_s8 + $0x6c] ss:$16 sps:$4 sm:$0xff]  }
 0x56b   : > { %5754 = vmatprep.subr.bf16.mxu0 %v7844_v30  ;;  %5795 = vmatprep.subr.bf16.mxu1 %v7847_v31  ;;  %v7913_v29 = vld [vmem:[%s9356_s8 + $0x26c] ss:$16 sps:$4 sm:$0xff]   ;;  %v7908_v30 = vld [vmem:[%s9356_s8 + $0x68] ss:$16 sps:$4 sm:$0xff]  }
 0x56c   : > { %v7911_v31 = vld [vmem:[%s9356_s8 + $0x268] ss:$16 sps:$4 sm:$0xff]  }
 0x56e   : > { %5755 = vmatpush1.bf16.msra.mxu0 %v7842_v32  ;;  %5796 = vmatpush1.bf16.msra.mxu1 %v7845_v33  ;;  %v7916_v32 = vld [vmem:[%s9356_s8 + $0x8c] ss:$16 sps:$4 sm:$0xff]  }
 0x56f   : > { %5756 = vmatprep.subr.bf16.mxu0 %v7850_v7  ;;  %5797 = vmatprep.subr.bf16.mxu1 %v7853_v19  ;;  %v7919_v33 = vld [vmem:[%s9356_s8 + $0x28c] ss:$16 sps:$4 sm:$0xff]   ;;  %v7914_v7 = vld [vmem:[%s9356_s8 + $0x88] ss:$16 sps:$4 sm:$0xff]  }
 0x570   : > { %v7917_v19 = vld [vmem:[%s9356_s8 + $0x288] ss:$16 sps:$4 sm:$0xff]  }
 0x572   : > { %5757 = vmatpush1.bf16.msra.mxu0 %v7848_v21  ;;  %5798 = vmatpush1.bf16.msra.mxu1 %v7851_v35  ;;  %v7922_v21 = vld [vmem:[%s9356_s8 + $0xac] ss:$16 sps:$4 sm:$0xff]  }
 0x573   : > { %5758 = vmatprep.subr.bf16.mxu0 %v7856_v36  ;;  %5799 = vmatprep.subr.bf16.mxu1 %v7859_v37  ;;  %v7925_v35 = vld [vmem:[%s9356_s8 + $0x2ac] ss:$16 sps:$4 sm:$0xff]   ;;  %v7920_v36 = vld [vmem:[%s9356_s8 + $0xa8] ss:$16 sps:$4 sm:$0xff]  }
 0x574   : > { %v7923_v37 = vld [vmem:[%s9356_s8 + $0x2a8] ss:$16 sps:$4 sm:$0xff]  }
 0x576   : > { %5759 = vmatpush1.bf16.msra.mxu0 %v7854_v38  ;;  %5800 = vmatpush1.bf16.msra.mxu1 %v7857_v39  ;;  %v7928_v38 = vld [vmem:[%s9356_s8 + $0xcc] ss:$16 sps:$4 sm:$0xff]  }
 0x577   : > { %5760 = vmatprep.subr.bf16.mxu0 %v7862_v40  ;;  %5801 = vmatprep.subr.bf16.mxu1 %v7865_v42  ;;  %v7931_v39 = vld [vmem:[%s9356_s8 + $0x2cc] ss:$16 sps:$4 sm:$0xff]   ;;  %v7926_v40 = vld [vmem:[%s9356_s8 + $0xc8] ss:$16 sps:$4 sm:$0xff]  }
 0x578   : > { %v7929_v42 = vld [vmem:[%s9356_s8 + $0x2c8] ss:$16 sps:$4 sm:$0xff]  }
 0x57a   : > { %5761 = vmatpush1.bf16.msra.mxu0 %v7860_v47  ;;  %5802 = vmatpush1.bf16.msra.mxu1 %v7863_v48  ;;  %v7935_v47 = vld [vmem:[%s9356_s8 + $0x2e8] ss:$16 sps:$4 sm:$0xff]   ;;  %v7940_v48 = vld [vmem:[%s9356_s8 + $0x10c] ss:$16 sps:$4 sm:$0xff]  }
 0x57b   : > { %5762 = vmatprep.subr.bf16.mxu0 %v7868_v49  ;;  %5803 = vmatprep.subr.bf16.mxu1 %v7871_v51  ;;  %v7943_v49 = vld [vmem:[%s9356_s8 + $0x30c] ss:$16 sps:$4 sm:$0xff]   ;;  %v7941_v51 = vld [vmem:[%s9356_s8 + $0x308] ss:$16 sps:$4 sm:$0xff]  }
 0x57e   : > { %5763 = vmatpush1.bf16.msra.mxu0 %v7866_v54  ;;  %5804 = vmatpush1.bf16.msra.mxu1 %v7869_v55  ;;  %v7944_v54 = vld [vmem:[%s9356_s8 + $0x128] ss:$16 sps:$4 sm:$0xff]  }
 0x57f   : > { %5764 = vmatprep.subr.bf16.mxu0 %v7874_v56  ;;  %5805 = vmatprep.subr.bf16.mxu1 %v7877_v60  ;;  %v7947_v55 = vld [vmem:[%s9356_s8 + $0x328] ss:$16 sps:$4 sm:$0xff]   ;;  %v7952_v56 = vld [vmem:[%s9356_s8 + $0x14c] ss:$16 sps:$4 sm:$0xff]  }
 0x580   : > { %v7953_v60 = vld [vmem:[%s9356_s8 + $0x348] ss:$16 sps:$4 sm:$0xff]  }
 0x582   : > { %5765 = vmatpush1.bf16.msra.mxu0 %v7872_v61  ;;  %5806 = vmatpush1.bf16.msra.mxu1 %v7875_v62  ;;  %v7958_v61 = vld [vmem:[%s9356_s8 + $0x16c] ss:$16 sps:$4 sm:$0xff]  }
 0x583   : > { %5766 = vmatprep.subr.bf16.mxu0 %v7880_v63  ;;  %5807 = vmatprep.subr.bf16.mxu1 %v7883_v0  ;;  %v7961_v62 = vld [vmem:[%s9356_s8 + $0x36c] ss:$16 sps:$4 sm:$0xff]   ;;  %v7956_v63 = vld [vmem:[%s9356_s8 + $0x168] ss:$16 sps:$4 sm:$0xff]  }
 0x584   : > { %v7959_v0 = vld [vmem:[%s9356_s8 + $0x368] ss:$16 sps:$4 sm:$0xff]  }
 0x586   : > { %5767 = vmatpush1.bf16.msra.mxu0 %v7878_v1  ;;  %5808 = vmatpush1.bf16.msra.mxu1 %v7881_v3  ;;  %v7964_v1 = vld [vmem:[%s9356_s8 + $0x18c] ss:$16 sps:$4 sm:$0xff]  }
 0x587   : > { %5768 = vmatprep.subr.bf16.mxu0 %v7886_v4  ;;  %5809 = vmatprep.subr.bf16.mxu1 %v7889_v5  ;;  %v7967_v3 = vld [vmem:[%s9356_s8 + $0x38c] ss:$16 sps:$4 sm:$0xff]   ;;  %v7962_v4 = vld [vmem:[%s9356_s8 + $0x188] ss:$16 sps:$4 sm:$0xff]  }
 0x588   : > { %v7965_v5 = vld [vmem:[%s9356_s8 + $0x388] ss:$16 sps:$4 sm:$0xff]  }
 0x58a   : > { %5769 = vmatpush1.bf16.msra.mxu0 %v7884_v8  ;;  %5810 = vmatpush1.bf16.msra.mxu1 %v7887_v9  ;;  %v7973_v8 = vld [vmem:[%s9356_s8 + $0x3ac] ss:$16 sps:$4 sm:$0xff]   ;;  %v7968_v9 = vld [vmem:[%s9356_s8 + $0x1a8] ss:$16 sps:$4 sm:$0xff]  }
 0x58b   : > { %5820 = vmatprep.subr.bf16.mxu0 %v7892_v10  ;;  %5861 = vmatprep.subr.bf16.mxu1 %v7895_v11  ;;  %v7976_v10 = vld [vmem:[%s9356_s8 + $0x1cc] ss:$16 sps:$4 sm:$0xff]  }
 0x58c   : > { %v7979_v11 = vld [vmem:[%s9356_s8 + $0x3cc] ss:$16 sps:$4 sm:$0xff]  }
 0x58d   : > { %5771 = vmatmul.mubr.bf16.vlgmr.msra.gmra.mrb[4].mxu0 %v9116_v13  ;;  %5812 = vmatmul.mubr.bf16.vlgmr.msra.gmra.mrb[4].mxu1 %v9118_v14 }
 0x58e   : > { %5821 = vmatpush1.bf16.msra.mxu0 %v7890_v15  ;;  %5862 = vmatpush1.bf16.msra.mxu1 %v7893_v17  ;;  %v7974_v15 = vld [vmem:[%s9356_s8 + $0x1c8] ss:$16 sps:$4 sm:$0xff]  }
 0x58f   : > { %5822 = vmatprep.subr.bf16.mxu0 %v7898_v18  ;;  %5863 = vmatprep.subr.bf16.mxu1 %v7901_v2  ;;  %v7977_v17 = vld [vmem:[%s9356_s8 + $0x3c8] ss:$16 sps:$4 sm:$0xff]   ;;  %v7982_v18 = vld [vmem:[%s9356_s8 + $0x1ec] ss:$16 sps:$4 sm:$0xff]  }
 0x590   : > { %5852 = vmatprep.mubr.bf16.mxu0 %v4855_v58  ;;  %5893 = vmatprep.mubr.bf16.mxu1 %v4857_v59  ;;  %v7955_v58 = vld [vmem:[%s9356_s8 + $0x34c] ss:$16 sps:$4 sm:$0xff]   ;;  %v7950_v59 = vld [vmem:[%s9356_s8 + $0x148] ss:$16 sps:$4 sm:$0xff]  }
 0x591   : > { %v7985_v2 = vld [vmem:[%s9356_s8 + $0x3ec] ss:$16 sps:$4 sm:$0xff]  }
 0x592   : > { %5823 = vmatpush1.bf16.msra.mxu0 %v7896_v20  ;;  %5864 = vmatpush1.bf16.msra.mxu1 %v7899_v22  ;;  %v7980_v20 = vld [vmem:[%s9356_s8 + $0x1e8] ss:$16 sps:$4 sm:$0xff]  }
 0x593   : > { %5824 = vmatprep.subr.bf16.mxu0 %v7904_v24  ;;  %5865 = vmatprep.subr.bf16.mxu1 %v7907_v25  ;;  %v7983_v22 = vld [vmem:[%s9356_s8 + $0x3e8] ss:$16 sps:$4 sm:$0xff]  }
 0x596   : > { %5825 = vmatpush1.bf16.msra.mxu0 %v7902_v6  ;;  %5866 = vmatpush1.bf16.msra.mxu1 %v7905_v27 }
 0x597   : > { %5826 = vmatprep.subr.bf16.mxu0 %v7910_v28  ;;  %5867 = vmatprep.subr.bf16.mxu1 %v7913_v29 }
 0x59a   : > { %5827 = vmatpush1.bf16.msra.mxu0 %v7908_v30  ;;  %5868 = vmatpush1.bf16.msra.mxu1 %v7911_v31 }
 0x59b   : > { %5828 = vmatprep.subr.bf16.mxu0 %v7916_v32  ;;  %5869 = vmatprep.subr.bf16.mxu1 %v7919_v33  ;;  %v5902_v32 = vld [vmem:[%s9358_s10] sm:$0xf] }
 0x59e   : > { %5829 = vmatpush1.bf16.msra.mxu0 %v7914_v7  ;;  %5870 = vmatpush1.bf16.msra.mxu1 %v7917_v19 }
 0x59f   : > { %5830 = vmatprep.subr.bf16.mxu0 %v7922_v21  ;;  %5871 = vmatprep.subr.bf16.mxu1 %v7925_v35  ;;  %v5907_v21 = vrot.slane %v5902_v32, %v8373_v41  ;;  %v5915_v41 = vrot.slane %v5902_v32, %v8447_v53 }
 0x5a2   : > { %5831 = vmatpush1.bf16.msra.mxu0 %v7920_v36  ;;  %5872 = vmatpush1.bf16.msra.mxu1 %v7923_v37  ;;  %v5911_v36 = vrot.slane %v5902_v32, %v8350_v23  ;;  %v5919_v23 = vrot.slane %v5902_v32, %v8379_v45 }
 0x5a3   : > { %5832 = vmatprep.subr.bf16.mxu0 %v7928_v38  ;;  %5873 = vmatprep.subr.bf16.mxu1 %v7931_v39 }
 0x5a6   : > { %5833 = vmatpush1.bf16.msra.mxu0 %v7926_v40  ;;  %5874 = vmatpush1.bf16.msra.mxu1 %v7929_v42 }
 0x5a7   : > { %5834 = vmatprep.subr.bf16.mxu0 %v7934_v43  ;;  %5875 = vmatprep.subr.bf16.mxu1 %v7937_v44 }
 0x5aa   : > { %5835 = vmatpush1.bf16.msra.mxu0 %v7932_v46  ;;  %5876 = vmatpush1.bf16.msra.mxu1 %v7935_v47 }
 0x5ab   : > { %5836 = vmatprep.subr.bf16.mxu0 %v7940_v48  ;;  %5877 = vmatprep.subr.bf16.mxu1 %v7943_v49 }
 0x5ae   : > { %5837 = vmatpush1.bf16.msra.mxu0 %v7938_v50  ;;  %5878 = vmatpush1.bf16.msra.mxu1 %v7941_v51 }
 0x5af   : > { %5838 = vmatprep.subr.bf16.mxu0 %v7946_v12  ;;  %5879 = vmatprep.subr.bf16.mxu1 %v7949_v52 }
 0x5b2   : > { %5839 = vmatpush1.bf16.msra.mxu0 %v7944_v54  ;;  %5880 = vmatpush1.bf16.msra.mxu1 %v7947_v55 }
 0x5b3   : > { %5840 = vmatprep.subr.bf16.mxu0 %v7952_v56  ;;  %5881 = vmatprep.subr.bf16.mxu1 %v7955_v58 }
 0x5b6   : > { %5841 = vmatpush1.bf16.msra.mxu0 %v7950_v59  ;;  %5882 = vmatpush1.bf16.msra.mxu1 %v7953_v60 }
 0x5b7   : > { %5842 = vmatprep.subr.bf16.mxu0 %v7958_v61  ;;  %5883 = vmatprep.subr.bf16.mxu1 %v7961_v62 }
 0x5ba   : > { %5843 = vmatpush1.bf16.msra.mxu0 %v7956_v63  ;;  %5884 = vmatpush1.bf16.msra.mxu1 %v7959_v0 }
 0x5bb   : > { %5844 = vmatprep.subr.bf16.mxu0 %v7964_v1  ;;  %5885 = vmatprep.subr.bf16.mxu1 %v7967_v3 }
 0x5be   : > { %5845 = vmatpush1.bf16.msra.mxu0 %v7962_v4  ;;  %5886 = vmatpush1.bf16.msra.mxu1 %v7965_v5 }
 0x5bf   : > { %5846 = vmatprep.subr.bf16.mxu0 %v7970_v26  ;;  %5887 = vmatprep.subr.bf16.mxu1 %v7973_v8 }
 0x5c2   : > { %5847 = vmatpush1.bf16.msra.mxu0 %v7968_v9  ;;  %5888 = vmatpush1.bf16.msra.mxu1 %v7971_v57 }
 0x5c3   : > { %5848 = vmatprep.subr.bf16.mxu0 %v7976_v10  ;;  %5889 = vmatprep.subr.bf16.mxu1 %v7979_v11 }
 0x5c6   : > { %5849 = vmatpush1.bf16.msra.mxu0 %v7974_v15  ;;  %5890 = vmatpush1.bf16.msra.mxu1 %v7977_v17 }
 0x5c7   : > { %5850 = vmatprep.subr.bf16.mxu0 %v7982_v18  ;;  %5891 = vmatprep.subr.bf16.mxu1 %v7985_v2 }
 0x5ca   : > { %5851 = vmatpush1.bf16.msra.mxu0 %v7980_v20  ;;  %5892 = vmatpush1.bf16.msra.mxu1 %v7983_v22 }
 0x5cd   : > { %5853 = vmatmul.mubr.bf16.vlgmr.msra.gmra.mrb[8].mxu0 %v9116_v13  ;;  %5894 = vmatmul.mubr.bf16.vlgmr.msra.gmra.mrb[8].mxu1 %v9118_v14 }
 0x620   : > { %v5050_v24 = vpop.f32.mrb[0].mxu0  ;;  %v5091_v25 = vpop.f32.mrb[0].mxu1 }
 0x621   : > { %v5052_v6 = vpop.f32.mrb[1].mxu0  ;;  %v5093_v27 = vpop.f32.mrb[1].mxu1 }
 0x622   : > { %v5054_v28 = vpop.f32.mrb[2].mxu0  ;;  %v5095_v29 = vpop.f32.mrb[2].mxu1 }
 0x623   : > { %v5055_v30 = vpop.f32.mrb[3].mxu0  ;;  %v5096_v31 = vpop.f32.mrb[3].mxu1 }
 0x660   : > { %v5772_v33 = vpop.f32.mrb[4].mxu0  ;;  %v5813_v19 = vpop.f32.mrb[4].mxu1 }
 0x661   : > { %v5773_v7 = vadd.f32 %v5772_v33, %v5050_v24  ;;  %v5774_v13 = vpop.f32.mrb[5].mxu0  ;;  %v5815_v14 = vpop.f32.mrb[5].mxu1 }
 0x662   : > { %v5775_v35 = vadd.f32 %v5774_v13, %v5052_v6  ;;  %v5776_v37 = vpop.f32.mrb[6].mxu0  ;;  %v5817_v39 = vpop.f32.mrb[6].mxu1 }
 0x663   : > { %v5814_v38 = vadd.f32 %v5813_v19, %v5773_v7  ;;  %v5777_v40 = vpop.f32.mrb[7].mxu0  ;;  %v5818_v43 = vpop.f32.mrb[7].mxu1 }
 0x664   : > { %v5816_v42 = vadd.f32 %v5815_v14, %v5775_v35 }
 0x665   : > { %v5924_v44 = vadd.f32 %v5907_v21, %v5814_v38 }
 0x666   : > { %v5925_v46 = vadd.f32 %v5911_v36, %v5816_v42 }
 0x667   : > { %v5928_v47 = vmax.f32 %v5924_v44, 0.0 }
 0x668   : > { %v5929_v48 = vmax.f32 %v5925_v46, 0.0 }
 0x66a   : > { %v5936_v49 = vcombine.low %v5928_v47, %v5929_v48 }
 0x66c   : > { %v5944_v5 = vrot.slane %v5936_v49, %v8886_v34 }
 0x6a0   : > { %v5854_v50 = vpop.f32.mrb[8].mxu0  ;;  %v5895_v12 = vpop.f32.mrb[8].mxu1 }
 0x6a1   : > { %v5855_v51 = vadd.f32 %v5854_v50, %v5091_v25  ;;  %v5856_v52 = vpop.f32.mrb[9].mxu0  ;;  %v5897_v55 = vpop.f32.mrb[9].mxu1 }
 0x6a2   : > { %v5857_v54 = vadd.f32 %v5856_v52, %v5093_v27  ;;  %v5858_v56 = vpop.f32.mrb[10].mxu0  ;;  %v5899_v59 = vpop.f32.mrb[10].mxu1 }
 0x6a3   : > { %v5896_v58 = vadd.f32 %v5895_v12, %v5855_v51  ;;  %v5859_v60 = vpop.f32.mrb[11].mxu0  ;;  %v5900_v62 = vpop.f32.mrb[11].mxu1 }
 0x6a4   : > { %v5898_v61 = vadd.f32 %v5897_v55, %v5857_v54 }
 0x6a5   : > { %v5926_v63 = vadd.f32 %v5915_v41, %v5896_v58 }
 0x6a6   : > { %v5927_v0 = vadd.f32 %v5919_v23, %v5898_v61 }
 0x6a7   : > { %v5930_v1 = vmax.f32 %v5926_v63, 0.0 }
 0x6a8   : > { %v5931_v3 = vmax.f32 %v5927_v0, 0.0 }
 0x6aa   : > { %v5937_v4 = vcombine.low %v5930_v1, %v5931_v3 }
 0x6ac   : > { %v5951_v53 = vrot.slane %v5937_v4, %v8886_v34 }
 0x6ae   : > { %v5952_v26 = vcombine.low %v5944_v5, %v5951_v53 }
 0x6b0   : > { %v5959_v8 = vrot.slane %v5952_v26, %v8886_v34 }
 0x6b2   : > { %5961 = vst.msk [vmem:[#allocation4] sm:$0xf] %vm8892_vm8, %v5959_v8 }
 0x6b3 PF: > { %p7000_p7 = scmp.eq.s32.totalorder %s8098_s18, 3  ;;  %s8031_s14 = smov [#allocation4]  }
 0x6b4   : > { %s5969_s15 = sshll.u32 %s8031_s14, 4  ;;  %s5970_s15 = int_to_ptr.vmem [resolvable:$true] %s5969_s15 }
 0x6b5   : > { %s7986_s16 = scalar_lea.vmem %s5970_s15, 64  ;;  %p7993_p11 = scmp.lt.s32.totalorder %s5970_s15, %s5970_s15 }
 0x6b6   : > { %p7987_p8 = scmp.ne.s32.totalorder %s5970_s15, %s7986_s16  ;;  %p7994_p12 = scmp.lt.s32.totalorder %s7986_s16, %s7986_s16 }
 0x6b8   : > { %p7988_p9 = pnand %p7987_p8, %p7000_p7  ;;  %p7995_p13 = por %p7994_p12, %p7993_p11 }
 0x6ba   : > { %p7989_p10 = pneg %p7988_p9 }
 0x6bc   : > { %p7996_p0 = pnand %p7995_p13, %p7989_p10 }
 0x6be   : > { %7999 = shalt.err (!%p7996_p0)
}
 0x6bf   : > { %s8000_s27 = scalar_lea.hbm %s9359_s11, 64 }
 0x6c0   : > { %p8001_p1 = scmp.ne.s32.totalorder %s9359_s11, %s8000_s27  ;;  %p8006_p4 = scmp.lt.u32.totalorder %s8000_s27, %s9359_s11 }
 0x6c2   : > { %p8002_p2 = pnand %p8001_p1, %p7000_p7 }
 0x6c4   : > { %p8003_p3 = pneg %p8002_p2 }
 0x6c6   : > { %p8008_p5 = pnand %p8006_p4, %p8003_p3 }
 0x6c8   : > { %8011 = shalt.err (!%p8008_p5)
}
 0x6c9   : > { %6997 = dma.vmem_to_hbm [thread:$0]  (%p7000_p7), %s5970_s15, 64, %s9359_s11, [#allocation5]  }
 0x6ca   : > { %8017 = dma.done.wait (%p7000_p7), [#allocation5], 64  }
 0x6cb   : > { %8019 = vsyncadd (%p7000_p7), [#allocation5], 4294967232 }
 0x6cc PF: > { %s22_s17 = sadd.s32 1, %s8022_s17  }
 0x6cd   : > { %p19_p6 = scmp.ge.s32.totalorder %s22_s17, 6  }
 0x6cf   :  { %21 = sbr.rel (!%p19_p6) target bundleno = 1 (0x1), region = 106 }
 0x6d6   :  { %5982 = vsyncpa [#allocation5], 1 }
 0x6d7   :  { %5984 = vsyncpa [#allocation5 + $0x1], 1 }

</bundles_post_ra>
